<compile_context>
chip_gen: v5e
topology: v5e:2x2
jax: 0.10.0
libtpu: 0.0.40
codegen_flags: <defaults>
</compile_context>

<pallas_src>
import functools

import jax
import jax.numpy as jnp
from jax.experimental import pallas as pl
from jax.experimental.pallas import tpu as pltpu


_CPAD = 128  # channel / contraction dimensions padded to one full lane tile


# ---------------------------------------------------------------------------
# Fused Pallas kernel: conv1..conv5 for one image per grid step.
# Activations are flat (H*W, 128) matrices (spatial rows -> sublanes,
# channels -> lanes).
# ---------------------------------------------------------------------------
def _detectnet_kernel(x_ref, w1_ref, b1_ref, w2_ref, b2_ref, w3_ref, b3_ref,
                      w4_ref, b4_ref, w5_ref, b5_ref, c1_ref, c2_ref, c3_ref,
                      o_ref, buf_ref, *, H, W):
    C = buf_ref.shape[1]  # 128

    def conv3x3_relu(x_val, w_ref, b_ref, h, w):
        """Same-padded 3x3 conv + bias + ReLU on a flat (h*w, 128) value."""
        m = h * w
        p = w + 1                                   # halo rows above/below
        # Halo-only zeroing: the centre is fully overwritten by x_val below.
        buf_ref[0:p, :] = jnp.zeros((p, C), jnp.float32)
        buf_ref[p + m:p + m + p, :] = jnp.zeros((p, C), jnp.float32)
        buf_ref[p:p + m, :] = x_val

        # Horizontal wrap masks, computed once per layer.
        col = jax.lax.broadcasted_iota(jnp.int32, (m, 1), 0) % w
        has_left = col >= 1
        has_right = col <= w - 2

        acc = None
        for dy in range(3):
            for dx in range(3):
                off = (dy - 1) * w + (dx - 1)
                src = buf_ref[p + off:p + off + m, :]     # shifted tap (m,128)
                if dx == 0:                               # left neighbour
                    src = jnp.where(has_left, src, 0.0)
                elif dx == 2:                             # right neighbour
                    src = jnp.where(has_right, src, 0.0)
                d = jnp.dot(src, w_ref[3 * dy + dx],
                            preferred_element_type=jnp.float32)
                acc = d if acc is None else acc + d       # vreg-resident
        return jnp.maximum(acc + b_ref[...], 0.0)         # bias fused here

    def maxpool2(y, c_ref, h, w):
        """2x2/2 max-pool of a (h*w,128) value.

        y is parked once in buf_ref[0:m]; a (w+1)-row zero halo below makes
        the three shifted corner reads in-bounds/finite; a single one-hot
        compaction matmul keeps the even/even anchor rows.
        """
        m = h * w
        buf_ref[m:m + w + 1, :] = jnp.zeros((w + 1, C), jnp.float32)
        buf_ref[0:m, :] = y
        v = jnp.maximum(y, buf_ref[1:1 + m, :])
        v = jnp.maximum(v, buf_ref[w:w + m, :])
        v = jnp.maximum(v, buf_ref[w + 1:w + 1 + m, :])
        return jnp.dot(c_ref[...], v, preferred_element_type=jnp.float32)

    # conv1: wrapper-side im2col -> one lane-dense dot.
    y = jnp.dot(x_ref[0], w1_ref[...], preferred_element_type=jnp.float32)
    y = jnp.maximum(y + b1_ref[...], 0.0)
    a = maxpool2(y, c1_ref, H, W)                              # (H*W/4, 128)
    a = conv3x3_relu(a, w2_ref, b2_ref, H // 2, W // 2)
    a = maxpool2(a, c2_ref, H // 2, W // 2)
    a = conv3x3_relu(a, w3_ref, b3_ref, H // 4, W // 4)
    a = maxpool2(a, c3_ref, H // 4, W // 4)
    a = conv3x3_relu(a, w4_ref, b4_ref, H // 8, W // 8)        # (H*W/64, 128)
    # conv5: 1x1 conv fused into the epilogue.
    out = jnp.dot(a, w5_ref[...], preferred_element_type=jnp.float32) + b5_ref[...]
    o_ref[0] = out.astype(o_ref.dtype)


# ---------------------------------------------------------------------------
# Wrapper-side parameter packing (pure XLA glue on tiny tensors, once/trace).
# ---------------------------------------------------------------------------
def _pool_compact(h, w):
    """(h*w/4, h*w) one-hot matrix selecting the top-left anchor of each 2x2."""
    hp, wp = h // 2, w // 2
    j = jnp.arange(hp * wp)
    base = (j // wp) * (2 * w) + (j % wp) * 2
    return jax.nn.one_hot(base, h * w, dtype=jnp.float32)


def _pack_conv_w(w):
    kh, kw, cin, cout = w.shape
    w = w.reshape(kh * kw, cin, cout).astype(jnp.float32)
    return jnp.pad(w, ((0, 0), (0, _CPAD - cin), (0, _CPAD - cout)))


def _pack_bias(b):
    return jnp.pad(b.astype(jnp.float32), (0, _CPAD - b.shape[0])).reshape(1, _CPAD)


# ---------------------------------------------------------------------------
# Parameters (deterministic synthetic init; shapes match the torch module)
# ---------------------------------------------------------------------------
def init_params(key):
    def conv_w(key, kh, kw, cin, cout):
        fan_in = kh * kw * cin
        return jax.random.normal(key, (kh, kw, cin, cout), jnp.float32) / jnp.sqrt(fan_in)

    keys = jax.random.split(key, 10)
    params = {
        "w1": conv_w(keys[0], 3, 3, 3, 32),  "b1": 0.01 * jax.random.normal(keys[1], (32,)),
        "w2": conv_w(keys[2], 3, 3, 32, 64), "b2": 0.01 * jax.random.normal(keys[3], (64,)),
        "w3": conv_w(keys[4], 3, 3, 64, 64), "b3": 0.01 * jax.random.normal(keys[5], (64,)),
        "w4": conv_w(keys[6], 3, 3, 64, 64), "b4": 0.01 * jax.random.normal(keys[7], (64,)),
        "w5": (jax.random.normal(keys[8], (64, 5), jnp.float32) / jnp.sqrt(64.0)),
        "b5": 0.01 * jax.random.normal(keys[9], (5,)),
    }
    return jax.tree.map(lambda t: t.astype(jnp.float32), params)


# ---------------------------------------------------------------------------
# Forward pass (PyTorch NCHW in / NCHW out) -- one fused pallas_call
# ---------------------------------------------------------------------------
@jax.jit
def detectnet_forward(x_nchw, params):
    n, cin, h, w = x_nchw.shape
    assert h % 8 == 0 and w % 8 == 0, "spatial dims must survive three 2x2 pools"

    # conv1 im2col in the wrapper: 9 taps x cin channels = 27 real lanes.
    x = jnp.transpose(x_nchw, (0, 2, 3, 1)).astype(jnp.float32)       # NHWC
    xp = jnp.pad(x, ((0, 0), (1, 1), (1, 1), (0, 0)))
    patches = [xp[:, dy:dy + h, dx:dx + w, :] for dy in range(3) for dx in range(3)]
    xi = jnp.concatenate(patches, axis=-1).reshape(n, h * w, 9 * cin)  # (n, HW, 27)
    xi = jnp.pad(xi, ((0, 0), (0, 0), (0, _CPAD - 9 * cin)))

    # conv1 weight as a single (128, 128) matrix matching the im2col ordering.
    w1 = params["w1"].astype(jnp.float32).reshape(9 * cin, -1)         # (27, 32)
    w1 = jnp.pad(w1, ((0, _CPAD - 9 * cin), (0, _CPAD - w1.shape[1])))
    b1 = _pack_bias(params["b1"])
    w2, b2 = _pack_conv_w(params["w2"]), _pack_bias(params["b2"])
    w3, b3 = _pack_conv_w(params["w3"]), _pack_bias(params["b3"])
    w4, b4 = _pack_conv_w(params["w4"]), _pack_bias(params["b4"])
    w5 = jnp.pad(params["w5"].astype(jnp.float32),
                 ((0, _CPAD - params["w5"].shape[0]), (0, 0)))          # (128, 5)
    b5 = params["b5"].astype(jnp.float32).reshape(1, -1)                # (1, 5)

    c1 = _pool_compact(h, w)
    c2 = _pool_compact(h // 2, w // 2)
    c3 = _pool_compact(h // 4, w // 4)

    cout = w5.shape[1]
    hw_out = (h // 8) * (w // 8)

    # Scratch rows: pool-1 needs H*W + (W+1); each conv k needs m_k + 2*(w_k+1).
    buf_rows = max(h * w + w + 1,
                   (h // 2) * (w // 2) + 2 * (w // 2 + 1),
                   (h // 4) * (w // 4) + 2 * (w // 4 + 1),
                   (h // 8) * (w // 8) + 2 * (w // 8 + 1))
    buf_rows = ((buf_rows + 7) // 8) * 8

    def const_spec(arr):
        return pl.BlockSpec(arr.shape, lambda i, _nd=arr.ndim: (0,) * _nd)

    kernel = functools.partial(_detectnet_kernel, H=h, W=w)

    out = pl.pallas_call(
        kernel,
        out_shape=jax.ShapeDtypeStruct((n, hw_out, cout), jnp.float32),
        grid_spec=pltpu.PrefetchScalarGridSpec(
            num_scalar_prefetch=0,
            grid=(n,),
            in_specs=[
                pl.BlockSpec((1, h * w, _CPAD), lambda i: (i, 0, 0)),
                const_spec(w1), const_spec(b1),
                const_spec(w2), const_spec(b2),
                const_spec(w3), const_spec(b3),
                const_spec(w4), const_spec(b4),
                const_spec(w5), const_spec(b5),
                const_spec(c1), const_spec(c2), const_spec(c3),
            ],
            out_specs=pl.BlockSpec((1, hw_out, cout), lambda i: (i, 0, 0)),
            scratch_shapes=[
                pltpu.VMEM((buf_rows, _CPAD), jnp.float32),   # halo / pool buffer
            ],
        ),
        compiler_params=pltpu.CompilerParams(
            dimension_semantics=("parallel",),
            vmem_limit_bytes=32 * 1024 * 1024,
        ),
    )(xi, w1, b1, w2, b2, w3, b3, w4, b4, w5, b5, c1, c2, c3)

    out = out.reshape(n, h // 8, w // 8, cout)
    return jnp.transpose(out, (0, 3, 1, 2))                    # NHWC -> NCHW


# ---------------------------------------------------------------------------
# Pure-JAX reference (for correctness check of the Pallas path)
# ---------------------------------------------------------------------------
def _ref_forward(x_nchw, params):
    x = jnp.transpose(x_nchw, (0, 2, 3, 1))

    def conv(x, w, b, pad):
        y = jax.lax.conv_general_dilated(
            x, w, window_strides=(1, 1), padding=pad,
            dimension_numbers=("NHWC", "HWIO", "NHWC"))
        return y + b.reshape(1, 1, 1, -1)

    def pool(x):
        return jax.lax.reduce_window(
            x, -jnp.inf, jax.lax.max, (1, 2, 2, 1), (1, 2, 2, 1), "VALID")

    x = pool(jax.nn.relu(conv(x, params["w1"], params["b1"], "SAME")))
    x = pool(jax.nn.relu(conv(x, params["w2"], params["b2"], "SAME")))
    x = pool(jax.nn.relu(conv(x, params["w3"], params["b3"], "SAME")))
    x = jax.nn.relu(conv(x, params["w4"], params["b4"], "SAME"))
    x = conv(x, params["w5"].reshape(1, 1, 64, 5), params["b5"], "VALID")
    return jnp.transpose(x, (0, 3, 1, 2))


if __name__ == "__main__":
    key = jax.random.PRNGKey(0)
    k_x, k_p = jax.random.split(key)

    # Small input consistent with the module: NCHW, 3 input channels.
    x = jax.random.normal(k_x, (2, 3, 16, 16), jnp.float32)
    params = init_params(k_p)

    out = jax.block_until_ready(detectnet_forward(x, params))
    assert out.shape == (2, 5, 2, 2), out.shape

    ref = _ref_forward(x, params)
    err = float(jnp.max(jnp.abs(out - ref)))
    assert jnp.allclose(out, ref, atol=5e-4, rtol=5e-4), err

    print("KERNEL_OK")
</pallas_src>

<mosaic_0001>
module attributes {stable_mosaic.version = 11 : i64} {
  func.func @_detectnet_kernel(%arg0: i32, %arg1: memref<1x256x128xf32, #tpu.memory_space<vmem>>, %arg2: memref<128x128xf32, #tpu.memory_space<vmem>>, %arg3: memref<1x128xf32, #tpu.memory_space<vmem>>, %arg4: memref<9x128x128xf32, #tpu.memory_space<vmem>>, %arg5: memref<1x128xf32, #tpu.memory_space<vmem>>, %arg6: memref<9x128x128xf32, #tpu.memory_space<vmem>>, %arg7: memref<1x128xf32, #tpu.memory_space<vmem>>, %arg8: memref<9x128x128xf32, #tpu.memory_space<vmem>>, %arg9: memref<1x128xf32, #tpu.memory_space<vmem>>, %arg10: memref<128x5xf32, #tpu.memory_space<vmem>>, %arg11: memref<1x5xf32, #tpu.memory_space<vmem>>, %arg12: memref<64x256xf32, #tpu.memory_space<vmem>>, %arg13: memref<16x64xf32, #tpu.memory_space<vmem>>, %arg14: memref<4x16xf32, #tpu.memory_space<vmem>>, %arg15: memref<1x4x5xf32, #tpu.memory_space<vmem>>, %arg16: memref<280x128xf32, #tpu.memory_space<vmem>>) attributes {dimension_semantics = [#tpu.dimension_semantics<parallel>], iteration_bounds = array<i64: 2>, scalar_prefetch = 0 : i64, scratch_operands = 1 : i64, tpu.core_type = #tpu.core_type<tc>, window_params = [{transform_indices = @transform_0, window_bounds = array<i64: 1, 256, 128>}, {pipeline_mode = #tpu.pipeline_mode<synchronous>, transform_indices = @transform_1, window_bounds = array<i64: 128, 128>}, {pipeline_mode = #tpu.pipeline_mode<synchronous>, transform_indices = @transform_2, window_bounds = array<i64: 1, 128>}, {pipeline_mode = #tpu.pipeline_mode<synchronous>, transform_indices = @transform_3, window_bounds = array<i64: 9, 128, 128>}, {pipeline_mode = #tpu.pipeline_mode<synchronous>, transform_indices = @transform_4, window_bounds = array<i64: 1, 128>}, {pipeline_mode = #tpu.pipeline_mode<synchronous>, transform_indices = @transform_5, window_bounds = array<i64: 9, 128, 128>}, {pipeline_mode = #tpu.pipeline_mode<synchronous>, transform_indices = @transform_6, window_bounds = array<i64: 1, 128>}, {pipeline_mode = #tpu.pipeline_mode<synchronous>, transform_indices = @transform_7, window_bounds = array<i64: 9, 128, 128>}, {pipeline_mode = #tpu.pipeline_mode<synchronous>, transform_indices = @transform_8, window_bounds = array<i64: 1, 128>}, {pipeline_mode = #tpu.pipeline_mode<synchronous>, transform_indices = @transform_9, window_bounds = array<i64: 128, 5>}, {pipeline_mode = #tpu.pipeline_mode<synchronous>, transform_indices = @transform_10, window_bounds = array<i64: 1, 5>}, {pipeline_mode = #tpu.pipeline_mode<synchronous>, transform_indices = @transform_11, window_bounds = array<i64: 64, 256>}, {pipeline_mode = #tpu.pipeline_mode<synchronous>, transform_indices = @transform_12, window_bounds = array<i64: 16, 64>}, {pipeline_mode = #tpu.pipeline_mode<synchronous>, transform_indices = @transform_13, window_bounds = array<i64: 4, 16>}, {transform_indices = @transform_14, window_bounds = array<i64: 1, 4, 5>}]} {
    %c0 = arith.constant 0 : index
    %c0_0 = arith.constant 0 : index
    %c0_1 = arith.constant 0 : index
    %0 = vector.load %arg1[%c0, %c0_0, %c0_1] : memref<1x256x128xf32, #tpu.memory_space<vmem>>, vector<1x256x128xf32>
    %1 = vector.shape_cast %0 : vector<1x256x128xf32> to vector<256x128xf32>
    %c0_2 = arith.constant 0 : index
    %c0_3 = arith.constant 0 : index
    %2 = vector.load %arg2[%c0_2, %c0_3] : memref<128x128xf32, #tpu.memory_space<vmem>>, vector<128x128xf32>
    %cst = arith.constant dense<0.000000e+00> : vector<256x128xf32>
    %3 = tpu.matmul %1, %2, %cst {dimension_numbers = #tpu.dot_dimension_numbers<[1], [0], [0], [1], [0, 0, 1, 1], [], []>} : vector<256x128xf32>, vector<128x128xf32>, vector<256x128xf32> -> vector<256x128xf32>
    %c0_4 = arith.constant 0 : index
    %c0_5 = arith.constant 0 : index
    %4 = vector.load %arg3[%c0_4, %c0_5] : memref<1x128xf32, #tpu.memory_space<vmem>>, vector<1x128xf32>
    %5 = vector.broadcast %4 : vector<1x128xf32> to vector<256x128xf32>
    %6 = arith.addf %3, %5 : vector<256x128xf32>
    %cst_6 = arith.constant 0.000000e+00 : f32
    %7 = vector.broadcast %cst_6 : f32 to vector<256x128xf32>
    %8 = arith.maximumf %6, %7 : vector<256x128xf32>
    %cst_7 = arith.constant 0.000000e+00 : f32
    %9 = vector.broadcast %cst_7 : f32 to vector<17x128xf32>
    %c256 = arith.constant 256 : index
    %c0_8 = arith.constant 0 : index
    %10 = vector.load %arg16[%c256, %c0_8] : memref<280x128xf32, #tpu.memory_space<vmem>>, vector<17x128xf32>
    tpu.vector_store %arg16[%c256, %c0_8], %9 {strides = array<i32>} : memref<280x128xf32, #tpu.memory_space<vmem>>, vector<17x128xf32>,
    %c0_9 = arith.constant 0 : index
    %c0_10 = arith.constant 0 : index
    %11 = vector.load %arg16[%c0_9, %c0_10] : memref<280x128xf32, #tpu.memory_space<vmem>>, vector<256x128xf32>
    tpu.vector_store %arg16[%c0_9, %c0_10], %8 {strides = array<i32>} : memref<280x128xf32, #tpu.memory_space<vmem>>, vector<256x128xf32>,
    %c1 = arith.constant 1 : index
    %c0_11 = arith.constant 0 : index
    %12 = vector.load %arg16[%c1, %c0_11] : memref<280x128xf32, #tpu.memory_space<vmem>>, vector<256x128xf32>
    %13 = arith.maximumf %8, %12 : vector<256x128xf32>
    %c16 = arith.constant 16 : index
    %c0_12 = arith.constant 0 : index
    %14 = vector.load %arg16[%c16, %c0_12] : memref<280x128xf32, #tpu.memory_space<vmem>>, vector<256x128xf32>
    %15 = arith.maximumf %13, %14 : vector<256x128xf32>
    %c17 = arith.constant 17 : index
    %c0_13 = arith.constant 0 : index
    %16 = vector.load %arg16[%c17, %c0_13] : memref<280x128xf32, #tpu.memory_space<vmem>>, vector<256x128xf32>
    %17 = arith.maximumf %15, %16 : vector<256x128xf32>
    %c0_14 = arith.constant 0 : index
    %c0_15 = arith.constant 0 : index
    %18 = vector.load %arg12[%c0_14, %c0_15] : memref<64x256xf32, #tpu.memory_space<vmem>>, vector<64x256xf32>
    %cst_16 = arith.constant dense<0.000000e+00> : vector<64x128xf32>
    %19 = tpu.matmul %18, %17, %cst_16 {dimension_numbers = #tpu.dot_dimension_numbers<[1], [0], [0], [1], [0, 0, 1, 1], [], []>} : vector<64x256xf32>, vector<256x128xf32>, vector<64x128xf32> -> vector<64x128xf32>
    %cst_17 = arith.constant 0.000000e+00 : f32
    %20 = vector.broadcast %cst_17 : f32 to vector<9x128xf32>
    %c0_18 = arith.constant 0 : index
    %c0_19 = arith.constant 0 : index
    %21 = vector.load %arg16[%c0_18, %c0_19] : memref<280x128xf32, #tpu.memory_space<vmem>>, vector<9x128xf32>
    tpu.vector_store %arg16[%c0_18, %c0_19], %20 {strides = array<i32>} : memref<280x128xf32, #tpu.memory_space<vmem>>, vector<9x128xf32>,
    %cst_20 = arith.constant 0.000000e+00 : f32
    %22 = vector.broadcast %cst_20 : f32 to vector<9x128xf32>
    %c73 = arith.constant 73 : index
    %c0_21 = arith.constant 0 : index
    %23 = vector.load %arg16[%c73, %c0_21] : memref<280x128xf32, #tpu.memory_space<vmem>>, vector<9x128xf32>
    tpu.vector_store %arg16[%c73, %c0_21], %22 {strides = array<i32>} : memref<280x128xf32, #tpu.memory_space<vmem>>, vector<9x128xf32>,
    %c9 = arith.constant 9 : index
    %c0_22 = arith.constant 0 : index
    %24 = vector.load %arg16[%c9, %c0_22] : memref<280x128xf32, #tpu.memory_space<vmem>>, vector<64x128xf32>
    tpu.vector_store %arg16[%c9, %c0_22], %19 {strides = array<i32>} : memref<280x128xf32, #tpu.memory_space<vmem>>, vector<64x128xf32>,
    %25 = tpu.iota {dimensions = array<i32: 0>} : vector<64x1xi32>
    %c8_i32 = arith.constant 8 : i32
    %c0_i32 = arith.constant 0 : i32
    %26 = arith.cmpi eq, %c8_i32, %c0_i32 : i32
    %c1_i32 = arith.constant 1 : i32
    %27 = arith.select %26, %c1_i32, %c8_i32 : i32
    %28 = vector.broadcast %27 : i32 to vector<64x1xi32>
    %29 = arith.remsi %25, %28 : vector<64x1xi32>
    %c0_i32_23 = arith.constant 0 : i32
    %30 = vector.broadcast %c0_i32_23 : i32 to vector<64x1xi32>
    %31 = arith.cmpi ne, %29, %30 : vector<64x1xi32>
    %c0_i32_24 = arith.constant 0 : i32
    %32 = vector.broadcast %c0_i32_24 : i32 to vector<64x1xi32>
    %33 = arith.cmpi slt, %29, %32 : vector<64x1xi32>
    %c0_i32_25 = arith.constant 0 : i32
    %34 = arith.cmpi slt, %27, %c0_i32_25 : i32
    %35 = vector.broadcast %34 : i1 to vector<64x1xi1>
    %36 = vector.broadcast %35 : vector<64x1xi1> to vector<64x1xi1>
    %37 = arith.xori %33, %36 : vector<64x1xi1>
    %38 = arith.andi %37, %31 : vector<64x1xi1>
    %39 = vector.broadcast %27 : i32 to vector<64x1xi32>
    %40 = arith.addi %29, %39 : vector<64x1xi32>
    %41 = arith.select %38, %40, %29 : vector<64x1xi1>, vector<64x1xi32>
    %c1_i32_26 = arith.constant 1 : i32
    %42 = vector.broadcast %c1_i32_26 : i32 to vector<64x1xi32>
    %43 = arith.cmpi sge, %41, %42 : vector<64x1xi32>
    %c6_i32 = arith.constant 6 : i32
    %44 = vector.broadcast %c6_i32 : i32 to vector<64x1xi32>
    %45 = arith.cmpi sle, %41, %44 : vector<64x1xi32>
    %c0_27 = arith.constant 0 : index
    %c0_28 = arith.constant 0 : index
    %46 = vector.load %arg16[%c0_27, %c0_28] : memref<280x128xf32, #tpu.memory_space<vmem>>, vector<64x128xf32>
    %cst_29 = arith.constant 0.000000e+00 : f32
    %47 = vector.shape_cast %43 : vector<64x1xi1> to vector<64x1xi1>
    %48 = vector.broadcast %47 : vector<64x1xi1> to vector<64x128xi1>
    %49 = vector.broadcast %cst_29 : f32 to vector<64x128xf32>
    %50 = arith.select %48, %46, %49 : vector<64x128xi1>, vector<64x128xf32>
    %c0_30 = arith.constant 0 : index
    %c0_31 = arith.constant 0 : index
    %c0_32 = arith.constant 0 : index
    %51 = vector.load %arg4[%c0_30, %c0_31, %c0_32] : memref<9x128x128xf32, #tpu.memory_space<vmem>>, vector<1x128x128xf32>
    %52 = vector.shape_cast %51 : vector<1x128x128xf32> to vector<128x128xf32>
    %cst_33 = arith.constant dense<0.000000e+00> : vector<64x128xf32>
    %53 = tpu.matmul %50, %52, %cst_33 {dimension_numbers = #tpu.dot_dimension_numbers<[1], [0], [0], [1], [0, 0, 1, 1], [], []>} : vector<64x128xf32>, vector<128x128xf32>, vector<64x128xf32> -> vector<64x128xf32>
    %c1_34 = arith.constant 1 : index
    %c0_35 = arith.constant 0 : index
    %54 = vector.load %arg16[%c1_34, %c0_35] : memref<280x128xf32, #tpu.memory_space<vmem>>, vector<64x128xf32>
    %c1_36 = arith.constant 1 : index
    %c0_37 = arith.constant 0 : index
    %c0_38 = arith.constant 0 : index
    %55 = vector.load %arg4[%c1_36, %c0_37, %c0_38] : memref<9x128x128xf32, #tpu.memory_space<vmem>>, vector<1x128x128xf32>
    %56 = vector.shape_cast %55 : vector<1x128x128xf32> to vector<128x128xf32>
    %cst_39 = arith.constant dense<0.000000e+00> : vector<64x128xf32>
    %57 = tpu.matmul %54, %56, %cst_39 {dimension_numbers = #tpu.dot_dimension_numbers<[1], [0], [0], [1], [0, 0, 1, 1], [], []>} : vector<64x128xf32>, vector<128x128xf32>, vector<64x128xf32> -> vector<64x128xf32>
    %58 = arith.addf %53, %57 : vector<64x128xf32>
    %c2 = arith.constant 2 : index
    %c0_40 = arith.constant 0 : index
    %59 = vector.load %arg16[%c2, %c0_40] : memref<280x128xf32, #tpu.memory_space<vmem>>, vector<64x128xf32>
    %cst_41 = arith.constant 0.000000e+00 : f32
    %60 = vector.shape_cast %45 : vector<64x1xi1> to vector<64x1xi1>
    %61 = vector.broadcast %60 : vector<64x1xi1> to vector<64x128xi1>
    %62 = vector.broadcast %cst_41 : f32 to vector<64x128xf32>
    %63 = arith.select %61, %59, %62 : vector<64x128xi1>, vector<64x128xf32>
    %c2_42 = arith.constant 2 : index
    %c0_43 = arith.constant 0 : index
    %c0_44 = arith.constant 0 : index
    %64 = vector.load %arg4[%c2_42, %c0_43, %c0_44] : memref<9x128x128xf32, #tpu.memory_space<vmem>>, vector<1x128x128xf32>
    %65 = vector.shape_cast %64 : vector<1x128x128xf32> to vector<128x128xf32>
    %cst_45 = arith.constant dense<0.000000e+00> : vector<64x128xf32>
    %66 = tpu.matmul %63, %65, %cst_45 {dimension_numbers = #tpu.dot_dimension_numbers<[1], [0], [0], [1], [0, 0, 1, 1], [], []>} : vector<64x128xf32>, vector<128x128xf32>, vector<64x128xf32> -> vector<64x128xf32>
    %67 = arith.addf %58, %66 : vector<64x128xf32>
    %c8 = arith.constant 8 : index
    %c0_46 = arith.constant 0 : index
    %68 = vector.load %arg16[%c8, %c0_46] : memref<280x128xf32, #tpu.memory_space<vmem>>, vector<64x128xf32>
    %cst_47 = arith.constant 0.000000e+00 : f32
    %69 = vector.shape_cast %43 : vector<64x1xi1> to vector<64x1xi1>
    %70 = vector.broadcast %69 : vector<64x1xi1> to vector<64x128xi1>
    %71 = vector.broadcast %cst_47 : f32 to vector<64x128xf32>
    %72 = arith.select %70, %68, %71 : vector<64x128xi1>, vector<64x128xf32>
    %c3 = arith.constant 3 : index
    %c0_48 = arith.constant 0 : index
    %c0_49 = arith.constant 0 : index
    %73 = vector.load %arg4[%c3, %c0_48, %c0_49] : memref<9x128x128xf32, #tpu.memory_space<vmem>>, vector<1x128x128xf32>
    %74 = vector.shape_cast %73 : vector<1x128x128xf32> to vector<128x128xf32>
    %cst_50 = arith.constant dense<0.000000e+00> : vector<64x128xf32>
    %75 = tpu.matmul %72, %74, %cst_50 {dimension_numbers = #tpu.dot_dimension_numbers<[1], [0], [0], [1], [0, 0, 1, 1], [], []>} : vector<64x128xf32>, vector<128x128xf32>, vector<64x128xf32> -> vector<64x128xf32>
    %76 = arith.addf %67, %75 : vector<64x128xf32>
    %c9_51 = arith.constant 9 : index
    %c0_52 = arith.constant 0 : index
    %77 = vector.load %arg16[%c9_51, %c0_52] : memref<280x128xf32, #tpu.memory_space<vmem>>, vector<64x128xf32>
    %c4 = arith.constant 4 : index
    %c0_53 = arith.constant 0 : index
    %c0_54 = arith.constant 0 : index
    %78 = vector.load %arg4[%c4, %c0_53, %c0_54] : memref<9x128x128xf32, #tpu.memory_space<vmem>>, vector<1x128x128xf32>
    %79 = vector.shape_cast %78 : vector<1x128x128xf32> to vector<128x128xf32>
    %cst_55 = arith.constant dense<0.000000e+00> : vector<64x128xf32>
    %80 = tpu.matmul %77, %79, %cst_55 {dimension_numbers = #tpu.dot_dimension_numbers<[1], [0], [0], [1], [0, 0, 1, 1], [], []>} : vector<64x128xf32>, vector<128x128xf32>, vector<64x128xf32> -> vector<64x128xf32>
    %81 = arith.addf %76, %80 : vector<64x128xf32>
    %c10 = arith.constant 10 : index
    %c0_56 = arith.constant 0 : index
    %82 = vector.load %arg16[%c10, %c0_56] : memref<280x128xf32, #tpu.memory_space<vmem>>, vector<64x128xf32>
    %cst_57 = arith.constant 0.000000e+00 : f32
    %83 = vector.shape_cast %45 : vector<64x1xi1> to vector<64x1xi1>
    %84 = vector.broadcast %83 : vector<64x1xi1> to vector<64x128xi1>
    %85 = vector.broadcast %cst_57 : f32 to vector<64x128xf32>
    %86 = arith.select %84, %82, %85 : vector<64x128xi1>, vector<64x128xf32>
    %c5 = arith.constant 5 : index
    %c0_58 = arith.constant 0 : index
    %c0_59 = arith.constant 0 : index
    %87 = vector.load %arg4[%c5, %c0_58, %c0_59] : memref<9x128x128xf32, #tpu.memory_space<vmem>>, vector<1x128x128xf32>
    %88 = vector.shape_cast %87 : vector<1x128x128xf32> to vector<128x128xf32>
    %cst_60 = arith.constant dense<0.000000e+00> : vector<64x128xf32>
    %89 = tpu.matmul %86, %88, %cst_60 {dimension_numbers = #tpu.dot_dimension_numbers<[1], [0], [0], [1], [0, 0, 1, 1], [], []>} : vector<64x128xf32>, vector<128x128xf32>, vector<64x128xf32> -> vector<64x128xf32>
    %90 = arith.addf %81, %89 : vector<64x128xf32>
    %c16_61 = arith.constant 16 : index
    %c0_62 = arith.constant 0 : index
    %91 = vector.load %arg16[%c16_61, %c0_62] : memref<280x128xf32, #tpu.memory_space<vmem>>, vector<64x128xf32>
    %cst_63 = arith.constant 0.000000e+00 : f32
    %92 = vector.shape_cast %43 : vector<64x1xi1> to vector<64x1xi1>
    %93 = vector.broadcast %92 : vector<64x1xi1> to vector<64x128xi1>
    %94 = vector.broadcast %cst_63 : f32 to vector<64x128xf32>
    %95 = arith.select %93, %91, %94 : vector<64x128xi1>, vector<64x128xf32>
    %c6 = arith.constant 6 : index
    %c0_64 = arith.constant 0 : index
    %c0_65 = arith.constant 0 : index
    %96 = vector.load %arg4[%c6, %c0_64, %c0_65] : memref<9x128x128xf32, #tpu.memory_space<vmem>>, vector<1x128x128xf32>
    %97 = vector.shape_cast %96 : vector<1x128x128xf32> to vector<128x128xf32>
    %cst_66 = arith.constant dense<0.000000e+00> : vector<64x128xf32>
    %98 = tpu.matmul %95, %97, %cst_66 {dimension_numbers = #tpu.dot_dimension_numbers<[1], [0], [0], [1], [0, 0, 1, 1], [], []>} : vector<64x128xf32>, vector<128x128xf32>, vector<64x128xf32> -> vector<64x128xf32>
    %99 = arith.addf %90, %98 : vector<64x128xf32>
    %c17_67 = arith.constant 17 : index
    %c0_68 = arith.constant 0 : index
    %100 = vector.load %arg16[%c17_67, %c0_68] : memref<280x128xf32, #tpu.memory_space<vmem>>, vector<64x128xf32>
    %c7 = arith.constant 7 : index
    %c0_69 = arith.constant 0 : index
    %c0_70 = arith.constant 0 : index
    %101 = vector.load %arg4[%c7, %c0_69, %c0_70] : memref<9x128x128xf32, #tpu.memory_space<vmem>>, vector<1x128x128xf32>
    %102 = vector.shape_cast %101 : vector<1x128x128xf32> to vector<128x128xf32>
    %cst_71 = arith.constant dense<0.000000e+00> : vector<64x128xf32>
    %103 = tpu.matmul %100, %102, %cst_71 {dimension_numbers = #tpu.dot_dimension_numbers<[1], [0], [0], [1], [0, 0, 1, 1], [], []>} : vector<64x128xf32>, vector<128x128xf32>, vector<64x128xf32> -> vector<64x128xf32>
    %104 = arith.addf %99, %103 : vector<64x128xf32>
    %c18 = arith.constant 18 : index
    %c0_72 = arith.constant 0 : index
    %105 = vector.load %arg16[%c18, %c0_72] : memref<280x128xf32, #tpu.memory_space<vmem>>, vector<64x128xf32>
    %cst_73 = arith.constant 0.000000e+00 : f32
    %106 = vector.shape_cast %45 : vector<64x1xi1> to vector<64x1xi1>
    %107 = vector.broadcast %106 : vector<64x1xi1> to vector<64x128xi1>
    %108 = vector.broadcast %cst_73 : f32 to vector<64x128xf32>
    %109 = arith.select %107, %105, %108 : vector<64x128xi1>, vector<64x128xf32>
    %c8_74 = arith.constant 8 : index
    %c0_75 = arith.constant 0 : index
    %c0_76 = arith.constant 0 : index
    %110 = vector.load %arg4[%c8_74, %c0_75, %c0_76] : memref<9x128x128xf32, #tpu.memory_space<vmem>>, vector<1x128x128xf32>
    %111 = vector.shape_cast %110 : vector<1x128x128xf32> to vector<128x128xf32>
    %cst_77 = arith.constant dense<0.000000e+00> : vector<64x128xf32>
    %112 = tpu.matmul %109, %111, %cst_77 {dimension_numbers = #tpu.dot_dimension_numbers<[1], [0], [0], [1], [0, 0, 1, 1], [], []>} : vector<64x128xf32>, vector<128x128xf32>, vector<64x128xf32> -> vector<64x128xf32>
    %113 = arith.addf %104, %112 : vector<64x128xf32>
    %c0_78 = arith.constant 0 : index
    %c0_79 = arith.constant 0 : index
    %114 = vector.load %arg5[%c0_78, %c0_79] : memref<1x128xf32, #tpu.memory_space<vmem>>, vector<1x128xf32>
    %115 = vector.broadcast %114 : vector<1x128xf32> to vector<64x128xf32>
    %116 = arith.addf %113, %115 : vector<64x128xf32>
    %cst_80 = arith.constant 0.000000e+00 : f32
    %117 = vector.broadcast %cst_80 : f32 to vector<64x128xf32>
    %118 = arith.maximumf %116, %117 : vector<64x128xf32>
    %cst_81 = arith.constant 0.000000e+00 : f32
    %119 = vector.broadcast %cst_81 : f32 to vector<9x128xf32>
    %c64 = arith.constant 64 : index
    %c0_82 = arith.constant 0 : index
    %120 = vector.load %arg16[%c64, %c0_82] : memref<280x128xf32, #tpu.memory_space<vmem>>, vector<9x128xf32>
    tpu.vector_store %arg16[%c64, %c0_82], %119 {strides = array<i32>} : memref<280x128xf32, #tpu.memory_space<vmem>>, vector<9x128xf32>,
    %c0_83 = arith.constant 0 : index
    %c0_84 = arith.constant 0 : index
    %121 = vector.load %arg16[%c0_83, %c0_84] : memref<280x128xf32, #tpu.memory_space<vmem>>, vector<64x128xf32>
    tpu.vector_store %arg16[%c0_83, %c0_84], %118 {strides = array<i32>} : memref<280x128xf32, #tpu.memory_space<vmem>>, vector<64x128xf32>,
    %c1_85 = arith.constant 1 : index
    %c0_86 = arith.constant 0 : index
    %122 = vector.load %arg16[%c1_85, %c0_86] : memref<280x128xf32, #tpu.memory_space<vmem>>, vector<64x128xf32>
    %123 = arith.maximumf %118, %122 : vector<64x128xf32>
    %c8_87 = arith.constant 8 : index
    %c0_88 = arith.constant 0 : index
    %124 = vector.load %arg16[%c8_87, %c0_88] : memref<280x128xf32, #tpu.memory_space<vmem>>, vector<64x128xf32>
    %125 = arith.maximumf %123, %124 : vector<64x128xf32>
    %c9_89 = arith.constant 9 : index
    %c0_90 = arith.constant 0 : index
    %126 = vector.load %arg16[%c9_89, %c0_90] : memref<280x128xf32, #tpu.memory_space<vmem>>, vector<64x128xf32>
    %127 = arith.maximumf %125, %126 : vector<64x128xf32>
    %c0_91 = arith.constant 0 : index
    %c0_92 = arith.constant 0 : index
    %128 = vector.load %arg13[%c0_91, %c0_92] : memref<16x64xf32, #tpu.memory_space<vmem>>, vector<16x64xf32>
    %cst_93 = arith.constant dense<0.000000e+00> : vector<16x128xf32>
    %129 = tpu.matmul %128, %127, %cst_93 {dimension_numbers = #tpu.dot_dimension_numbers<[1], [0], [0], [1], [0, 0, 1, 1], [], []>} : vector<16x64xf32>, vector<64x128xf32>, vector<16x128xf32> -> vector<16x128xf32>
    %cst_94 = arith.constant 0.000000e+00 : f32
    %130 = vector.broadcast %cst_94 : f32 to vector<5x128xf32>
    %c0_95 = arith.constant 0 : index
    %c0_96 = arith.constant 0 : index
    %131 = vector.load %arg16[%c0_95, %c0_96] : memref<280x128xf32, #tpu.memory_space<vmem>>, vector<5x128xf32>
    tpu.vector_store %arg16[%c0_95, %c0_96], %130 {strides = array<i32>} : memref<280x128xf32, #tpu.memory_space<vmem>>, vector<5x128xf32>,
    %cst_97 = arith.constant 0.000000e+00 : f32
    %132 = vector.broadcast %cst_97 : f32 to vector<5x128xf32>
    %c21 = arith.constant 21 : index
    %c0_98 = arith.constant 0 : index
    %133 = vector.load %arg16[%c21, %c0_98] : memref<280x128xf32, #tpu.memory_space<vmem>>, vector<5x128xf32>
    tpu.vector_store %arg16[%c21, %c0_98], %132 {strides = array<i32>} : memref<280x128xf32, #tpu.memory_space<vmem>>, vector<5x128xf32>,
    %c5_99 = arith.constant 5 : index
    %c0_100 = arith.constant 0 : index
    %134 = vector.load %arg16[%c5_99, %c0_100] : memref<280x128xf32, #tpu.memory_space<vmem>>, vector<16x128xf32>
    tpu.vector_store %arg16[%c5_99, %c0_100], %129 {strides = array<i32>} : memref<280x128xf32, #tpu.memory_space<vmem>>, vector<16x128xf32>,
    %135 = tpu.iota {dimensions = array<i32: 0>} : vector<16x1xi32>
    %c4_i32 = arith.constant 4 : i32
    %c0_i32_101 = arith.constant 0 : i32
    %136 = arith.cmpi eq, %c4_i32, %c0_i32_101 : i32
    %c1_i32_102 = arith.constant 1 : i32
    %137 = arith.select %136, %c1_i32_102, %c4_i32 : i32
    %138 = vector.broadcast %137 : i32 to vector<16x1xi32>
    %139 = arith.remsi %135, %138 : vector<16x1xi32>
    %c0_i32_103 = arith.constant 0 : i32
    %140 = vector.broadcast %c0_i32_103 : i32 to vector<16x1xi32>
    %141 = arith.cmpi ne, %139, %140 : vector<16x1xi32>
    %c0_i32_104 = arith.constant 0 : i32
    %142 = vector.broadcast %c0_i32_104 : i32 to vector<16x1xi32>
    %143 = arith.cmpi slt, %139, %142 : vector<16x1xi32>
    %c0_i32_105 = arith.constant 0 : i32
    %144 = arith.cmpi slt, %137, %c0_i32_105 : i32
    %145 = vector.broadcast %144 : i1 to vector<16x1xi1>
    %146 = vector.broadcast %145 : vector<16x1xi1> to vector<16x1xi1>
    %147 = arith.xori %143, %146 : vector<16x1xi1>
    %148 = arith.andi %147, %141 : vector<16x1xi1>
    %149 = vector.broadcast %137 : i32 to vector<16x1xi32>
    %150 = arith.addi %139, %149 : vector<16x1xi32>
    %151 = arith.select %148, %150, %139 : vector<16x1xi1>, vector<16x1xi32>
    %c1_i32_106 = arith.constant 1 : i32
    %152 = vector.broadcast %c1_i32_106 : i32 to vector<16x1xi32>
    %153 = arith.cmpi sge, %151, %152 : vector<16x1xi32>
    %c2_i32 = arith.constant 2 : i32
    %154 = vector.broadcast %c2_i32 : i32 to vector<16x1xi32>
    %155 = arith.cmpi sle, %151, %154 : vector<16x1xi32>
    %c0_107 = arith.constant 0 : index
    %c0_108 = arith.constant 0 : index
    %156 = vector.load %arg16[%c0_107, %c0_108] : memref<280x128xf32, #tpu.memory_space<vmem>>, vector<16x128xf32>
    %cst_109 = arith.constant 0.000000e+00 : f32
    %157 = vector.shape_cast %153 : vector<16x1xi1> to vector<16x1xi1>
    %158 = vector.broadcast %157 : vector<16x1xi1> to vector<16x128xi1>
    %159 = vector.broadcast %cst_109 : f32 to vector<16x128xf32>
    %160 = arith.select %158, %156, %159 : vector<16x128xi1>, vector<16x128xf32>
    %c0_110 = arith.constant 0 : index
    %c0_111 = arith.constant 0 : index
    %c0_112 = arith.constant 0 : index
    %161 = vector.load %arg6[%c0_110, %c0_111, %c0_112] : memref<9x128x128xf32, #tpu.memory_space<vmem>>, vector<1x128x128xf32>
    %162 = vector.shape_cast %161 : vector<1x128x128xf32> to vector<128x128xf32>
    %cst_113 = arith.constant dense<0.000000e+00> : vector<16x128xf32>
    %163 = tpu.matmul %160, %162, %cst_113 {dimension_numbers = #tpu.dot_dimension_numbers<[1], [0], [0], [1], [0, 0, 1, 1], [], []>} : vector<16x128xf32>, vector<128x128xf32>, vector<16x128xf32> -> vector<16x128xf32>
    %c1_114 = arith.constant 1 : index
    %c0_115 = arith.constant 0 : index
    %164 = vector.load %arg16[%c1_114, %c0_115] : memref<280x128xf32, #tpu.memory_space<vmem>>, vector<16x128xf32>
    %c1_116 = arith.constant 1 : index
    %c0_117 = arith.constant 0 : index
    %c0_118 = arith.constant 0 : index
    %165 = vector.load %arg6[%c1_116, %c0_117, %c0_118] : memref<9x128x128xf32, #tpu.memory_space<vmem>>, vector<1x128x128xf32>
    %166 = vector.shape_cast %165 : vector<1x128x128xf32> to vector<128x128xf32>
    %cst_119 = arith.constant dense<0.000000e+00> : vector<16x128xf32>
    %167 = tpu.matmul %164, %166, %cst_119 {dimension_numbers = #tpu.dot_dimension_numbers<[1], [0], [0], [1], [0, 0, 1, 1], [], []>} : vector<16x128xf32>, vector<128x128xf32>, vector<16x128xf32> -> vector<16x128xf32>
    %168 = arith.addf %163, %167 : vector<16x128xf32>
    %c2_120 = arith.constant 2 : index
    %c0_121 = arith.constant 0 : index
    %169 = vector.load %arg16[%c2_120, %c0_121] : memref<280x128xf32, #tpu.memory_space<vmem>>, vector<16x128xf32>
    %cst_122 = arith.constant 0.000000e+00 : f32
    %170 = vector.shape_cast %155 : vector<16x1xi1> to vector<16x1xi1>
    %171 = vector.broadcast %170 : vector<16x1xi1> to vector<16x128xi1>
    %172 = vector.broadcast %cst_122 : f32 to vector<16x128xf32>
    %173 = arith.select %171, %169, %172 : vector<16x128xi1>, vector<16x128xf32>
    %c2_123 = arith.constant 2 : index
    %c0_124 = arith.constant 0 : index
    %c0_125 = arith.constant 0 : index
    %174 = vector.load %arg6[%c2_123, %c0_124, %c0_125] : memref<9x128x128xf32, #tpu.memory_space<vmem>>, vector<1x128x128xf32>
    %175 = vector.shape_cast %174 : vector<1x128x128xf32> to vector<128x128xf32>
    %cst_126 = arith.constant dense<0.000000e+00> : vector<16x128xf32>
    %176 = tpu.matmul %173, %175, %cst_126 {dimension_numbers = #tpu.dot_dimension_numbers<[1], [0], [0], [1], [0, 0, 1, 1], [], []>} : vector<16x128xf32>, vector<128x128xf32>, vector<16x128xf32> -> vector<16x128xf32>
    %177 = arith.addf %168, %176 : vector<16x128xf32>
    %c4_127 = arith.constant 4 : index
    %c0_128 = arith.constant 0 : index
    %178 = vector.load %arg16[%c4_127, %c0_128] : memref<280x128xf32, #tpu.memory_space<vmem>>, vector<16x128xf32>
    %cst_129 = arith.constant 0.000000e+00 : f32
    %179 = vector.shape_cast %153 : vector<16x1xi1> to vector<16x1xi1>
    %180 = vector.broadcast %179 : vector<16x1xi1> to vector<16x128xi1>
    %181 = vector.broadcast %cst_129 : f32 to vector<16x128xf32>
    %182 = arith.select %180, %178, %181 : vector<16x128xi1>, vector<16x128xf32>
    %c3_130 = arith.constant 3 : index
    %c0_131 = arith.constant 0 : index
    %c0_132 = arith.constant 0 : index
    %183 = vector.load %arg6[%c3_130, %c0_131, %c0_132] : memref<9x128x128xf32, #tpu.memory_space<vmem>>, vector<1x128x128xf32>
    %184 = vector.shape_cast %183 : vector<1x128x128xf32> to vector<128x128xf32>
    %cst_133 = arith.constant dense<0.000000e+00> : vector<16x128xf32>
    %185 = tpu.matmul %182, %184, %cst_133 {dimension_numbers = #tpu.dot_dimension_numbers<[1], [0], [0], [1], [0, 0, 1, 1], [], []>} : vector<16x128xf32>, vector<128x128xf32>, vector<16x128xf32> -> vector<16x128xf32>
    %186 = arith.addf %177, %185 : vector<16x128xf32>
    %c5_134 = arith.constant 5 : index
    %c0_135 = arith.constant 0 : index
    %187 = vector.load %arg16[%c5_134, %c0_135] : memref<280x128xf32, #tpu.memory_space<vmem>>, vector<16x128xf32>
    %c4_136 = arith.constant 4 : index
    %c0_137 = arith.constant 0 : index
    %c0_138 = arith.constant 0 : index
    %188 = vector.load %arg6[%c4_136, %c0_137, %c0_138] : memref<9x128x128xf32, #tpu.memory_space<vmem>>, vector<1x128x128xf32>
    %189 = vector.shape_cast %188 : vector<1x128x128xf32> to vector<128x128xf32>
    %cst_139 = arith.constant dense<0.000000e+00> : vector<16x128xf32>
    %190 = tpu.matmul %187, %189, %cst_139 {dimension_numbers = #tpu.dot_dimension_numbers<[1], [0], [0], [1], [0, 0, 1, 1], [], []>} : vector<16x128xf32>, vector<128x128xf32>, vector<16x128xf32> -> vector<16x128xf32>
    %191 = arith.addf %186, %190 : vector<16x128xf32>
    %c6_140 = arith.constant 6 : index
    %c0_141 = arith.constant 0 : index
    %192 = vector.load %arg16[%c6_140, %c0_141] : memref<280x128xf32, #tpu.memory_space<vmem>>, vector<16x128xf32>
    %cst_142 = arith.constant 0.000000e+00 : f32
    %193 = vector.shape_cast %155 : vector<16x1xi1> to vector<16x1xi1>
    %194 = vector.broadcast %193 : vector<16x1xi1> to vector<16x128xi1>
    %195 = vector.broadcast %cst_142 : f32 to vector<16x128xf32>
    %196 = arith.select %194, %192, %195 : vector<16x128xi1>, vector<16x128xf32>
    %c5_143 = arith.constant 5 : index
    %c0_144 = arith.constant 0 : index
    %c0_145 = arith.constant 0 : index
    %197 = vector.load %arg6[%c5_143, %c0_144, %c0_145] : memref<9x128x128xf32, #tpu.memory_space<vmem>>, vector<1x128x128xf32>
    %198 = vector.shape_cast %197 : vector<1x128x128xf32> to vector<128x128xf32>
    %cst_146 = arith.constant dense<0.000000e+00> : vector<16x128xf32>
    %199 = tpu.matmul %196, %198, %cst_146 {dimension_numbers = #tpu.dot_dimension_numbers<[1], [0], [0], [1], [0, 0, 1, 1], [], []>} : vector<16x128xf32>, vector<128x128xf32>, vector<16x128xf32> -> vector<16x128xf32>
    %200 = arith.addf %191, %199 : vector<16x128xf32>
    %c8_147 = arith.constant 8 : index
    %c0_148 = arith.constant 0 : index
    %201 = vector.load %arg16[%c8_147, %c0_148] : memref<280x128xf32, #tpu.memory_space<vmem>>, vector<16x128xf32>
    %cst_149 = arith.constant 0.000000e+00 : f32
    %202 = vector.shape_cast %153 : vector<16x1xi1> to vector<16x1xi1>
    %203 = vector.broadcast %202 : vector<16x1xi1> to vector<16x128xi1>
    %204 = vector.broadcast %cst_149 : f32 to vector<16x128xf32>
    %205 = arith.select %203, %201, %204 : vector<16x128xi1>, vector<16x128xf32>
    %c6_150 = arith.constant 6 : index
    %c0_151 = arith.constant 0 : index
    %c0_152 = arith.constant 0 : index
    %206 = vector.load %arg6[%c6_150, %c0_151, %c0_152] : memref<9x128x128xf32, #tpu.memory_space<vmem>>, vector<1x128x128xf32>
    %207 = vector.shape_cast %206 : vector<1x128x128xf32> to vector<128x128xf32>
    %cst_153 = arith.constant dense<0.000000e+00> : vector<16x128xf32>
    %208 = tpu.matmul %205, %207, %cst_153 {dimension_numbers = #tpu.dot_dimension_numbers<[1], [0], [0], [1], [0, 0, 1, 1], [], []>} : vector<16x128xf32>, vector<128x128xf32>, vector<16x128xf32> -> vector<16x128xf32>
    %209 = arith.addf %200, %208 : vector<16x128xf32>
    %c9_154 = arith.constant 9 : index
    %c0_155 = arith.constant 0 : index
    %210 = vector.load %arg16[%c9_154, %c0_155] : memref<280x128xf32, #tpu.memory_space<vmem>>, vector<16x128xf32>
    %c7_156 = arith.constant 7 : index
    %c0_157 = arith.constant 0 : index
    %c0_158 = arith.constant 0 : index
    %211 = vector.load %arg6[%c7_156, %c0_157, %c0_158] : memref<9x128x128xf32, #tpu.memory_space<vmem>>, vector<1x128x128xf32>
    %212 = vector.shape_cast %211 : vector<1x128x128xf32> to vector<128x128xf32>
    %cst_159 = arith.constant dense<0.000000e+00> : vector<16x128xf32>
    %213 = tpu.matmul %210, %212, %cst_159 {dimension_numbers = #tpu.dot_dimension_numbers<[1], [0], [0], [1], [0, 0, 1, 1], [], []>} : vector<16x128xf32>, vector<128x128xf32>, vector<16x128xf32> -> vector<16x128xf32>
    %214 = arith.addf %209, %213 : vector<16x128xf32>
    %c10_160 = arith.constant 10 : index
    %c0_161 = arith.constant 0 : index
    %215 = vector.load %arg16[%c10_160, %c0_161] : memref<280x128xf32, #tpu.memory_space<vmem>>, vector<16x128xf32>
    %cst_162 = arith.constant 0.000000e+00 : f32
    %216 = vector.shape_cast %155 : vector<16x1xi1> to vector<16x1xi1>
    %217 = vector.broadcast %216 : vector<16x1xi1> to vector<16x128xi1>
    %218 = vector.broadcast %cst_162 : f32 to vector<16x128xf32>
    %219 = arith.select %217, %215, %218 : vector<16x128xi1>, vector<16x128xf32>
    %c8_163 = arith.constant 8 : index
    %c0_164 = arith.constant 0 : index
    %c0_165 = arith.constant 0 : index
    %220 = vector.load %arg6[%c8_163, %c0_164, %c0_165] : memref<9x128x128xf32, #tpu.memory_space<vmem>>, vector<1x128x128xf32>
    %221 = vector.shape_cast %220 : vector<1x128x128xf32> to vector<128x128xf32>
    %cst_166 = arith.constant dense<0.000000e+00> : vector<16x128xf32>
    %222 = tpu.matmul %219, %221, %cst_166 {dimension_numbers = #tpu.dot_dimension_numbers<[1], [0], [0], [1], [0, 0, 1, 1], [], []>} : vector<16x128xf32>, vector<128x128xf32>, vector<16x128xf32> -> vector<16x128xf32>
    %223 = arith.addf %214, %222 : vector<16x128xf32>
    %c0_167 = arith.constant 0 : index
    %c0_168 = arith.constant 0 : index
    %224 = vector.load %arg7[%c0_167, %c0_168] : memref<1x128xf32, #tpu.memory_space<vmem>>, vector<1x128xf32>
    %225 = vector.broadcast %224 : vector<1x128xf32> to vector<16x128xf32>
    %226 = arith.addf %223, %225 : vector<16x128xf32>
    %cst_169 = arith.constant 0.000000e+00 : f32
    %227 = vector.broadcast %cst_169 : f32 to vector<16x128xf32>
    %228 = arith.maximumf %226, %227 : vector<16x128xf32>
    %cst_170 = arith.constant 0.000000e+00 : f32
    %229 = vector.broadcast %cst_170 : f32 to vector<5x128xf32>
    %c16_171 = arith.constant 16 : index
    %c0_172 = arith.constant 0 : index
    %230 = vector.load %arg16[%c16_171, %c0_172] : memref<280x128xf32, #tpu.memory_space<vmem>>, vector<5x128xf32>
    tpu.vector_store %arg16[%c16_171, %c0_172], %229 {strides = array<i32>} : memref<280x128xf32, #tpu.memory_space<vmem>>, vector<5x128xf32>,
    %c0_173 = arith.constant 0 : index
    %c0_174 = arith.constant 0 : index
    %231 = vector.load %arg16[%c0_173, %c0_174] : memref<280x128xf32, #tpu.memory_space<vmem>>, vector<16x128xf32>
    tpu.vector_store %arg16[%c0_173, %c0_174], %228 {strides = array<i32>} : memref<280x128xf32, #tpu.memory_space<vmem>>, vector<16x128xf32>,
    %c1_175 = arith.constant 1 : index
    %c0_176 = arith.constant 0 : index
    %232 = vector.load %arg16[%c1_175, %c0_176] : memref<280x128xf32, #tpu.memory_space<vmem>>, vector<16x128xf32>
    %233 = arith.maximumf %228, %232 : vector<16x128xf32>
    %c4_177 = arith.constant 4 : index
    %c0_178 = arith.constant 0 : index
    %234 = vector.load %arg16[%c4_177, %c0_178] : memref<280x128xf32, #tpu.memory_space<vmem>>, vector<16x128xf32>
    %235 = arith.maximumf %233, %234 : vector<16x128xf32>
    %c5_179 = arith.constant 5 : index
    %c0_180 = arith.constant 0 : index
    %236 = vector.load %arg16[%c5_179, %c0_180] : memref<280x128xf32, #tpu.memory_space<vmem>>, vector<16x128xf32>
    %237 = arith.maximumf %235, %236 : vector<16x128xf32>
    %c0_181 = arith.constant 0 : index
    %c0_182 = arith.constant 0 : index
    %238 = vector.load %arg14[%c0_181, %c0_182] : memref<4x16xf32, #tpu.memory_space<vmem>>, vector<4x16xf32>
    %cst_183 = arith.constant dense<0.000000e+00> : vector<4x128xf32>
    %239 = tpu.matmul %238, %237, %cst_183 {dimension_numbers = #tpu.dot_dimension_numbers<[1], [0], [0], [1], [0, 0, 1, 1], [], []>} : vector<4x16xf32>, vector<16x128xf32>, vector<4x128xf32> -> vector<4x128xf32>
    %cst_184 = arith.constant 0.000000e+00 : f32
    %240 = vector.broadcast %cst_184 : f32 to vector<3x128xf32>
    %c0_185 = arith.constant 0 : index
    %c0_186 = arith.constant 0 : index
    %241 = vector.load %arg16[%c0_185, %c0_186] : memref<280x128xf32, #tpu.memory_space<vmem>>, vector<3x128xf32>
    tpu.vector_store %arg16[%c0_185, %c0_186], %240 {strides = array<i32>} : memref<280x128xf32, #tpu.memory_space<vmem>>, vector<3x128xf32>,
    %cst_187 = arith.constant 0.000000e+00 : f32
    %242 = vector.broadcast %cst_187 : f32 to vector<3x128xf32>
    %c7_188 = arith.constant 7 : index
    %c0_189 = arith.constant 0 : index
    %243 = vector.load %arg16[%c7_188, %c0_189] : memref<280x128xf32, #tpu.memory_space<vmem>>, vector<3x128xf32>
    tpu.vector_store %arg16[%c7_188, %c0_189], %242 {strides = array<i32>} : memref<280x128xf32, #tpu.memory_space<vmem>>, vector<3x128xf32>,
    %c3_190 = arith.constant 3 : index
    %c0_191 = arith.constant 0 : index
    %244 = vector.load %arg16[%c3_190, %c0_191] : memref<280x128xf32, #tpu.memory_space<vmem>>, vector<4x128xf32>
    tpu.vector_store %arg16[%c3_190, %c0_191], %239 {strides = array<i32>} : memref<280x128xf32, #tpu.memory_space<vmem>>, vector<4x128xf32>,
    %245 = tpu.iota {dimensions = array<i32: 0>} : vector<4x1xi32>
    %c2_i32_192 = arith.constant 2 : i32
    %c0_i32_193 = arith.constant 0 : i32
    %246 = arith.cmpi eq, %c2_i32_192, %c0_i32_193 : i32
    %c1_i32_194 = arith.constant 1 : i32
    %247 = arith.select %246, %c1_i32_194, %c2_i32_192 : i32
    %248 = vector.broadcast %247 : i32 to vector<4x1xi32>
    %249 = arith.remsi %245, %248 : vector<4x1xi32>
    %c0_i32_195 = arith.constant 0 : i32
    %250 = vector.broadcast %c0_i32_195 : i32 to vector<4x1xi32>
    %251 = arith.cmpi ne, %249, %250 : vector<4x1xi32>
    %c0_i32_196 = arith.constant 0 : i32
    %252 = vector.broadcast %c0_i32_196 : i32 to vector<4x1xi32>
    %253 = arith.cmpi slt, %249, %252 : vector<4x1xi32>
    %c0_i32_197 = arith.constant 0 : i32
    %254 = arith.cmpi slt, %247, %c0_i32_197 : i32
    %255 = vector.broadcast %254 : i1 to vector<4x1xi1>
    %256 = vector.broadcast %255 : vector<4x1xi1> to vector<4x1xi1>
    %257 = arith.xori %253, %256 : vector<4x1xi1>
    %258 = arith.andi %257, %251 : vector<4x1xi1>
    %259 = vector.broadcast %247 : i32 to vector<4x1xi32>
    %260 = arith.addi %249, %259 : vector<4x1xi32>
    %261 = arith.select %258, %260, %249 : vector<4x1xi1>, vector<4x1xi32>
    %c1_i32_198 = arith.constant 1 : i32
    %262 = vector.broadcast %c1_i32_198 : i32 to vector<4x1xi32>
    %263 = arith.cmpi sge, %261, %262 : vector<4x1xi32>
    %c0_i32_199 = arith.constant 0 : i32
    %264 = vector.broadcast %c0_i32_199 : i32 to vector<4x1xi32>
    %265 = arith.cmpi sle, %261, %264 : vector<4x1xi32>
    %c0_200 = arith.constant 0 : index
    %c0_201 = arith.constant 0 : index
    %266 = vector.load %arg16[%c0_200, %c0_201] : memref<280x128xf32, #tpu.memory_space<vmem>>, vector<4x128xf32>
    %cst_202 = arith.constant 0.000000e+00 : f32
    %267 = vector.shape_cast %263 : vector<4x1xi1> to vector<4x1xi1>
    %268 = vector.broadcast %267 : vector<4x1xi1> to vector<4x128xi1>
    %269 = vector.broadcast %cst_202 : f32 to vector<4x128xf32>
    %270 = arith.select %268, %266, %269 : vector<4x128xi1>, vector<4x128xf32>
    %c0_203 = arith.constant 0 : index
    %c0_204 = arith.constant 0 : index
    %c0_205 = arith.constant 0 : index
    %271 = vector.load %arg8[%c0_203, %c0_204, %c0_205] : memref<9x128x128xf32, #tpu.memory_space<vmem>>, vector<1x128x128xf32>
    %272 = vector.shape_cast %271 : vector<1x128x128xf32> to vector<128x128xf32>
    %cst_206 = arith.constant dense<0.000000e+00> : vector<4x128xf32>
    %273 = tpu.matmul %270, %272, %cst_206 {dimension_numbers = #tpu.dot_dimension_numbers<[1], [0], [0], [1], [0, 0, 1, 1], [], []>} : vector<4x128xf32>, vector<128x128xf32>, vector<4x128xf32> -> vector<4x128xf32>
    %c1_207 = arith.constant 1 : index
    %c0_208 = arith.constant 0 : index
    %274 = vector.load %arg16[%c1_207, %c0_208] : memref<280x128xf32, #tpu.memory_space<vmem>>, vector<4x128xf32>
    %c1_209 = arith.constant 1 : index
    %c0_210 = arith.constant 0 : index
    %c0_211 = arith.constant 0 : index
    %275 = vector.load %arg8[%c1_209, %c0_210, %c0_211] : memref<9x128x128xf32, #tpu.memory_space<vmem>>, vector<1x128x128xf32>
    %276 = vector.shape_cast %275 : vector<1x128x128xf32> to vector<128x128xf32>
    %cst_212 = arith.constant dense<0.000000e+00> : vector<4x128xf32>
    %277 = tpu.matmul %274, %276, %cst_212 {dimension_numbers = #tpu.dot_dimension_numbers<[1], [0], [0], [1], [0, 0, 1, 1], [], []>} : vector<4x128xf32>, vector<128x128xf32>, vector<4x128xf32> -> vector<4x128xf32>
    %278 = arith.addf %273, %277 : vector<4x128xf32>
    %c2_213 = arith.constant 2 : index
    %c0_214 = arith.constant 0 : index
    %279 = vector.load %arg16[%c2_213, %c0_214] : memref<280x128xf32, #tpu.memory_space<vmem>>, vector<4x128xf32>
    %cst_215 = arith.constant 0.000000e+00 : f32
    %280 = vector.shape_cast %265 : vector<4x1xi1> to vector<4x1xi1>
    %281 = vector.broadcast %280 : vector<4x1xi1> to vector<4x128xi1>
    %282 = vector.broadcast %cst_215 : f32 to vector<4x128xf32>
    %283 = arith.select %281, %279, %282 : vector<4x128xi1>, vector<4x128xf32>
    %c2_216 = arith.constant 2 : index
    %c0_217 = arith.constant 0 : index
    %c0_218 = arith.constant 0 : index
    %284 = vector.load %arg8[%c2_216, %c0_217, %c0_218] : memref<9x128x128xf32, #tpu.memory_space<vmem>>, vector<1x128x128xf32>
    %285 = vector.shape_cast %284 : vector<1x128x128xf32> to vector<128x128xf32>
    %cst_219 = arith.constant dense<0.000000e+00> : vector<4x128xf32>
    %286 = tpu.matmul %283, %285, %cst_219 {dimension_numbers = #tpu.dot_dimension_numbers<[1], [0], [0], [1], [0, 0, 1, 1], [], []>} : vector<4x128xf32>, vector<128x128xf32>, vector<4x128xf32> -> vector<4x128xf32>
    %287 = arith.addf %278, %286 : vector<4x128xf32>
    %c2_220 = arith.constant 2 : index
    %c0_221 = arith.constant 0 : index
    %288 = vector.load %arg16[%c2_220, %c0_221] : memref<280x128xf32, #tpu.memory_space<vmem>>, vector<4x128xf32>
    %cst_222 = arith.constant 0.000000e+00 : f32
    %289 = vector.shape_cast %263 : vector<4x1xi1> to vector<4x1xi1>
    %290 = vector.broadcast %289 : vector<4x1xi1> to vector<4x128xi1>
    %291 = vector.broadcast %cst_222 : f32 to vector<4x128xf32>
    %292 = arith.select %290, %288, %291 : vector<4x128xi1>, vector<4x128xf32>
    %c3_223 = arith.constant 3 : index
    %c0_224 = arith.constant 0 : index
    %c0_225 = arith.constant 0 : index
    %293 = vector.load %arg8[%c3_223, %c0_224, %c0_225] : memref<9x128x128xf32, #tpu.memory_space<vmem>>, vector<1x128x128xf32>
    %294 = vector.shape_cast %293 : vector<1x128x128xf32> to vector<128x128xf32>
    %cst_226 = arith.constant dense<0.000000e+00> : vector<4x128xf32>
    %295 = tpu.matmul %292, %294, %cst_226 {dimension_numbers = #tpu.dot_dimension_numbers<[1], [0], [0], [1], [0, 0, 1, 1], [], []>} : vector<4x128xf32>, vector<128x128xf32>, vector<4x128xf32> -> vector<4x128xf32>
    %296 = arith.addf %287, %295 : vector<4x128xf32>
    %c3_227 = arith.constant 3 : index
    %c0_228 = arith.constant 0 : index
    %297 = vector.load %arg16[%c3_227, %c0_228] : memref<280x128xf32, #tpu.memory_space<vmem>>, vector<4x128xf32>
    %c4_229 = arith.constant 4 : index
    %c0_230 = arith.constant 0 : index
    %c0_231 = arith.constant 0 : index
    %298 = vector.load %arg8[%c4_229, %c0_230, %c0_231] : memref<9x128x128xf32, #tpu.memory_space<vmem>>, vector<1x128x128xf32>
    %299 = vector.shape_cast %298 : vector<1x128x128xf32> to vector<128x128xf32>
    %cst_232 = arith.constant dense<0.000000e+00> : vector<4x128xf32>
    %300 = tpu.matmul %297, %299, %cst_232 {dimension_numbers = #tpu.dot_dimension_numbers<[1], [0], [0], [1], [0, 0, 1, 1], [], []>} : vector<4x128xf32>, vector<128x128xf32>, vector<4x128xf32> -> vector<4x128xf32>
    %301 = arith.addf %296, %300 : vector<4x128xf32>
    %c4_233 = arith.constant 4 : index
    %c0_234 = arith.constant 0 : index
    %302 = vector.load %arg16[%c4_233, %c0_234] : memref<280x128xf32, #tpu.memory_space<vmem>>, vector<4x128xf32>
    %cst_235 = arith.constant 0.000000e+00 : f32
    %303 = vector.shape_cast %265 : vector<4x1xi1> to vector<4x1xi1>
    %304 = vector.broadcast %303 : vector<4x1xi1> to vector<4x128xi1>
    %305 = vector.broadcast %cst_235 : f32 to vector<4x128xf32>
    %306 = arith.select %304, %302, %305 : vector<4x128xi1>, vector<4x128xf32>
    %c5_236 = arith.constant 5 : index
    %c0_237 = arith.constant 0 : index
    %c0_238 = arith.constant 0 : index
    %307 = vector.load %arg8[%c5_236, %c0_237, %c0_238] : memref<9x128x128xf32, #tpu.memory_space<vmem>>, vector<1x128x128xf32>
    %308 = vector.shape_cast %307 : vector<1x128x128xf32> to vector<128x128xf32>
    %cst_239 = arith.constant dense<0.000000e+00> : vector<4x128xf32>
    %309 = tpu.matmul %306, %308, %cst_239 {dimension_numbers = #tpu.dot_dimension_numbers<[1], [0], [0], [1], [0, 0, 1, 1], [], []>} : vector<4x128xf32>, vector<128x128xf32>, vector<4x128xf32> -> vector<4x128xf32>
    %310 = arith.addf %301, %309 : vector<4x128xf32>
    %c4_240 = arith.constant 4 : index
    %c0_241 = arith.constant 0 : index
    %311 = vector.load %arg16[%c4_240, %c0_241] : memref<280x128xf32, #tpu.memory_space<vmem>>, vector<4x128xf32>
    %cst_242 = arith.constant 0.000000e+00 : f32
    %312 = vector.shape_cast %263 : vector<4x1xi1> to vector<4x1xi1>
    %313 = vector.broadcast %312 : vector<4x1xi1> to vector<4x128xi1>
    %314 = vector.broadcast %cst_242 : f32 to vector<4x128xf32>
    %315 = arith.select %313, %311, %314 : vector<4x128xi1>, vector<4x128xf32>
    %c6_243 = arith.constant 6 : index
    %c0_244 = arith.constant 0 : index
    %c0_245 = arith.constant 0 : index
    %316 = vector.load %arg8[%c6_243, %c0_244, %c0_245] : memref<9x128x128xf32, #tpu.memory_space<vmem>>, vector<1x128x128xf32>
    %317 = vector.shape_cast %316 : vector<1x128x128xf32> to vector<128x128xf32>
    %cst_246 = arith.constant dense<0.000000e+00> : vector<4x128xf32>
    %318 = tpu.matmul %315, %317, %cst_246 {dimension_numbers = #tpu.dot_dimension_numbers<[1], [0], [0], [1], [0, 0, 1, 1], [], []>} : vector<4x128xf32>, vector<128x128xf32>, vector<4x128xf32> -> vector<4x128xf32>
    %319 = arith.addf %310, %318 : vector<4x128xf32>
    %c5_247 = arith.constant 5 : index
    %c0_248 = arith.constant 0 : index
    %320 = vector.load %arg16[%c5_247, %c0_248] : memref<280x128xf32, #tpu.memory_space<vmem>>, vector<4x128xf32>
    %c7_249 = arith.constant 7 : index
    %c0_250 = arith.constant 0 : index
    %c0_251 = arith.constant 0 : index
    %321 = vector.load %arg8[%c7_249, %c0_250, %c0_251] : memref<9x128x128xf32, #tpu.memory_space<vmem>>, vector<1x128x128xf32>
    %322 = vector.shape_cast %321 : vector<1x128x128xf32> to vector<128x128xf32>
    %cst_252 = arith.constant dense<0.000000e+00> : vector<4x128xf32>
    %323 = tpu.matmul %320, %322, %cst_252 {dimension_numbers = #tpu.dot_dimension_numbers<[1], [0], [0], [1], [0, 0, 1, 1], [], []>} : vector<4x128xf32>, vector<128x128xf32>, vector<4x128xf32> -> vector<4x128xf32>
    %324 = arith.addf %319, %323 : vector<4x128xf32>
    %c6_253 = arith.constant 6 : index
    %c0_254 = arith.constant 0 : index
    %325 = vector.load %arg16[%c6_253, %c0_254] : memref<280x128xf32, #tpu.memory_space<vmem>>, vector<4x128xf32>
    %cst_255 = arith.constant 0.000000e+00 : f32
    %326 = vector.shape_cast %265 : vector<4x1xi1> to vector<4x1xi1>
    %327 = vector.broadcast %326 : vector<4x1xi1> to vector<4x128xi1>
    %328 = vector.broadcast %cst_255 : f32 to vector<4x128xf32>
    %329 = arith.select %327, %325, %328 : vector<4x128xi1>, vector<4x128xf32>
    %c8_256 = arith.constant 8 : index
    %c0_257 = arith.constant 0 : index
    %c0_258 = arith.constant 0 : index
    %330 = vector.load %arg8[%c8_256, %c0_257, %c0_258] : memref<9x128x128xf32, #tpu.memory_space<vmem>>, vector<1x128x128xf32>
    %331 = vector.shape_cast %330 : vector<1x128x128xf32> to vector<128x128xf32>
    %cst_259 = arith.constant dense<0.000000e+00> : vector<4x128xf32>
    %332 = tpu.matmul %329, %331, %cst_259 {dimension_numbers = #tpu.dot_dimension_numbers<[1], [0], [0], [1], [0, 0, 1, 1], [], []>} : vector<4x128xf32>, vector<128x128xf32>, vector<4x128xf32> -> vector<4x128xf32>
    %333 = arith.addf %324, %332 : vector<4x128xf32>
    %c0_260 = arith.constant 0 : index
    %c0_261 = arith.constant 0 : index
    %334 = vector.load %arg9[%c0_260, %c0_261] : memref<1x128xf32, #tpu.memory_space<vmem>>, vector<1x128xf32>
    %335 = vector.broadcast %334 : vector<1x128xf32> to vector<4x128xf32>
    %336 = arith.addf %333, %335 : vector<4x128xf32>
    %cst_262 = arith.constant 0.000000e+00 : f32
    %337 = vector.broadcast %cst_262 : f32 to vector<4x128xf32>
    %338 = arith.maximumf %336, %337 : vector<4x128xf32>
    %c0_263 = arith.constant 0 : index
    %c0_264 = arith.constant 0 : index
    %339 = vector.load %arg10[%c0_263, %c0_264] : memref<128x5xf32, #tpu.memory_space<vmem>>, vector<128x5xf32>
    %cst_265 = arith.constant dense<0.000000e+00> : vector<4x5xf32>
    %340 = tpu.matmul %338, %339, %cst_265 {dimension_numbers = #tpu.dot_dimension_numbers<[1], [0], [0], [1], [0, 0, 1, 1], [], []>} : vector<4x128xf32>, vector<128x5xf32>, vector<4x5xf32> -> vector<4x5xf32>
    %c0_266 = arith.constant 0 : index
    %c0_267 = arith.constant 0 : index
    %341 = vector.load %arg11[%c0_266, %c0_267] : memref<1x5xf32, #tpu.memory_space<vmem>>, vector<1x5xf32>
    %342 = vector.broadcast %341 : vector<1x5xf32> to vector<4x5xf32>
    %343 = arith.addf %340, %342 : vector<4x5xf32>
    %c0_268 = arith.constant 0 : index
    %c0_269 = arith.constant 0 : index
    %c0_270 = arith.constant 0 : index
    %344 = vector.load %arg15[%c0_268, %c0_269, %c0_270] : memref<1x4x5xf32, #tpu.memory_space<vmem>>, vector<1x4x5xf32>
    %345 = vector.shape_cast %344 : vector<1x4x5xf32> to vector<4x5xf32>
    %346 = vector.shape_cast %343 : vector<4x5xf32> to vector<1x4x5xf32>
    tpu.vector_store %arg15[%c0_268, %c0_269, %c0_270], %346 {strides = array<i32>} : memref<1x4x5xf32, #tpu.memory_space<vmem>>, vector<1x4x5xf32>,
    return
  }
  func.func @transform_0(%arg0: i32) -> (i32, i32, i32) {
    %c0_i32 = arith.constant 0 : i32
    %c0_i32_0 = arith.constant 0 : i32
    %c0_i32_1 = arith.constant 0 : i32
    return %arg0, %c0_i32, %c0_i32_0 : i32, i32, i32
  }
  func.func @transform_1(%arg0: i32) -> (i32, i32) {
    %c0_i32 = arith.constant 0 : i32
    %c0_i32_0 = arith.constant 0 : i32
    %c0_i32_1 = arith.constant 0 : i32
    return %c0_i32, %c0_i32_0 : i32, i32
  }
  func.func @transform_2(%arg0: i32) -> (i32, i32) {
    %c0_i32 = arith.constant 0 : i32
    %c0_i32_0 = arith.constant 0 : i32
    %c0_i32_1 = arith.constant 0 : i32
    return %c0_i32, %c0_i32_0 : i32, i32
  }
  func.func @transform_3(%arg0: i32) -> (i32, i32, i32) {
    %c0_i32 = arith.constant 0 : i32
    %c0_i32_0 = arith.constant 0 : i32
    %c0_i32_1 = arith.constant 0 : i32
    %c0_i32_2 = arith.constant 0 : i32
    return %c0_i32, %c0_i32_0, %c0_i32_1 : i32, i32, i32
  }
  func.func @transform_4(%arg0: i32) -> (i32, i32) {
    %c0_i32 = arith.constant 0 : i32
    %c0_i32_0 = arith.constant 0 : i32
    %c0_i32_1 = arith.constant 0 : i32
    return %c0_i32, %c0_i32_0 : i32, i32
  }
  func.func @transform_5(%arg0: i32) -> (i32, i32, i32) {
    %c0_i32 = arith.constant 0 : i32
    %c0_i32_0 = arith.constant 0 : i32
    %c0_i32_1 = arith.constant 0 : i32
    %c0_i32_2 = arith.constant 0 : i32
    return %c0_i32, %c0_i32_0, %c0_i32_1 : i32, i32, i32
  }
  func.func @transform_6(%arg0: i32) -> (i32, i32) {
    %c0_i32 = arith.constant 0 : i32
    %c0_i32_0 = arith.constant 0 : i32
    %c0_i32_1 = arith.constant 0 : i32
    return %c0_i32, %c0_i32_0 : i32, i32
  }
  func.func @transform_7(%arg0: i32) -> (i32, i32, i32) {
    %c0_i32 = arith.constant 0 : i32
    %c0_i32_0 = arith.constant 0 : i32
    %c0_i32_1 = arith.constant 0 : i32
    %c0_i32_2 = arith.constant 0 : i32
    return %c0_i32, %c0_i32_0, %c0_i32_1 : i32, i32, i32
  }
  func.func @transform_8(%arg0: i32) -> (i32, i32) {
    %c0_i32 = arith.constant 0 : i32
    %c0_i32_0 = arith.constant 0 : i32
    %c0_i32_1 = arith.constant 0 : i32
    return %c0_i32, %c0_i32_0 : i32, i32
  }
  func.func @transform_9(%arg0: i32) -> (i32, i32) {
    %c0_i32 = arith.constant 0 : i32
    %c0_i32_0 = arith.constant 0 : i32
    %c0_i32_1 = arith.constant 0 : i32
    return %c0_i32, %c0_i32_0 : i32, i32
  }
  func.func @transform_10(%arg0: i32) -> (i32, i32) {
    %c0_i32 = arith.constant 0 : i32
    %c0_i32_0 = arith.constant 0 : i32
    %c0_i32_1 = arith.constant 0 : i32
    return %c0_i32, %c0_i32_0 : i32, i32
  }
  func.func @transform_11(%arg0: i32) -> (i32, i32) {
    %c0_i32 = arith.constant 0 : i32
    %c0_i32_0 = arith.constant 0 : i32
    %c0_i32_1 = arith.constant 0 : i32
    return %c0_i32, %c0_i32_0 : i32, i32
  }
  func.func @transform_12(%arg0: i32) -> (i32, i32) {
    %c0_i32 = arith.constant 0 : i32
    %c0_i32_0 = arith.constant 0 : i32
    %c0_i32_1 = arith.constant 0 : i32
    return %c0_i32, %c0_i32_0 : i32, i32
  }
  func.func @transform_13(%arg0: i32) -> (i32, i32) {
    %c0_i32 = arith.constant 0 : i32
    %c0_i32_0 = arith.constant 0 : i32
    %c0_i32_1 = arith.constant 0 : i32
    return %c0_i32, %c0_i32_0 : i32, i32
  }
  func.func @transform_14(%arg0: i32) -> (i32, i32, i32) {
    %c0_i32 = arith.constant 0 : i32
    %c0_i32_0 = arith.constant 0 : i32
    %c0_i32_1 = arith.constant 0 : i32
    return %arg0, %c0_i32, %c0_i32_0 : i32, i32, i32
  }
}

</mosaic_0001>

<bundles_post_ra>
// kernel: detectnet_forward.1
= control target key start
LH: loop header
LB: loop body
LE: loop exit
PB: predicated region body
PF: predicated region fallthrough
CT: control target
= control target key end

     0   :  { %s5883_s0 = inlined_call_operand.vmem [shape: f32[2,256,128], index: 0, kind: input, shape index: {}]   ;;  %s5884_s1 = inlined_call_operand.vmem [shape: f32[128,128], index: 1, kind: input, shape index: {}]   ;;  %s5885_s2 = inlined_call_operand.vmem [shape: f32[1,128], index: 2, kind: input, shape index: {}]   ;;  %s5886_s3 = inlined_call_operand.vmem [shape: f32[9,128,128], index: 3, kind: input, shape index: {}]   ;;  %s5887_s4 = inlined_call_operand.vmem [shape: f32[1,128], index: 4, kind: input, shape index: {}]   ;;  %s5888_s5 = inlined_call_operand.vmem [shape: f32[9,128,128], index: 5, kind: input, shape index: {}]   ;;  %s5889_s6 = inlined_call_operand.vmem [shape: f32[1,128], index: 6, kind: input, shape index: {}]   ;;  %s5890_s7 = inlined_call_operand.vmem [shape: f32[9,128,128], index: 7, kind: input, shape index: {}]   ;;  %s5891_s8 = inlined_call_operand.vmem [shape: f32[1,128], index: 8, kind: input, shape index: {}]   ;;  %s5892_s9 = inlined_call_operand.vmem [shape: f32[128,5], index: 9, kind: input, shape index: {}]   ;;  %s5893_s10 = inlined_call_operand.vmem [shape: f32[1,5], index: 10, kind: input, shape index: {}]   ;;  %s5894_s11 = inlined_call_operand.vmem [shape: f32[64,256], index: 11, kind: input, shape index: {}]   ;;  %s5895_s12 = inlined_call_operand.vmem [shape: f32[16,64], index: 12, kind: input, shape index: {}]   ;;  %s5896_s13 = inlined_call_operand.vmem [shape: f32[4,16], index: 13, kind: input, shape index: {}]   ;;  %s5897_s14 = inlined_call_operand.hbm [shape: f32[2,4,5], index: 14, kind: output, shape index: {}]  }
   0x1   :  { %5903 = sst [smem:[#allocation11_spill]] %s5883_s0 }
   0x2   :  { %19 = vsyncpa [#allocation4], 0 }
   0x3   :  { %21 = vsyncpa [#allocation4 + $0x1], 0  ;;  %s3562_s29 = smov 0   ;;  %s3564_s30 = smov 0  }
   0x4   :  { %s3566_s15 = smov 0   ;;  %s3568_s16 = smov 0  }
   0x5 LB: > { %5904 = sst [smem:[#allocation6_spill]] %s3472_s29  ;;  %s3583_s17 = sadd.s32 4294967295, %s3484_s16   ;;  %s3484_s16 = sphi %s3568_s16, %s5958_s16   ;;  %s3480_s15 = sphi %s3566_s15, %s5960_s15   ;;  %s3476_s30 = sphi %s3564_s30, %s5962_s30   ;;  %s3472_s29 = sphi %s3562_s29, %s5961_s29  }
   0x6   : > { %5905 = sst [smem:[#allocation7_spill]] %s3480_s15  ;;  %s2910_s18 = sadd.s32 4294967294, %s3484_s16  }
   0x7   : > { %s3587_s19 = sadd.s32 1, %s3484_s16   ;;  %s333_s20 = sadd.s32 1, %s3480_s15 }
   0x8   : > { %5906 = sst [smem:[#allocation8_spill]] %s3587_s19  ;;  %s330_s21 = ssub.s32 %s3484_s16, %s3587_s19 }
   0x9   : > { %p343_p0 = scmp.ne.s32.totalorder %s3480_s15, %s3476_s30  ;;  %p331_p1 = scmp.eq.s32.totalorder %s330_s21, 0 }
   0xa   : > { %p344_p2 = scmp.eq.s32.totalorder %s3583_s17, 1  ;;  %p349_p3 = scmp.ne.s32.totalorder %s3476_s30, %s3472_s29 }
   0xb   : > { %p350_p4 = scmp.eq.s32.totalorder %s2910_s18, 1  ;;  %p2913_p7 = scmp.ge.s32.totalorder %s3484_s16, 1 }
   0xc   : > { %s3598_s22 = scalar_select %p331_p1, %s3480_s15, %s333_s20  }
   0xd   : > { %p3600_p5 = por %p344_p2, %p343_p0  ;;  %p3604_p6 = por %p350_p4, %p349_p3 }
   0xe   : > { %5907 = sst [smem:[#allocation9_spill]] %s3598_s22  ;;  %p415_p8 = scmp.lt.s32.totalorder %s3484_s16, 3 }
   0xf   : > { %s5909_s24 = scalar_select %p3604_p6, 1, 0 }
  0x10   : > { %p416_p9 = pnand %p2913_p7, %p415_p8 }
  0x11   : > { %5910 = sst [smem:[#allocation10_spill]] %s5909_s24  ;;  %p461_p10 = scmp.lt.s32.totalorder (!%p416_p9), %s3583_s17, 1 }
  0x12   : > { %419 = sbr.rel (%p416_p9) target bundleno = 1742 (0x6ce), region = 76  ;;  %s5911_s0 = sld [smem:[#allocation11_spill]] (!%p416_p9) }
  0x13   : > { %s458_s21 = sand.u32 (!%p416_p9), 1, %s3476_s30   ;;  %s3371_s26 = sshll.u32 (!%p416_p9), %s3583_s17, 2 }
  0x14   : > { %s2914_s25 = sshll.u32 (!%p416_p9), %s458_s21, 2  ;;  %s2846_s18 = scalar_lea.hbm (!%p416_p9), %s5897_s14, %s3371_s26 }
  0x15   : > { %s460_s22 = scalar_lea.vmem (!%p416_p9), [#allocation3], %s2914_s25  ;;  %s2836_s19 = scalar_lea.sflag (!%p416_p9), [#allocation4], %s458_s21 }
  0x16   : > { %s2848_s20 = sshll.u32 (!%p416_p9), %s460_s22, 4  ;;  %s3442_s25 = scalar_lea.hbm (!%p416_p9), %s5897_s14, 8  ;;  %s2849_s20 = int_to_ptr.vmem [resolvable:$true] %s2848_s20 }
  0x17   : > { %v513_v0 = vld [vmem:[%s5884_s1 + $0x78] sm:$0xff]  ;;  %v512_v1 = vld [vmem:[%s5884_s1 + $0x70] sm:$0xff]  ;;  %v511_v2 = vld [vmem:[%s5884_s1 + $0x68] sm:$0xff]  ;;  %s462_s27 = scalar_select %p461_p10, %s3583_s17, 1  ;;  %v3486_v30 = vmov 0.0  }
  0x18   : > { %518 = vmatpush.msra.mxu0 %v513_v0  ;;  %v510_v3 = vld [vmem:[%s5884_s1 + $0x60] sm:$0xff]  ;;  %v509_v4 = vld [vmem:[%s5884_s1 + $0x58] sm:$0xff]  ;;  %v508_v5 = vld [vmem:[%s5884_s1 + $0x50] sm:$0xff]  ;;  %663 = vst [vmem:[#allocation2 + $0x100] sm:$0xff] %v3486_v30 }
  0x19   : > { %v507_v6 = vld [vmem:[%s5884_s1 + $0x48] sm:$0xff]  ;;  %v506_v7 = vld [vmem:[%s5884_s1 + $0x40] sm:$0xff]  ;;  %v505_v8 = vld [vmem:[%s5884_s1 + $0x38] sm:$0xff]  ;;  %s3374_s15 = sshll.u32 %s462_s27, 8  ;;  %664 = vst [vmem:[#allocation2 + $0x108] sm:$0xff] %v3486_v30 }
  0x1a   : > { %519 = vmatpush.msra.mxu0 %v512_v1  ;;  %v504_v9 = vld [vmem:[%s5884_s1 + $0x30] sm:$0xff]  ;;  %v503_v10 = vld [vmem:[%s5884_s1 + $0x28] sm:$0xff]  ;;  %v502_v11 = vld [vmem:[%s5884_s1 + $0x20] sm:$0xff]  ;;  %s3660_s28 = scalar_lea.vmem %s5911_s0, %s3374_s15  ;;  %665 = vst [vmem:[#allocation2 + $0x110] sm:$0x1] %v3486_v30  ;;  %s2850_s15 = sshll.u32 %s2846_s18, 4  ;;  %s2851_s15 = int_to_ptr.hbm [resolvable:$true] %s2850_s15 }
  0x1b   : > { %v501_v12 = vld [vmem:[%s5884_s1 + $0x18] sm:$0xff]  ;;  %v500_v13 = vld [vmem:[%s5884_s1 + $0x10] sm:$0xff]  ;;  %v499_v14 = vld [vmem:[%s5884_s1 + $0x8] sm:$0xff]  ;;  %s3436_s17 = sshra.s32 %s2851_s15, 4  ;;  %s3437_s17 = int_to_ptr.hbm [resolvable:$true] %s3436_s17 }
  0x1c   : > { %520 = vmatpush.msra.mxu0 %v511_v2  ;;  %v498_v15 = vld [vmem:[%s5884_s1] sm:$0xff]  ;;  %v467_v17 = vld [vmem:[%s3660_s28 + $0x8] sm:$0xff]  ;;  %v468_v18 = vld [vmem:[%s3660_s28 + $0x10] sm:$0xff]  ;;  %s3438_s0 = scalar_lea.hbm %s3437_s17, 4  ;;  %p3443_p0 = scmp.lt.s32.totalorder %s3437_s17, %s5897_s14 }
  0x1d   : > { %v466_v16 = vld [vmem:[%s3660_s28] sm:$0xff]  ;;  %v469_v19 = vld [vmem:[%s3660_s28 + $0x18] sm:$0xff]  ;;  %v471_v21 = vld [vmem:[%s3660_s28 + $0x28] sm:$0xff]  ;;  %p3439_p11 = scmp.ne.s32.totalorder %s3437_s17, %s3438_s0  ;;  %p3444_p1 = scmp.lt.s32.totalorder %s3442_s25, %s3438_s0 }
  0x1e   : > { %521 = vmatpush.msra.mxu0 %v510_v3  ;;  %v470_v20 = vld [vmem:[%s3660_s28 + $0x20] sm:$0xff]  ;;  %v472_v22 = vld [vmem:[%s3660_s28 + $0x30] sm:$0xff]  ;;  %v473_v23 = vld [vmem:[%s3660_s28 + $0x38] sm:$0xff] }
  0x1f   : > { %v474_v24 = vld [vmem:[%s3660_s28 + $0x40] sm:$0xff]  ;;  %v475_v25 = vld [vmem:[%s3660_s28 + $0x48] sm:$0xff]  ;;  %v476_v26 = vld [vmem:[%s3660_s28 + $0x50] sm:$0xff]  ;;  %p3440_p12 = pnand %p3439_p11, %p3600_p5  ;;  %p3445_p2 = por %p3444_p1, %p3443_p0 }
  0x20   : > { %522 = vmatpush.msra.mxu0 %v509_v4  ;;  %v477_v27 = vld [vmem:[%s3660_s28 + $0x58] sm:$0xff]  ;;  %v478_v28 = vld [vmem:[%s3660_s28 + $0x60] sm:$0xff]  ;;  %v479_v29 = vld [vmem:[%s3660_s28 + $0x68] sm:$0xff] }
  0x21   : > { %v480_v31 = vld [vmem:[%s3660_s28 + $0x70] sm:$0xff]  ;;  %v481_v32 = vld [vmem:[%s3660_s28 + $0x78] sm:$0xff]  ;;  %v3687_v33 = vld [vmem:[%s5885_s2] ss:$0 sm:$0xff]  ;;  %p3441_p13 = pneg %p3440_p12 }
  0x22   : > { %523 = vmatpush.msra.mxu0 %v508_v5  ;;  %v482_v35 = vld [vmem:[%s3660_s28 + $0x80] sm:$0xff]  ;;  %v483_v39 = vld [vmem:[%s3660_s28 + $0x88] sm:$0xff]  ;;  %v484_v43 = vld [vmem:[%s3660_s28 + $0x90] sm:$0xff] }
  0x23   : > { %v485_v50 = vld [vmem:[%s3660_s28 + $0x98] sm:$0xff]  ;;  %v486_v56 = vld [vmem:[%s3660_s28 + $0xa0] sm:$0xff]  ;;  %v487_v0 = vld [vmem:[%s3660_s28 + $0xa8] sm:$0xff]  ;;  %p3446_p3 = pnand %p3445_p2, %p3441_p13 }
  0x24   : > { %524 = vmatpush.msra.mxu0 %v507_v6 }
  0x26   : > { %525 = vmatpush.msra.mxu0 %v506_v7  ;;  %v488_v7 = vld [vmem:[%s3660_s28 + $0xb0] sm:$0xff] }
  0x28   : > { %526 = vmatpush.msra.mxu0 %v505_v8 }
  0x2a   : > { %527 = vmatpush.msra.mxu0 %v504_v9 }
  0x2c   : > { %528 = vmatpush.msra.mxu0 %v503_v10 }
  0x2e   : > { %529 = vmatpush.msra.mxu0 %v502_v11 }
  0x30   : > { %530 = vmatpush.msra.mxu0 %v501_v12 }
  0x32   : > { %531 = vmatpush.msra.mxu0 %v500_v13 }
  0x34   : > { %532 = vmatpush.msra.mxu0 %v499_v14  ;;  %v489_v14 = vld [vmem:[%s3660_s28 + $0xb8] sm:$0xff] }
  0x36   : > { %533 = vmatpush.msra.mxu0 %v498_v15 }
  0x37   : > { %534 = vmatmul.f32.vlgmr.msra.gmra.mxu0 %v466_v16 }
  0x3f   : > { %537 = vmatmul.f32.gmra.mxu0 %v467_v17 }
  0x47   : > { %540 = vmatmul.f32.gmra.mxu0 %v468_v18 }
  0x4f   : > { %543 = vmatmul.f32.gmra.mxu0 %v469_v19 }
  0x57   : > { %546 = vmatmul.f32.gmra.mxu0 %v470_v20 }
  0x5f   : > { %549 = vmatmul.f32.gmra.mxu0 %v471_v21  ;;  %v490_v21 = vld [vmem:[%s3660_s28 + $0xc0] sm:$0xff] }
  0x67   : > { %552 = vmatmul.f32.gmra.mxu0 %v472_v22 }
  0x6f   : > { %555 = vmatmul.f32.gmra.mxu0 %v473_v23 }
  0x77   : > { %558 = vmatmul.f32.gmra.mxu0 %v474_v24 }
  0x7f   : > { %561 = vmatmul.f32.gmra.mxu0 %v475_v25 }
  0x87   : > { %564 = vmatmul.f32.gmra.mxu0 %v476_v26 }
  0x8f   : > { %567 = vmatmul.f32.gmra.mxu0 %v477_v27 }
  0x97   : > { %570 = vmatmul.f32.gmra.mxu0 %v478_v28  ;;  %v491_v28 = vld [vmem:[%s3660_s28 + $0xc8] sm:$0xff] }
  0x9f   : > { %573 = vmatmul.f32.gmra.mxu0 %v479_v29 }
  0xa7   : > { %576 = vmatmul.f32.gmra.mxu0 %v480_v31 }
  0xaf   : > { %579 = vmatmul.f32.gmra.mxu0 %v481_v32 }
  0xb4   : > { %v535_v34 = vpop.f32.mrf.mxu0 }
  0xb5   : > { %v536_v36 = vadd.f32 %v3687_v33, %v535_v34 }
  0xb7   : > { %v631_v37 = vmax.f32 %v536_v36, 0.0  ;;  %582 = vmatmul.f32.gmra.mxu0 %v482_v35 }
  0xb9   : > { %666 = vst [vmem:[#allocation2] sm:$0xff] %v631_v37 }
  0xbc   : > { %v538_v38 = vpop.f32.mrf.mxu0 }
  0xbd   : > { %v539_v40 = vadd.f32 %v3687_v33, %v538_v38 }
  0xbf   : > { %v632_v41 = vmax.f32 %v539_v40, 0.0  ;;  %585 = vmatmul.f32.gmra.mxu0 %v483_v39 }
  0xc1   : > { %667 = vst [vmem:[#allocation2 + $0x8] sm:$0xff] %v632_v41 }
  0xc4   : > { %v541_v42 = vpop.f32.mrf.mxu0 }
  0xc5   : > { %v542_v44 = vadd.f32 %v3687_v33, %v541_v42 }
  0xc7   : > { %v3695_v45 = vmax.f32 %v542_v44, 0.0  ;;  %588 = vmatmul.f32.gmra.mxu0 %v484_v43  ;;  %v493_v44 = vld [vmem:[%s3660_s28 + $0xd8] sm:$0xff] }
  0xc8   : > { %v698_v46 = vld [vmem:[#allocation2 + $0x1] sm:$0xff] }
  0xc9   : > { %959 = vst [vmem:[#allocation2 + $0x8] sm:$0x1] %v3486_v30  ;;  %v3698_v47 = vmax.f32 %v631_v37, %v698_v46  ;;  %v492_v37 = vld [vmem:[%s3660_s28 + $0xd0] sm:$0xff] }
  0xca   : > { %958 = vst [vmem:[#allocation2] sm:$0xff] %v3486_v30 }
  0xcb   : > { %668 = vst [vmem:[#allocation2 + $0x10] sm:$0xff] %v3695_v45  ;;  %v794_v48 = vmax.f32 %v3698_v47, %v3695_v45 }
  0xcc   : > { %v544_v49 = vpop.f32.mrf.mxu0 }
  0xcd   : > { %v545_v51 = vadd.f32 %v3687_v33, %v544_v49 }
  0xcf   : > { %v3706_v52 = vmax.f32 %v545_v51, 0.0  ;;  %591 = vmatmul.f32.gmra.mxu0 %v485_v50 }
  0xd1   : > { %669 = vst [vmem:[#allocation2 + $0x18] sm:$0xff] %v3706_v52 }
  0xd2   : > { %v699_v53 = vld [vmem:[#allocation2 + $0x9] sm:$0xff] }
  0xd3   : > { %v3709_v54 = vmax.f32 %v632_v41, %v699_v53 }
  0xd4   : > { %v547_v55 = vpop.f32.mrf.mxu0 }
  0xd5   : > { %v548_v57 = vadd.f32 %v3687_v33, %v547_v55  ;;  %v795_v58 = vmax.f32 %v3709_v54, %v3706_v52 }
  0xd7   : > { %v635_v59 = vmax.f32 %v548_v57, 0.0  ;;  %594 = vmatmul.f32.gmra.mxu0 %v486_v56  ;;  %v494_v57 = vld [vmem:[%s3660_s28 + $0xe0] sm:$0xff] }
  0xd8   : > { %v3715_v60 = vld [vmem:[#allocation2 + $0x11] sm:$0xff] }
  0xd9   : > { %670 = vst [vmem:[#allocation2 + $0x20] sm:$0xff] %v635_v59  ;;  %v732_v61 = vmax.f32 %v3695_v45, %v3715_v60 }
  0xdb   : > { %v3719_v62 = vmax.f32 %v732_v61, %v635_v59 }
  0xdc   : > { %v550_v63 = vpop.f32.mrf.mxu0 }
  0xdd   : > { %v551_v1 = vadd.f32 %v3687_v33, %v550_v63 }
  0xdf   : > { %v636_v2 = vmax.f32 %v551_v1, 0.0  ;;  %597 = vmatmul.f32.gmra.mxu0 %v487_v0 }
  0xe0   : > { %v3723_v3 = vld [vmem:[#allocation2 + $0x19] sm:$0xff] }
  0xe1   : > { %671 = vst [vmem:[#allocation2 + $0x28] sm:$0xff] %v636_v2  ;;  %v733_v4 = vmax.f32 %v3706_v52, %v3723_v3 }
  0xe3   : > { %v3727_v5 = vmax.f32 %v733_v4, %v636_v2 }
  0xe4   : > { %v553_v6 = vpop.f32.mrf.mxu0 }
  0xe5   : > { %v554_v8 = vadd.f32 %v3687_v33, %v553_v6  ;;  %v495_v6 = vld [vmem:[%s3660_s28 + $0xe8] sm:$0xff] }
  0xe7   : > { %v637_v9 = vmax.f32 %v554_v8, 0.0  ;;  %600 = vmatmul.f32.gmra.mxu0 %v488_v7 }
  0xe8   : > { %v3731_v10 = vld [vmem:[#allocation2 + $0x21] sm:$0xff] }
  0xe9   : > { %672 = vst [vmem:[#allocation2 + $0x30] sm:$0xff] %v637_v9  ;;  %v734_v11 = vmax.f32 %v635_v59, %v3731_v10 }
  0xeb   : > { %v3734_v12 = vmax.f32 %v734_v11, %v637_v9  ;;  %v496_v11 = vld [vmem:[%s3660_s28 + $0xf0] sm:$0xff] }
  0xec   : > { %v556_v13 = vpop.f32.mrf.mxu0 }
  0xed   : > { %v557_v15 = vadd.f32 %v3687_v33, %v556_v13 }
  0xef   : > { %v638_v16 = vmax.f32 %v557_v15, 0.0  ;;  %603 = vmatmul.f32.gmra.mxu0 %v489_v14 }
  0xf0   : > { %v3738_v17 = vld [vmem:[#allocation2 + $0x29] sm:$0xff] }
  0xf1   : > { %673 = vst [vmem:[#allocation2 + $0x38] sm:$0xff] %v638_v16  ;;  %v735_v18 = vmax.f32 %v636_v2, %v3738_v17 }
  0xf3   : > { %v3741_v19 = vmax.f32 %v735_v18, %v638_v16 }
  0xf4   : > { %v559_v20 = vpop.f32.mrf.mxu0 }
  0xf5   : > { %v560_v22 = vadd.f32 %v3687_v33, %v559_v20 }
  0xf7   : > { %v639_v23 = vmax.f32 %v560_v22, 0.0  ;;  %606 = vmatmul.f32.gmra.mxu0 %v490_v21 }
  0xf8   : > { %v3745_v24 = vld [vmem:[#allocation2 + $0x31] sm:$0xff] }
  0xf9   : > { %674 = vst [vmem:[#allocation2 + $0x40] sm:$0xff] %v639_v23  ;;  %v736_v25 = vmax.f32 %v637_v9, %v3745_v24 }
  0xfb   : > { %v3748_v26 = vmax.f32 %v736_v25, %v639_v23 }
  0xfc   : > { %v562_v27 = vpop.f32.mrf.mxu0 }
  0xfd   : > { %v563_v29 = vadd.f32 %v3687_v33, %v562_v27 }
  0xff   : > { %v640_v31 = vmax.f32 %v563_v29, 0.0  ;;  %609 = vmatmul.f32.gmra.mxu0 %v491_v28 }
 0x100   : > { %v3752_v32 = vld [vmem:[#allocation2 + $0x39] sm:$0xff] }
 0x101   : > { %675 = vst [vmem:[#allocation2 + $0x48] sm:$0xff] %v640_v31  ;;  %v737_v34 = vmax.f32 %v638_v16, %v3752_v32  ;;  %v497_v16 = vld [vmem:[%s3660_s28 + $0xf8] sm:$0xff] }
 0x103   : > { %v3755_v35 = vmax.f32 %v737_v34, %v640_v31 }
 0x104   : > { %v565_v36 = vpop.f32.mrf.mxu0 }
 0x105   : > { %v566_v38 = vadd.f32 %v3687_v33, %v565_v36 }
 0x107   : > { %v641_v39 = vmax.f32 %v566_v38, 0.0  ;;  %612 = vmatmul.f32.gmra.mxu0 %v492_v37 }
 0x108   : > { %v3759_v40 = vld [vmem:[#allocation2 + $0x41] sm:$0xff] }
 0x109   : > { %676 = vst [vmem:[#allocation2 + $0x50] sm:$0xff] %v641_v39  ;;  %v738_v41 = vmax.f32 %v639_v23, %v3759_v40 }
 0x10b   : > { %v3762_v42 = vmax.f32 %v738_v41, %v641_v39 }
 0x10c   : > { %v568_v43 = vpop.f32.mrf.mxu0 }
 0x10d   : > { %v569_v46 = vadd.f32 %v3687_v33, %v568_v43 }
 0x10f   : > { %v3766_v49 = vmax.f32 %v569_v46, 0.0  ;;  %615 = vmatmul.f32.gmra.mxu0 %v493_v44 }
 0x110   : > { %v3768_v50 = vld [vmem:[#allocation2 + $0x49] sm:$0xff] }
 0x111   : > { %677 = vst [vmem:[#allocation2 + $0x58] sm:$0xff] %v3766_v49  ;;  %v739_v51 = vmax.f32 %v640_v31, %v3768_v50  ;;  %v835_v53 = vmax.f32 %v3755_v35, %v3768_v50 }
 0x112   : > { %960 = vst [vmem:[#allocation2 + $0x49] sm:$0xff] %v3486_v30 }
 0x113   : > { %v3776_v55 = vmax.f32 %v739_v51, %v3766_v49 }
 0x114   : > { %v571_v56 = vpop.f32.mrf.mxu0 }
 0x115   : > { %v572_v59 = vadd.f32 %v3687_v33, %v571_v56 }
 0x117   : > { %v3780_v61 = vmax.f32 %v572_v59, 0.0  ;;  %618 = vmatmul.f32.gmra.mxu0 %v494_v57 }
 0x118   : > { %v3782_v63 = vld [vmem:[#allocation2 + $0x51] sm:$0xff] }
 0x119   : > { %678 = vst [vmem:[#allocation2 + $0x60] sm:$0xff] %v3780_v61  ;;  %v740_v0 = vmax.f32 %v641_v39, %v3782_v63  ;;  %v836_v1 = vmax.f32 %v3762_v42, %v3782_v63  ;;  %v832_v63 = vmax.f32 %v3734_v12, %v3745_v24  ;;  %v829_v12 = vmax.f32 %v795_v58, %v3723_v3 }
 0x11a   : > { %961 = vst [vmem:[#allocation2 + $0x51] sm:$0x1] %v3486_v30 }
 0x11b   : > { %v3790_v2 = vmax.f32 %v740_v0, %v3780_v61 }
 0x11c   : > { %v574_v4 = vpop.f32.mrf.mxu0 }
 0x11d   : > { %v575_v7 = vadd.f32 %v3687_v33, %v574_v4 }
 0x11f   : > { %v644_v8 = vmax.f32 %v575_v7, 0.0  ;;  %621 = vmatmul.f32.gmra.mxu0 %v495_v6 }
 0x120   : > { %v709_v7 = vld [vmem:[#allocation2 + $0x59] sm:$0xff] }
 0x121   : > { %679 = vst [vmem:[#allocation2 + $0x68] sm:$0xff] %v644_v8 }
 0x124   : > { %v577_v9 = vpop.f32.mrf.mxu0 }
 0x125   : > { %v578_v13 = vadd.f32 %v3687_v33, %v577_v9 }
 0x127   : > { %v645_v14 = vmax.f32 %v578_v13, 0.0  ;;  %624 = vmatmul.f32.gmra.mxu0 %v496_v11 }
 0x128   : > { %v710_v57 = vld [vmem:[#allocation2 + $0x61] sm:$0xff] }
 0x129   : > { %680 = vst [vmem:[#allocation2 + $0x70] sm:$0xff] %v645_v14 }
 0x12c   : > { %v580_v15 = vpop.f32.mrf.mxu0 }
 0x12d   : > { %v581_v18 = vadd.f32 %v3687_v33, %v580_v15  ;;  %v742_v15 = vmax.f32 %v3780_v61, %v710_v57 }
 0x12f   : > { %v646_v20 = vmax.f32 %v581_v18, 0.0  ;;  %627 = vmatmul.f32.gmra.mxu0 %v497_v16 }
 0x130   : > { %v711_v46 = vld [vmem:[#allocation2 + $0x69] sm:$0xff] }
 0x131   : > { %681 = vst [vmem:[#allocation2 + $0x78] sm:$0xff] %v646_v20  ;;  %v743_v4 = vmax.f32 %v644_v8, %v711_v46 }
 0x133   : > { %v807_v18 = vmax.f32 %v743_v4, %v646_v20 }
 0x134   : > { %v583_v21 = vpop.f32.mrf.mxu0 }
 0x135   : > { %v584_v22 = vadd.f32 %v3687_v33, %v583_v21  ;;  %v741_v21 = vmax.f32 %v3766_v49, %v709_v7  ;;  %v838_v49 = vmax.f32 %v3790_v2, %v710_v57  ;;  %v834_v2 = vmax.f32 %v3748_v26, %v3759_v40 }
 0x136   : > { %v831_v26 = vmax.f32 %v3727_v5, %v3738_v17  ;;  %v830_v40 = vmax.f32 %v3719_v62, %v3731_v10  ;;  %v828_v5 = vmax.f32 %v794_v48, %v3715_v60 }
 0x137   : > { %v647_v23 = vmax.f32 %v584_v22, 0.0 }
 0x138   : > { %v712_v39 = vld [vmem:[#allocation2 + $0x71] sm:$0xff] }
 0x139   : > { %682 = vst [vmem:[#allocation2 + $0x80] sm:$0xff] %v647_v23  ;;  %v744_v56 = vmax.f32 %v645_v14, %v712_v39 }
 0x13b   : > { %v808_v13 = vmax.f32 %v744_v56, %v647_v23  ;;  %v833_v56 = vmax.f32 %v3741_v19, %v3752_v32 }
 0x13c   : > { %v586_v25 = vpop.f32.mrf.mxu0 }
 0x13d   : > { %v587_v27 = vadd.f32 %v3687_v33, %v586_v25 }
 0x13f   : > { %v648_v28 = vmax.f32 %v587_v27, 0.0 }
 0x140   : > { %v713_v36 = vld [vmem:[#allocation2 + $0x79] sm:$0xff] }
 0x141   : > { %683 = vst [vmem:[#allocation2 + $0x88] sm:$0xff] %v648_v28  ;;  %v745_v41 = vmax.f32 %v646_v20, %v713_v36 }
 0x143   : > { %v809_v0 = vmax.f32 %v745_v41, %v648_v28  ;;  %v805_v41 = vmax.f32 %v741_v21, %v644_v8 }
 0x144   : > { %v589_v29 = vpop.f32.mrf.mxu0 }
 0x145   : > { %v590_v31 = vadd.f32 %v3687_v33, %v589_v29  ;;  %v841_v29 = vmax.f32 %v807_v18, %v713_v36  ;;  %v839_v61 = vmax.f32 %v805_v41, %v711_v46 }
 0x147   : > { %v649_v34 = vmax.f32 %v590_v31, 0.0  ;;  %v806_v31 = vmax.f32 %v742_v15, %v645_v14  ;;  %v837_v14 = vmax.f32 %v3776_v55, %v709_v7 }
 0x148   : > { %v714_v37 = vld [vmem:[#allocation2 + $0x81] sm:$0xff] }
 0x149   : > { %684 = vst [vmem:[#allocation2 + $0x90] sm:$0xff] %v649_v34  ;;  %v746_v38 = vmax.f32 %v647_v23, %v714_v37  ;;  %v842_v16 = vmax.f32 %v808_v13, %v714_v37 }
 0x14b   : > { %v3801_v43 = vmax.f32 %v746_v38, %v649_v34 }
 0x14c   : > { %v592_v44 = vpop.f32.mrf.mxu0 }
 0x14d   : > { %v593_v51 = vadd.f32 %v3687_v33, %v592_v44 }
 0x14f   : > { %v650_v59 = vmax.f32 %v593_v51, 0.0 }
 0x150   : > { %v715_v6 = vld [vmem:[#allocation2 + $0x89] sm:$0xff] }
 0x151   : > { %685 = vst [vmem:[#allocation2 + $0x98] sm:$0xff] %v650_v59  ;;  %v747_v9 = vmax.f32 %v648_v28, %v715_v6  ;;  %v843_v11 = vmax.f32 %v809_v0, %v715_v6  ;;  %v840_v28 = vmax.f32 %v806_v31, %v712_v39 }
 0x153   : > { %876 = vmatpush.msra.mxu1 %v843_v11  ;;  %v3806_v22 = vmax.f32 %v747_v9, %v650_v59 }
 0x154   : > { %v595_v25 = vpop.f32.mrf.mxu0 }
 0x155   : > { %v596_v27 = vadd.f32 %v3687_v33, %v595_v25  ;;  %877 = vmatpush.msra.mxu1 %v842_v16 }
 0x157   : > { %v651_v38 = vmax.f32 %v596_v27, 0.0  ;;  %878 = vmatpush.msra.mxu1 %v841_v29 }
 0x158   : > { %v3809_v23 = vld [vmem:[#allocation2 + $0x91] sm:$0xff] }
 0x159   : > { %686 = vst [vmem:[#allocation2 + $0xa0] sm:$0xff] %v651_v38  ;;  %879 = vmatpush.msra.mxu1 %v840_v28  ;;  %v748_v20 = vmax.f32 %v649_v34, %v3809_v23 }
 0x15b   : > { %880 = vmatpush.msra.mxu1 %v839_v61  ;;  %v3813_v37 = vmax.f32 %v748_v20, %v651_v38 }
 0x15c   : > { %v598_v44 = vpop.f32.mrf.mxu0 }
 0x15d   : > { %v599_v36 = vadd.f32 %v3687_v33, %v598_v44  ;;  %881 = vmatpush.msra.mxu1 %v838_v49 }
 0x15f   : > { %v652_v39 = vmax.f32 %v599_v36, 0.0  ;;  %882 = vmatpush.msra.mxu1 %v837_v14 }
 0x160   : > { %v3817_v8 = vld [vmem:[#allocation2 + $0x99] sm:$0xff] }
 0x161   : > { %687 = vst [vmem:[#allocation2 + $0xa8] sm:$0xff] %v652_v39  ;;  %883 = vmatpush.msra.mxu1 %v836_v1  ;;  %v749_v34 = vmax.f32 %v650_v59, %v3817_v8 }
 0x163   : > { %884 = vmatpush.msra.mxu1 %v835_v53  ;;  %v3828_v46 = vmax.f32 %v749_v34, %v652_v39 }
 0x164   : > { %v601_v55 = vpop.f32.mrf.mxu0 }
 0x165   : > { %v602_v51 = vadd.f32 %v3687_v33, %v601_v55  ;;  %885 = vmatpush.msra.mxu1 %v834_v2  ;;  %v827_v55 = vld [vmem:[#allocation2 + $0x109] sm:$0xff] }
 0x167   : > { %v653_v42 = vmax.f32 %v602_v51, 0.0  ;;  %886 = vmatpush.msra.mxu1 %v833_v56 }
 0x168   : > { %v3835_v1 = vld [vmem:[#allocation2 + $0xa1] sm:$0xff] }
 0x169   : > { %688 = vst [vmem:[#allocation2 + $0xb0] sm:$0xff] %v653_v42  ;;  %887 = vmatpush.msra.mxu1 %v832_v63  ;;  %v750_v35 = vmax.f32 %v651_v38, %v3835_v1 }
 0x16b   : > { %888 = vmatpush.msra.mxu1 %v831_v26  ;;  %v3842_v50 = vmax.f32 %v750_v35, %v653_v42  ;;  %v826_v26 = vld [vmem:[#allocation2 + $0x101] sm:$0xff] }
 0x16c   : > { %v604_v19 = vpop.f32.mrf.mxu0 }
 0x16d   : > { %v605_v32 = vadd.f32 %v3687_v33, %v604_v19  ;;  %889 = vmatpush.msra.mxu1 %v830_v40 }
 0x16f   : > { %v654_v24 = vmax.f32 %v605_v32, 0.0  ;;  %890 = vmatpush.msra.mxu1 %v829_v12 }
 0x170   : > { %v3853_v17 = vld [vmem:[#allocation2 + $0xa9] sm:$0xff] }
 0x171   : > { %689 = vst [vmem:[#allocation2 + $0xb8] sm:$0xff] %v654_v24  ;;  %891 = vmatpush.msra.mxu1 %v828_v5  ;;  %v751_v62 = vmax.f32 %v652_v39, %v3853_v17 }
 0x173   : > { %v3856_v10 = vmax.f32 %v751_v62, %v654_v24 }
 0x174   : > { %v607_v53 = vpop.f32.mrf.mxu0 }
 0x175   : > { %v608_v57 = vadd.f32 %v3687_v33, %v607_v53 }
 0x177   : > { %v655_v52 = vmax.f32 %v608_v57, 0.0 }
 0x178   : > { %v3859_v54 = vld [vmem:[#allocation2 + $0xb1] sm:$0xff] }
 0x179   : > { %690 = vst [vmem:[#allocation2 + $0xc0] sm:$0xff] %v655_v52  ;;  %v752_v58 = vmax.f32 %v653_v42, %v3859_v54 }
 0x17b   : > { %v3862_v3 = vmax.f32 %v752_v58, %v655_v52 }
 0x17c   : > { %v610_v45 = vpop.f32.mrf.mxu0 }
 0x17d   : > { %v611_v47 = vadd.f32 %v3687_v33, %v610_v45 }
 0x17f   : > { %v3865_v48 = vmax.f32 %v611_v47, 0.0 }
 0x180   : > { %v3867_v60 = vld [vmem:[#allocation2 + $0xb9] sm:$0xff] }
 0x181   : > { %691 = vst [vmem:[#allocation2 + $0xc8] sm:$0xff] %v3865_v48  ;;  %v753_v59 = vmax.f32 %v654_v24, %v3867_v60 }
 0x183   : > { %v3872_v0 = vmax.f32 %v753_v59, %v3865_v48 }
 0x184   : > { %v613_v4 = vpop.f32.mrf.mxu0 }
 0x185   : > { %v614_v6 = vadd.f32 %v3687_v33, %v613_v4 }
 0x187   : > { %v657_v7 = vmax.f32 %v614_v6, 0.0  ;;  %v862_v6 = vld [vmem:[%s5894_s11 + $0x10] sm:$0xff] }
 0x188   : > { %v3875_v9 = vld [vmem:[#allocation2 + $0xc1] sm:$0xff] }
 0x189   : > { %692 = vst [vmem:[#allocation2 + $0xd0] sm:$0xff] %v657_v7  ;;  %v754_v11 = vmax.f32 %v655_v52, %v3875_v9 }
 0x18b   : > { %v3878_v13 = vmax.f32 %v754_v11, %v657_v7 }
 0x18c   : > { %v616_v15 = vpop.f32.mrf.mxu0 }
 0x18d   : > { %v617_v16 = vadd.f32 %v3687_v33, %v616_v15 }
 0x18f   : > { %v658_v18 = vmax.f32 %v617_v16, 0.0 }
 0x190   : > { %v723_v62 = vld [vmem:[#allocation2 + $0xc9] sm:$0xff] }
 0x191   : > { %693 = vst [vmem:[#allocation2 + $0xd8] sm:$0xff] %v658_v18  ;;  %v755_v47 = vmax.f32 %v3865_v48, %v723_v62  ;;  %v864_v48 = vld [vmem:[%s5894_s11 + $0x20] sm:$0xff] }
 0x193   : > { %v819_v15 = vmax.f32 %v755_v47, %v658_v18  ;;  %v2920_v47 = vld [vmem:[%s5886_s3 + $0x98] sm:$0xff] }
 0x194   : > { %v619_v21 = vpop.f32.mrf.mxu0 }
 0x195   : > { %v620_v25 = vadd.f32 %v3687_v33, %v619_v21  ;;  %v851_v21 = vmax.f32 %v3872_v0, %v723_v62  ;;  %v847_v0 = vmax.f32 %v3828_v46, %v3853_v17  ;;  %v861_v46 = vld [vmem:[%s5894_s11 + $0x8] sm:$0xff]  ;;  %v868_v17 = vld [vmem:[%s5894_s11 + $0x40] sm:$0xff]  ;;  %v2948_v62 = vld [vmem:[%s5886_s3 + $0x138] sm:$0xff] }
 0x197   : > { %v659_v27 = vmax.f32 %v620_v25, 0.0  ;;  %v850_v25 = vmax.f32 %v3862_v3, %v3875_v9  ;;  %v846_v3 = vmax.f32 %v3813_v37, %v3835_v1  ;;  %v863_v37 = vld [vmem:[%s5894_s11 + $0x18] sm:$0xff]  ;;  %v874_v1 = vld [vmem:[%s5894_s11 + $0x70] sm:$0xff] }
 0x198   : > { %v724_v32 = vld [vmem:[#allocation2 + $0xd1] sm:$0xff] }
 0x199   : > { %694 = vst [vmem:[#allocation2 + $0xe0] sm:$0xff] %v659_v27  ;;  %v756_v52 = vmax.f32 %v657_v7, %v724_v32  ;;  %v852_v7 = vmax.f32 %v3878_v13, %v724_v32  ;;  %v848_v13 = vmax.f32 %v3842_v50, %v3859_v54  ;;  %v844_v50 = vmax.f32 %v3801_v43, %v3809_v23  ;;  %v870_v43 = vld [vmem:[%s5894_s11 + $0x50] sm:$0xff]  ;;  %v872_v23 = vld [vmem:[%s5894_s11 + $0x60] sm:$0xff]  ;;  %v2932_v54 = vld [vmem:[%s5886_s3 + $0xf8] sm:$0xff] }
 0x19a   : > { %1164 = vmatpush.msra.mxu3 %v2932_v54  ;;  %v2931_v9 = vld [vmem:[%s5886_s3 + $0xf0] sm:$0xff]  ;;  %v1130_v32 = vld [vmem:[%s5886_s3 + $0x38] sm:$0xff]  ;;  %v2978_v54 = vld [vmem:[%s5886_s3 + $0x1e8] sm:$0xff] }
 0x19b   : > { %v820_v4 = vmax.f32 %v756_v52, %v659_v27  ;;  %v2947_v52 = vld [vmem:[%s5886_s3 + $0x130] sm:$0xff] }
 0x19c   : > { %v622_v29 = vpop.f32.mrf.mxu0  ;;  %1165 = vmatpush.msra.mxu3 %v2931_v9  ;;  %v3003_v9 = vld [vmem:[%s5886_s3 + $0x270] sm:$0xff] }
 0x19d   : > { %v623_v31 = vadd.f32 %v3687_v33, %v622_v29  ;;  %v1137_v29 = vld [vmem:[%s5886_s3 + $0x70] sm:$0xff] }
 0x19f   : > { %v660_v38 = vmax.f32 %v623_v31, 0.0  ;;  %v2930_v31 = vld [vmem:[%s5886_s3 + $0xe8] sm:$0xff] }
 0x1a0   : > { %v725_v35 = vld [vmem:[#allocation2 + $0xd9] sm:$0xff]  ;;  %1166 = vmatpush.msra.mxu3 %v2930_v31 }
 0x1a1   : > { %695 = vst [vmem:[#allocation2 + $0xe8] sm:$0xff] %v660_v38  ;;  %v757_v5 = vmax.f32 %v658_v18, %v725_v35  ;;  %v853_v16 = vmax.f32 %v819_v15, %v725_v35  ;;  %v849_v18 = vmax.f32 %v3856_v10, %v3867_v60  ;;  %v845_v10 = vmax.f32 %v3806_v22, %v3817_v8  ;;  %v865_v22 = vld [vmem:[%s5894_s11 + $0x28] sm:$0xff]  ;;  %v867_v8 = vld [vmem:[%s5894_s11 + $0x38] sm:$0xff]  ;;  %v1131_v35 = vld [vmem:[%s5886_s3 + $0x40] sm:$0xff] }
 0x1a2   : > { %v1138_v60 = vld [vmem:[%s5886_s3 + $0x78] sm:$0xff]  ;;  %v2918_v15 = vld [vmem:[%s5886_s3 + $0x88] sm:$0xff] }
 0x1a3   : > { %v821_v45 = vmax.f32 %v757_v5, %v660_v38  ;;  %1205 = vmatpush.msrb.mxu1 %v1138_v60  ;;  %v2922_v5 = vld [vmem:[%s5886_s3 + $0xa8] sm:$0xff]  ;;  %v3004_v60 = vld [vmem:[%s5886_s3 + $0x278] sm:$0xff] }
 0x1a4   : > { %v625_v28 = vpop.f32.mrf.mxu0 }
 0x1a5   : > { %v626_v41 = vadd.f32 %v3687_v33, %v625_v28  ;;  %v2956_v28 = vld [vmem:[%s5886_s3 + $0x178] sm:$0xff]  ;;  %1206 = vmatpush.msrb.mxu1 %v1137_v29  ;;  %v2977_v29 = vld [vmem:[%s5886_s3 + $0x1e0] sm:$0xff] }
 0x1a7   : > { %v661_v61 = vmax.f32 %v626_v41, 0.0  ;;  %v2929_v41 = vld [vmem:[%s5886_s3 + $0xe0] sm:$0xff] }
 0x1a8   : > { %v726_v51 = vld [vmem:[#allocation2 + $0xe1] sm:$0xff]  ;;  %1167 = vmatpush.msra.mxu3 %v2929_v41  ;;  %v2975_v41 = vld [vmem:[%s5886_s3 + $0x1d0] sm:$0xff] }
 0x1a9   : > { %696 = vst [vmem:[#allocation2 + $0xf0] sm:$0xff] %v661_v61  ;;  %v758_v19 = vmax.f32 %v659_v27, %v726_v51  ;;  %v854_v11 = vmax.f32 %v820_v4, %v726_v51  ;;  %v866_v27 = vld [vmem:[%s5894_s11 + $0x30] sm:$0xff]  ;;  %v2952_v51 = vld [vmem:[%s5886_s3 + $0x158] sm:$0xff] }
 0x1aa   : > { %v2919_v4 = vld [vmem:[%s5886_s3 + $0x90] sm:$0xff] }
 0x1ab   : > { %v822_v57 = vmax.f32 %v758_v19, %v661_v61  ;;  %v2950_v19 = vld [vmem:[%s5886_s3 + $0x148] sm:$0xff] }
 0x1ac   : > { %v628_v20 = vpop.f32.mrf.mxu0 }
 0x1ad   : > { %v629_v49 = vadd.f32 %v3687_v33, %v628_v20  ;;  %v860_v33 = vld [vmem:[%s5894_s11] sm:$0xff]  ;;  %v869_v20 = vld [vmem:[%s5894_s11 + $0x48] sm:$0xff] }
 0x1ae   : > { %892 = vmatmul.f32.vlgmr.msra.gmra.mxu1 %v860_v33  ;;  %v2923_v33 = vld [vmem:[%s5886_s3 + $0xb0] sm:$0xff] }
 0x1af   : > { %v662_v44 = vmax.f32 %v629_v49, 0.0  ;;  %v1135_v49 = vld [vmem:[%s5886_s3 + $0x60] sm:$0xff] }
 0x1b0   : > { %v727_v39 = vld [vmem:[#allocation2 + $0xe9] sm:$0xff] }
 0x1b1   : > { %697 = vst [vmem:[#allocation2 + $0xf8] sm:$0xff] %v662_v44  ;;  %v759_v63 = vmax.f32 %v660_v38, %v727_v39  ;;  %v855_v59 = vmax.f32 %v821_v45, %v727_v39  ;;  %v1136_v38 = vld [vmem:[%s5886_s3 + $0x68] sm:$0xff]  ;;  %v2927_v39 = vld [vmem:[%s5886_s3 + $0xd0] sm:$0xff]  ;;  %v1127_v45 = vld [vmem:[%s5886_s3 + $0x20] sm:$0xff] }
 0x1b2   : > { %1207 = vmatpush.msrb.mxu1 %v1136_v38 }
 0x1b3   : > { %v823_v24 = vmax.f32 %v759_v63, %v662_v44  ;;  %v2951_v63 = vld [vmem:[%s5886_s3 + $0x150] sm:$0xff] }
 0x1b4   : > { %1208 = vmatpush.msrb.mxu1 %v1135_v49 }
 0x1b6   : > { %895 = vmatmul.f32.gmra.mxu1 %v862_v6  ;;  %v1125_v6 = vld [vmem:[%s5886_s3 + $0x10] sm:$0xff] }
 0x1b8   : > { %v729_v36 = vld [vmem:[#allocation2 + $0xf9] sm:$0xff]  ;;  %v728_v14 = vld [vmem:[#allocation2 + $0xf1] sm:$0xff] }
 0x1b9   : > { %v761_v34 = vmax.f32 %v662_v44, %v729_v36  ;;  %v760_v2 = vmax.f32 %v661_v61, %v728_v14  ;;  %v857_v53 = vmax.f32 %v823_v24, %v729_v36  ;;  %v856_v58 = vmax.f32 %v822_v57, %v728_v14  ;;  %v2955_v61 = vld [vmem:[%s5886_s3 + $0x170] sm:$0xff]  ;;  %v2928_v44 = vld [vmem:[%s5886_s3 + $0xd8] sm:$0xff]  ;;  %v2954_v36 = vld [vmem:[%s5886_s3 + $0x168] sm:$0xff] }
 0x1ba   : > { %v1134_v14 = vld [vmem:[%s5886_s3 + $0x58] sm:$0xff]  ;;  %1168 = vmatpush.msra.mxu3 %v2928_v44  ;;  %v1129_v24 = vld [vmem:[%s5886_s3 + $0x30] sm:$0xff]  ;;  %v2921_v57 = vld [vmem:[%s5886_s3 + $0xa0] sm:$0xff] }
 0x1bb   : > { %v825_v56 = vmax.f32 %v761_v34, 0.0  ;;  %v824_v42 = vmax.f32 %v760_v2, 0.0  ;;  %v2953_v34 = vld [vmem:[%s5886_s3 + $0x160] sm:$0xff]  ;;  %v1133_v2 = vld [vmem:[%s5886_s3 + $0x50] sm:$0xff]  ;;  %1209 = vmatpush.msrb.mxu1 %v1134_v14  ;;  %v3002_v14 = vld [vmem:[%s5886_s3 + $0x268] sm:$0xff] }
 0x1bc   : > { %1169 = vmatpush.msra.mxu3 %v2927_v39  ;;  %v2974_v39 = vld [vmem:[%s5886_s3 + $0x1c8] sm:$0xff] }
 0x1bd   : > { %v859_v40 = vmax.f32 %v825_v56, %v827_v55  ;;  %v858_v12 = vmax.f32 %v824_v42, %v826_v26  ;;  %v2926_v55 = vld [vmem:[%s5886_s3 + $0xc8] sm:$0xff]  ;;  %1210 = vmatpush.msrb.mxu1 %v1133_v2  ;;  %v2925_v42 = vld [vmem:[%s5886_s3 + $0xc0] sm:$0xff]  ;;  %v871_v26 = vld [vmem:[%s5894_s11 + $0x58] sm:$0xff] }
 0x1be   : > { %898 = vmatmul.f32.gmra.mxu1 %v864_v48  ;;  %v1132_v56 = vld [vmem:[%s5886_s3 + $0x48] sm:$0xff]  ;;  %1170 = vmatpush.msra.mxu3 %v2926_v55  ;;  %v3001_v55 = vld [vmem:[%s5886_s3 + $0x260] sm:$0xff] }
 0x1bf   : > { %917 = vmatpush.msra.mxu2 %v859_v40  ;;  %1211 = vmatpush.msrb.mxu1 %v1132_v56  ;;  %v2924_v40 = vld [vmem:[%s5886_s3 + $0xb8] sm:$0xff] }
 0x1c0   : > { %1171 = vmatpush.msra.mxu3 %v2925_v42  ;;  %v3020_v56 = vld [vmem:[%s5886_s3 + $0x2f8] sm:$0xff] }
 0x1c1   : > { %918 = vmatpush.msra.mxu2 %v858_v12  ;;  %1212 = vmatpush.msrb.mxu1 %v1131_v35  ;;  %v2949_v12 = vld [vmem:[%s5886_s3 + $0x140] sm:$0xff]  ;;  %v2999_v35 = vld [vmem:[%s5886_s3 + $0x250] sm:$0xff] }
 0x1c2   : > { %1172 = vmatpush.msra.mxu3 %v2924_v40  ;;  %v2972_v40 = vld [vmem:[%s5886_s3 + $0x1b8] sm:$0xff] }
 0x1c3   : > { %919 = vmatpush.msra.mxu2 %v857_v53  ;;  %1213 = vmatpush.msrb.mxu1 %v1130_v32  ;;  %v1128_v53 = vld [vmem:[%s5886_s3 + $0x28] sm:$0xff]  ;;  %v2971_v32 = vld [vmem:[%s5886_s3 + $0x1b0] sm:$0xff] }
 0x1c4   : > { %1173 = vmatpush.msra.mxu3 %v2923_v33 }
 0x1c5   : > { %920 = vmatpush.msra.mxu2 %v856_v58  ;;  %1214 = vmatpush.msrb.mxu1 %v1129_v24  ;;  %v873_v58 = vld [vmem:[%s5894_s11 + $0x68] sm:$0xff] }
 0x1c6   : > { %901 = vmatmul.f32.gmra.mxu1 %v866_v27  ;;  %1174 = vmatpush.msra.mxu3 %v2922_v5  ;;  %v2945_v27 = vld [vmem:[%s5886_s3 + $0x120] sm:$0xff] }
 0x1c7   : > { %921 = vmatpush.msra.mxu2 %v855_v59  ;;  %1215 = vmatpush.msrb.mxu1 %v1128_v53  ;;  %v1126_v59 = vld [vmem:[%s5886_s3 + $0x18] sm:$0xff]  ;;  %v2998_v53 = vld [vmem:[%s5886_s3 + $0x248] sm:$0xff] }
 0x1c8   : > { %1175 = vmatpush.msra.mxu3 %v2921_v57  ;;  %v3018_v57 = vld [vmem:[%s5886_s3 + $0x2e8] sm:$0xff] }
 0x1c9   : > { %922 = vmatpush.msra.mxu2 %v854_v11  ;;  %1216 = vmatpush.msrb.mxu1 %v1127_v45  ;;  %v875_v11 = vld [vmem:[%s5894_s11 + $0x78] sm:$0xff]  ;;  %v2970_v45 = vld [vmem:[%s5886_s3 + $0x1a8] sm:$0xff] }
 0x1ca   : > { %1176 = vmatpush.msra.mxu3 %v2920_v47  ;;  %v2997_v47 = vld [vmem:[%s5886_s3 + $0x240] sm:$0xff] }
 0x1cb   : > { %923 = vmatpush.msra.mxu2 %v853_v16  ;;  %1217 = vmatpush.msrb.mxu1 %v1126_v59  ;;  %v2917_v16 = vld [vmem:[%s5886_s3 + $0x80] sm:$0xff] }
 0x1cc   : > { %1177 = vmatpush.msra.mxu3 %v2919_v4  ;;  %v3017_v59 = vld [vmem:[%s5886_s3 + $0x2e0] sm:$0xff]  ;;  %v2996_v4 = vld [vmem:[%s5886_s3 + $0x238] sm:$0xff] }
 0x1cd   : > { %924 = vmatpush.msra.mxu2 %v852_v7  ;;  %1218 = vmatpush.msrb.mxu1 %v1125_v6  ;;  %v1139_v7 = vld [vmem:[#allocation2 + $0x1] sm:$0xff] }
 0x1ce   : > { %904 = vmatmul.f32.gmra.mxu1 %v868_v17  ;;  %1178 = vmatpush.msra.mxu3 %v2918_v15  ;;  %v2941_v17 = vld [vmem:[%s5886_s3 + $0x100] sm:$0xff]  ;;  %v2995_v15 = vld [vmem:[%s5886_s3 + $0x230] sm:$0xff] }
 0x1cf   : > { %925 = vmatpush.msra.mxu2 %v851_v21  ;;  %v970_v21 = vlaneseq }
 0x1d0   : > { %1179 = vmatpush.msra.mxu3 %v2917_v16  ;;  %v2969_v16 = vld [vmem:[%s5886_s3 + $0x1a0] sm:$0xff] }
 0x1d1   : > { %926 = vmatpush.msra.mxu2 %v850_v25  ;;  %1180 = vmatmul.f32.vlgmr.msra.gmra.mxu3 %v1139_v7  ;;  %v4070_v48 = vshrl.u32 %v970_v21, 7  ;;  %v1124_v25 = vld [vmem:[%s5886_s3 + $0x8] sm:$0xff]  ;;  %v3015_v7 = vld [vmem:[%s5886_s3 + $0x2d0] sm:$0xff]  ;;  %v2968_v21 = vld [vmem:[%s5886_s3 + $0x198] sm:$0xff] }
 0x1d2   : > { %1219 = vmatpush.msrb.mxu1 %v1124_v25 }
 0x1d3   : > { %927 = vmatpush.msra.mxu2 %v849_v18  ;;  %v2946_v18 = vld [vmem:[%s5886_s3 + $0x128] sm:$0xff]  ;;  %v4145_v44 = vadd.s32 16, %v4070_v48  ;;  %v4198_v5 = vadd.s32 24, %v4070_v48 }
 0x1d5   : > { %928 = vmatpush.msra.mxu2 %v848_v13  ;;  %v983_v13 = vand.u32 7, %v4070_v48  ;;  %v997_v42 = vand.u32 7, %v4145_v44  ;;  %v1004_v6 = vand.u32 7, %v4198_v5  ;;  %v976_v44 = vadd.s32 40, %v4070_v48 }
 0x1d6   : > { %907 = vmatmul.f32.gmra.mxu1 %v870_v43 }
 0x1d7   : > { %929 = vmatpush.msra.mxu2 %v847_v0  ;;  %v1123_v0 = vld [vmem:[%s5886_s3] sm:$0xff]  ;;  %vm4088_vm0 = vcmp.ge.s32.totalorder %v983_v13, 1  ;;  %vm4140_vm2 = vcmp.le.s32.totalorder %v983_v13, 6  ;;  %vm4189_vm3 = vcmp.ge.s32.totalorder %v997_v42, 1  ;;  %vm4248_vm5 = vcmp.ge.s32.totalorder %v1004_v6, 1 }
 0x1d8   : > { %1220 = vmatpush.msrb.mxu1 %v1123_v0  ;;  %vm4252_vm6 = vcmp.le.s32.totalorder %v997_v42, 6  ;;  %vm4308_vm8 = vcmp.le.s32.totalorder %v1004_v6, 6  ;;  %v2989_v42 = vld [vmem:[%s5886_s3 + $0x200] sm:$0xff] }
 0x1d9   : > { %930 = vmatpush.msra.mxu2 %v846_v3  ;;  %v2944_v3 = vld [vmem:[%s5886_s3 + $0x118] sm:$0xff]  ;;  %v3005_v6 = vld [vmem:[%s5886_s3 + $0x280] sm:$0xff] }
 0x1da   : > { %1451 = vmatpush.msra.mxu1 %v3004_v60  ;;  %v2966_v60 = vld [vmem:[%s5886_s3 + $0x188] sm:$0xff] }
 0x1db   : > { %931 = vmatpush.msra.mxu2 %v845_v10 }
 0x1dc   : > { %1452 = vmatpush.msra.mxu1 %v3003_v9  ;;  %v3012_v9 = vld [vmem:[%s5886_s3 + $0x2b8] sm:$0xff] }
 0x1dd   : > { %932 = vmatpush.msra.mxu2 %v844_v50  ;;  %v2943_v50 = vld [vmem:[%s5886_s3 + $0x110] sm:$0xff] }
 0x1de   : > { %933 = vmatmul.f32.vlgmr.msra.gmra.mxu2 %v861_v46  ;;  %910 = vmatmul.f32.gmra.mxu1 %v872_v23  ;;  %v2942_v46 = vld [vmem:[%s5886_s3 + $0x108] sm:$0xff] }
 0x1df   : > { %1295 = vmatpush.msrb.mxu2 %v2956_v28  ;;  %v2976_v28 = vld [vmem:[%s5886_s3 + $0x1d8] sm:$0xff]  ;;  %1453 = vmatpush.msra.mxu1 %v3002_v14 }
 0x1e1   : > { %1296 = vmatpush.msrb.mxu2 %v2955_v61  ;;  %1454 = vmatpush.msra.mxu1 %v3001_v55 }
 0x1e3   : > { %1297 = vmatpush.msrb.mxu2 %v2954_v36 }
 0x1e5   : > { %1298 = vmatpush.msrb.mxu2 %v2953_v34 }
 0x1e6   : > { %936 = vmatmul.f32.gmra.mxu2 %v863_v37  ;;  %913 = vmatmul.f32.gmra.mxu1 %v874_v1 }
 0x1e7   : > { %1299 = vmatpush.msrb.mxu2 %v2952_v51  ;;  %v3000_v51 = vld [vmem:[%s5886_s3 + $0x258] sm:$0xff] }
 0x1e8   : > { %1455 = vmatpush.msra.mxu1 %v3000_v51 }
 0x1e9   : > { %1300 = vmatpush.msrb.mxu2 %v2951_v63  ;;  %v3019_v63 = vld [vmem:[%s5886_s3 + $0x2f0] sm:$0xff] }
 0x1ea   : > { %1456 = vmatpush.msra.mxu1 %v2999_v35  ;;  %v3008_v35 = vld [vmem:[%s5886_s3 + $0x298] sm:$0xff] }
 0x1eb   : > { %1301 = vmatpush.msrb.mxu2 %v2950_v19 }
 0x1ec   : > { %1457 = vmatpush.msra.mxu1 %v2998_v53  ;;  %v3007_v53 = vld [vmem:[%s5886_s3 + $0x290] sm:$0xff] }
 0x1ed   : > { %1302 = vmatpush.msrb.mxu2 %v2949_v12 }
 0x1ee   : > { %939 = vmatmul.f32.gmra.mxu2 %v865_v22  ;;  %2933 = vmatmul.msk.f32.vlgmr.msrb.gmra.mxu1 %vm4088_vm0, %v3486_v30  ;;  %v2980_v30 = vld [vmem:[%s5886_s3 + $0x1f8] sm:$0xff]  ;;  %v2979_v22 = vld [vmem:[%s5886_s3 + $0x1f0] sm:$0xff] }
 0x1ef   : > { %1303 = vmatpush.msrb.mxu2 %v2948_v62  ;;  %1377 = vmatpush.msrb.mxu3 %v2980_v30  ;;  %v2993_v30 = vld [vmem:[%s5886_s3 + $0x220] sm:$0xff] }
 0x1f0   : > { %1458 = vmatpush.msra.mxu1 %v2997_v47  ;;  %v3006_v47 = vld [vmem:[%s5886_s3 + $0x288] sm:$0xff] }
 0x1f1   : > { %1304 = vmatpush.msrb.mxu2 %v2947_v52  ;;  %1378 = vmatpush.msrb.mxu3 %v2979_v22  ;;  %v3013_v22 = vld [vmem:[%s5886_s3 + $0x2c0] sm:$0xff] }
 0x1f2   : > { %1459 = vmatpush.msra.mxu1 %v2996_v4 }
 0x1f3   : > { %1305 = vmatpush.msrb.mxu2 %v2946_v18  ;;  %1379 = vmatpush.msrb.mxu3 %v2978_v54  ;;  %v2992_v54 = vld [vmem:[%s5886_s3 + $0x218] sm:$0xff] }
 0x1f4   : > { %1460 = vmatpush.msra.mxu1 %v2995_v15 }
 0x1f5   : > { %1306 = vmatpush.msrb.mxu2 %v2945_v27  ;;  %1380 = vmatpush.msrb.mxu3 %v2977_v29  ;;  %v975_v27 = vadd.s32 32, %v4070_v48  ;;  %v2991_v29 = vld [vmem:[%s5886_s3 + $0x210] sm:$0xff] }
 0x1f6   : > { %942 = vmatmul.f32.gmra.mxu2 %v867_v8  ;;  %v4111_v8 = vadd.s32 8, %v4070_v48 }
 0x1f7   : > { %1307 = vmatpush.msrb.mxu2 %v2944_v3  ;;  %1381 = vmatpush.msrb.mxu3 %v2976_v28 }
 0x1f8   : > { %v990_v31 = vand.u32 7, %v4111_v8 }
 0x1f9   : > { %1308 = vmatpush.msrb.mxu2 %v2943_v50  ;;  %1382 = vmatpush.msrb.mxu3 %v2975_v41  ;;  %v2994_v50 = vld [vmem:[%s5886_s3 + $0x228] sm:$0xff] }
 0x1fa   : > { %vm4136_vm1 = vcmp.ge.s32.totalorder %v990_v31, 1  ;;  %vm4193_vm4 = vcmp.le.s32.totalorder %v990_v31, 6  ;;  %1461 = vmatpush.msra.mxu1 %v2994_v50  ;;  %v2965_v31 = vld [vmem:[%s5886_s3 + $0x180] sm:$0xff] }
 0x1fb   : > { %1309 = vmatpush.msrb.mxu2 %v2942_v46  ;;  %1383 = vmatpush.msrb.mxu3 %v2974_v39  ;;  %v3014_v46 = vld [vmem:[%s5886_s3 + $0x2c8] sm:$0xff] }
 0x1fc   : > { %1462 = vmatpush.msra.mxu1 %v2993_v30  ;;  %v2990_v39 = vld [vmem:[%s5886_s3 + $0x208] sm:$0xff] }
 0x1fd   : > { %1310 = vmatpush.msrb.mxu2 %v2941_v17 }
 0x1fe   : > { %945 = vmatmul.f32.gmra.mxu2 %v869_v20  ;;  %1463 = vmatpush.msra.mxu1 %v2992_v54 }
 0x1ff   : > { %1533 = vmatpush.msra.mxu2 %v3020_v56  ;;  %v3010_v56 = vld [vmem:[%s5886_s3 + $0x2a8] sm:$0xff] }
 0x200   : > { %1464 = vmatpush.msra.mxu1 %v2991_v29 }
 0x201   : > { %1534 = vmatpush.msra.mxu2 %v3019_v63  ;;  %v1018_v63 = vand.u32 7, %v976_v44  ;;  %v3068_v44 = vld [vmem:[%s5886_s3 + $0x3f8] sm:$0xff] }
 0x202   : > { %1465 = vmatpush.msra.mxu1 %v2990_v39  ;;  %v3067_v39 = vld [vmem:[%s5886_s3 + $0x3f0] sm:$0xff] }
 0x203   : > { %1535 = vmatpush.msra.mxu2 %v3018_v57  ;;  %vm4342_vm9 = vcmp.ge.s32.totalorder %v1018_v63, 1  ;;  %vm4378_vm12 = vcmp.le.s32.totalorder %v1018_v63, 6  ;;  %v3040_v63 = vld [vmem:[%s5886_s3 + $0x358] sm:$0xff] }
 0x204   : > { %1466 = vmatpush.msra.mxu1 %v2989_v42  ;;  %v3066_v42 = vld [vmem:[%s5886_s3 + $0x3e8] sm:$0xff] }
 0x205   : > { %1536 = vmatpush.msra.mxu2 %v3017_v59 }
 0x206   : > { %948 = vmatmul.f32.gmra.mxu2 %v871_v26  ;;  %v2973_v26 = vld [vmem:[%s5886_s3 + $0x1c0] sm:$0xff]  ;;  %1689 = vmatpush.msrb.mxu1 %v3068_v44  ;;  %v3079_v44 = vld [vmem:[%s5886_s3 + $0x450] sm:$0xff] }
 0x207   : > { %1384 = vmatpush.msrb.mxu3 %v2973_v26  ;;  %v3009_v26 = vld [vmem:[%s5886_s3 + $0x2a0] sm:$0xff] }
 0x208   : > { %1690 = vmatpush.msrb.mxu1 %v3067_v39  ;;  %v3058_v39 = vld [vmem:[%s5886_s3 + $0x3a8] sm:$0xff] }
 0x209   : > { %1385 = vmatpush.msrb.mxu3 %v2972_v40 }
 0x20a   : > { %1691 = vmatpush.msrb.mxu1 %v3066_v42  ;;  %v3078_v42 = vld [vmem:[%s5886_s3 + $0x448] sm:$0xff] }
 0x20b   : > { %1386 = vmatpush.msrb.mxu3 %v2971_v32 }
 0x20d   : > { %1387 = vmatpush.msrb.mxu3 %v2970_v45 }
 0x20e   : > { %951 = vmatmul.f32.gmra.mxu2 %v873_v58 }
 0x20f   : > { %1388 = vmatpush.msrb.mxu3 %v2969_v16 }
 0x211   : > { %1389 = vmatpush.msrb.mxu3 %v2968_v21 }
 0x216   : > { %954 = vmatmul.f32.gmra.mxu2 %v875_v11  ;;  %v3016_v11 = vld [vmem:[%s5886_s3 + $0x2d8] sm:$0xff] }
 0x217   : > { %1537 = vmatpush.msra.mxu2 %v3016_v11 }
 0x219   : > { %1538 = vmatpush.msra.mxu2 %v3015_v7  ;;  %v978_v7 = vadd.s32 56, %v4070_v48 }
 0x21b   : > { %1539 = vmatpush.msra.mxu2 %v3014_v46 }
 0x21d   : > { %1540 = vmatpush.msra.mxu2 %v3013_v22 }
 0x21f   : > { %1541 = vmatpush.msra.mxu2 %v3012_v9  ;;  %v3043_v9 = vld [vmem:[%s5886_s3 + $0x370] sm:$0xff] }
 0x22b   : > { %v893_v37 = vpop.f32.mrf.mxu1 }
 0x233   : > { %v896_v43 = vpop.f32.mrf.mxu1 }
 0x23b   : > { %v899_v38 = vpop.f32.mrf.mxu1 }
 0x243   : > { %v902_v19 = vpop.f32.mrf.mxu1 }
 0x24b   : > { %v905_v0 = vpop.f32.mrf.mxu1 }
 0x253   : > { %v908_v51 = vpop.f32.mrf.mxu1 }
 0x25b   : > { %v911_v59 = vpop.f32.mrf.mxu1 }
 0x261   : > { %v934_v23 = vpop.f32.mrf.mxu2 }
 0x262   : > { %v4113_v1 = vadd.f32 %v934_v23, %v893_v37  ;;  %v1011_v23 = vand.u32 7, %v975_v27  ;;  %v1032_v27 = vand.u32 7, %v978_v7  ;;  %v3061_v7 = vld [vmem:[%s5886_s3 + $0x3c0] sm:$0xff] }
 0x263   : > { %v914_v50 = vpop.f32.mrf.mxu1 }
 0x264   : > { %962 = vst [vmem:[#allocation2 + $0x9] sm:$0xff] %v4113_v1  ;;  %1183 = vmatmul.f32.gmra.mxu3 %v4113_v1  ;;  %vm4304_vm7 = vcmp.ge.s32.totalorder %v1011_v23, 1  ;;  %vm4346_vm10 = vcmp.le.s32.totalorder %v1011_v23, 6  ;;  %vm4397_vm13 = vcmp.ge.s32.totalorder %v1032_v27, 1  ;;  %vm4427_vm15 = vcmp.le.s32.totalorder %v1032_v27, 6  ;;  %v3081_v27 = vld [vmem:[%s5886_s3 + $0x460] sm:$0xff] }
 0x269   : > { %v937_v61 = vpop.f32.mrf.mxu2 }
 0x26a   : > { %v4147_v36 = vadd.f32 %v937_v61, %v896_v43  ;;  %v2967_v43 = vld [vmem:[%s5886_s3 + $0x190] sm:$0xff] }
 0x26b   : > { %v4155_v34 = vld [vmem:[#allocation2 + $0x8] sm:$0xff]  ;;  %1390 = vmatpush.msrb.mxu3 %v2967_v43 }
 0x26c   : > { %v1246_v2 = vld [vmem:[#allocation2 + $0x2] sm:$0xff]  ;;  %963 = vst [vmem:[#allocation2 + $0x11] sm:$0xff] %v4147_v36  ;;  %2934 = vmatmul.msk.f32.gmra.mxu1 %vm4136_vm1, %v4155_v34  ;;  %1186 = vmatmul.f32.gmra.mxu3 %v4147_v36 }
 0x26d   : > { %2957 = vmatmul.msk.f32.vlgmr.msrb.gmra.mxu2 %vm4140_vm2, %v1246_v2  ;;  %1391 = vmatpush.msrb.mxu3 %v2966_v60  ;;  %v3044_v60 = vld [vmem:[%s5886_s3 + $0x378] sm:$0xff] }
 0x26f   : > { %1392 = vmatpush.msrb.mxu3 %v2965_v31  ;;  %v3042_v31 = vld [vmem:[%s5886_s3 + $0x368] sm:$0xff] }
 0x271   : > { %v940_v33 = vpop.f32.mrf.mxu2  ;;  %1615 = vmatpush.msra.mxu3 %v3044_v60  ;;  %v3080_v60 = vld [vmem:[%s5886_s3 + $0x458] sm:$0xff] }
 0x272   : > { %v4200_v62 = vadd.f32 %v940_v33, %v899_v38  ;;  %v3011_v38 = vld [vmem:[%s5886_s3 + $0x2b0] sm:$0xff]  ;;  %v977_v33 = vadd.s32 48, %v4070_v48 }
 0x273   : > { %v4208_v52 = vld [vmem:[#allocation2 + $0x10] sm:$0xff]  ;;  %1542 = vmatpush.msra.mxu2 %v3011_v38  ;;  %1616 = vmatpush.msra.mxu3 %v3043_v9 }
 0x274   : > { %v4210_v58 = vld [vmem:[#allocation2 + $0xa] sm:$0xff]  ;;  %964 = vst [vmem:[#allocation2 + $0x19] sm:$0xff] %v4200_v62  ;;  %2935 = vmatmul.msk.f32.gmra.mxu1 %vm4189_vm3, %v4208_v52  ;;  %1189 = vmatmul.f32.gmra.mxu3 %v4200_v62  ;;  %v1025_v4 = vand.u32 7, %v977_v33  ;;  %v3064_v33 = vld [vmem:[%s5886_s3 + $0x3d8] sm:$0xff] }
 0x275   : > { %2958 = vmatmul.msk.f32.gmra.mxu2 %vm4193_vm4, %v4210_v58  ;;  %1617 = vmatpush.msra.mxu3 %v3042_v31  ;;  %v3059_v9 = vld [vmem:[%s5886_s3 + $0x3b0] sm:$0xff]  ;;  %v3034_v31 = vld [vmem:[%s5886_s3 + $0x328] sm:$0xff] }
 0x276   : > { %1543 = vmatpush.msra.mxu2 %v3010_v56  ;;  %vm4374_vm11 = vcmp.ge.s32.totalorder %v1025_v4, 1  ;;  %vm4401_vm14 = vcmp.le.s32.totalorder %v1025_v4, 6  ;;  %v3037_v4 = vld [vmem:[%s5886_s3 + $0x340] sm:$0xff] }
 0x278   : > { %1544 = vmatpush.msra.mxu2 %v3009_v26  ;;  %v3065_v26 = vld [vmem:[%s5886_s3 + $0x3e0] sm:$0xff] }
 0x279   : > { %v943_v25 = vpop.f32.mrf.mxu2  ;;  %1692 = vmatpush.msrb.mxu1 %v3065_v26  ;;  %v3077_v26 = vld [vmem:[%s5886_s3 + $0x440] sm:$0xff] }
 0x27a   : > { %v4257_v3 = vadd.f32 %v943_v25, %v902_v19  ;;  %1545 = vmatpush.msra.mxu2 %v3008_v35  ;;  %v3039_v35 = vld [vmem:[%s5886_s3 + $0x350] sm:$0xff] }
 0x27b   : > { %v4265_v17 = vld [vmem:[#allocation2 + $0x18] sm:$0xff]  ;;  %1693 = vmatpush.msrb.mxu1 %v3064_v33 }
 0x27c   : > { %v4267_v37 = vld [vmem:[#allocation2 + $0x12] sm:$0xff]  ;;  %965 = vst [vmem:[#allocation2 + $0x21] sm:$0xff] %v4257_v3  ;;  %2936 = vmatmul.msk.f32.gmra.mxu1 %vm4248_vm5, %v4265_v17  ;;  %1192 = vmatmul.f32.gmra.mxu3 %v4257_v3 }
 0x27d   : > { %2959 = vmatmul.msk.f32.gmra.mxu2 %vm4252_vm6, %v4267_v37  ;;  %v3076_v33 = vld [vmem:[%s5886_s3 + $0x438] sm:$0xff] }
 0x27e   : > { %1546 = vmatpush.msra.mxu2 %v3007_v53  ;;  %v3084_v53 = vld [vmem:[%s5886_s3 + $0x478] sm:$0xff] }
 0x280   : > { %1547 = vmatpush.msra.mxu2 %v3006_v47  ;;  %v3063_v47 = vld [vmem:[%s5886_s3 + $0x3d0] sm:$0xff] }
 0x281   : > { %v946_v28 = vpop.f32.mrf.mxu2  ;;  %1694 = vmatpush.msrb.mxu1 %v3063_v47  ;;  %v3055_v47 = vld [vmem:[%s5886_s3 + $0x390] sm:$0xff] }
 0x282   : > { %v4313_v14 = vadd.f32 %v946_v28, %v905_v0  ;;  %1548 = vmatpush.msra.mxu2 %v3005_v6  ;;  %v3082_v6 = vld [vmem:[%s5886_s3 + $0x468] sm:$0xff] }
 0x283   : > { %v4318_v2 = vld [vmem:[#allocation2 + $0x20] sm:$0xff] }
 0x284   : > { %v4320_v55 = vld [vmem:[#allocation2 + $0x1a] sm:$0xff]  ;;  %966 = vst [vmem:[#allocation2 + $0x29] sm:$0xff] %v4313_v14  ;;  %2937 = vmatmul.msk.f32.gmra.mxu1 %vm4304_vm7, %v4318_v2  ;;  %1195 = vmatmul.f32.gmra.mxu3 %v4313_v14 }
 0x285   : > { %2960 = vmatmul.msk.f32.gmra.mxu2 %vm4308_vm8, %v4320_v55 }
 0x286   : > { %1771 = vmatpush.msrb.mxu2 %v3084_v53  ;;  %v3031_v53 = vld [vmem:[%s5886_s3 + $0x310] sm:$0xff] }
 0x289   : > { %v949_v40 = vpop.f32.mrf.mxu2 }
 0x28a   : > { %v4351_v5 = vadd.f32 %v949_v40, %v908_v51  ;;  %v4450_v51 = vld [vmem:[#allocation2 + $0x100] sm:$0xff]  ;;  %v3038_v40 = vld [vmem:[%s5886_s3 + $0x348] sm:$0xff] }
 0x28b   : > { %v4356_v57 = vld [vmem:[#allocation2 + $0x28] sm:$0xff] }
 0x28c   : > { %v4358_v45 = vld [vmem:[#allocation2 + $0x22] sm:$0xff]  ;;  %967 = vst [vmem:[#allocation2 + $0x31] sm:$0xff] %v4351_v5  ;;  %2938 = vmatmul.msk.f32.gmra.mxu1 %vm4342_vm9, %v4356_v57  ;;  %1198 = vmatmul.f32.gmra.mxu3 %v4351_v5 }
 0x28d   : > { %2961 = vmatmul.msk.f32.gmra.mxu2 %vm4346_vm10, %v4358_v45 }
 0x291   : > { %v952_v11 = vpop.f32.mrf.mxu2 }
 0x292   : > { %v4383_v21 = vadd.f32 %v952_v11, %v911_v59  ;;  %v3062_v59 = vld [vmem:[%s5886_s3 + $0x3c8] sm:$0xff]  ;;  %v3036_v11 = vld [vmem:[%s5886_s3 + $0x338] sm:$0xff] }
 0x293   : > { %v4385_v25 = vld [vmem:[#allocation2 + $0x30] sm:$0xff]  ;;  %1695 = vmatpush.msrb.mxu1 %v3062_v59  ;;  %v3030_v59 = vld [vmem:[%s5886_s3 + $0x308] sm:$0xff] }
 0x294   : > { %v4387_v0 = vld [vmem:[#allocation2 + $0x2a] sm:$0xff]  ;;  %968 = vst [vmem:[#allocation2 + $0x39] sm:$0xff] %v4383_v21  ;;  %2939 = vmatmul.msk.f32.gmra.mxu1 %vm4374_vm11, %v4385_v25  ;;  %1201 = vmatmul.f32.gmra.mxu3 %v4383_v21 }
 0x295   : > { %2962 = vmatmul.msk.f32.gmra.mxu2 %vm4378_vm12, %v4387_v0  ;;  %1696 = vmatpush.msrb.mxu1 %v3061_v7  ;;  %v3053_v7 = vld [vmem:[%s5886_s3 + $0x380] sm:$0xff] }
 0x299   : > { %v955_v46 = vpop.f32.mrf.mxu2 }
 0x29a   : > { %v4405_v22 = vadd.f32 %v955_v46, %v914_v50  ;;  %v3035_v50 = vld [vmem:[%s5886_s3 + $0x330] sm:$0xff]  ;;  %v3060_v46 = vld [vmem:[%s5886_s3 + $0x3b8] sm:$0xff] }
 0x29b   : > { %v4407_v23 = vld [vmem:[#allocation2 + $0x38] sm:$0xff]  ;;  %1697 = vmatpush.msrb.mxu1 %v3060_v46  ;;  %v3071_v46 = vld [vmem:[%s5886_s3 + $0x410] sm:$0xff] }
 0x29c   : > { %v4409_v54 = vld [vmem:[#allocation2 + $0x32] sm:$0xff]  ;;  %969 = vst [vmem:[#allocation2 + $0x41] sm:$0xff] %v4405_v22  ;;  %2940 = vmatmul.msk.f32.gmra.mxu1 %vm4397_vm13, %v4407_v23  ;;  %2981 = vmatmul.msk.f32.vlgmr.msrb.gmra.mxu3 %vm4088_vm0, %v4155_v34 }
 0x29d   : > { %2963 = vmatmul.msk.f32.gmra.mxu2 %vm4401_vm14, %v4409_v54  ;;  %1698 = vmatpush.msrb.mxu1 %v3059_v9  ;;  %v3069_v9 = vld [vmem:[%s5886_s3 + $0x400] sm:$0xff] }
 0x29f   : > { %1699 = vmatpush.msrb.mxu1 %v3058_v39 }
 0x2a3   : > { %v4434_v38 = vld [vmem:[#allocation2 + $0x3a] sm:$0xff]  ;;  %v4438_v28 = vld [vmem:[#allocation2 + $0x42] sm:$0xff] }
 0x2a4   : > { %v4436_v34 = vld [vmem:[#allocation2 + $0x40] sm:$0xff]  ;;  %1467 = vmatmul.f32.vlgmr.msra.gmra.mxu1 %v4113_v1  ;;  %2982 = vmatmul.msk.f32.gmra.mxu3 %vm4136_vm1, %v4208_v52  ;;  %v4459_v56 = vld [vmem:[#allocation2 + $0x48] sm:$0xff] }
 0x2a5   : > { %2964 = vmatmul.msk.f32.gmra.mxu2 %vm4427_vm15, %v4434_v38  ;;  %1840 = vst [vmem:[#allocation2 + $0x40] sm:$0xff] %v4450_v51  ;;  %v3041_v1 = vld [vmem:[%s5886_s3 + $0x360] sm:$0xff] }
 0x2a6   : > { %1618 = vmatpush.msra.mxu3 %v3041_v1  ;;  %1841 = vst [vmem:[#allocation2 + $0x48] sm:$0x1] %v4450_v51  ;;  %v3033_v1 = vld [vmem:[%s5886_s3 + $0x320] sm:$0xff] }
 0x2a8   : > { %1619 = vmatpush.msra.mxu3 %v3040_v63  ;;  %v3057_v63 = vld [vmem:[%s5886_s3 + $0x3a0] sm:$0xff] }
 0x2a9   : > { %1700 = vmatpush.msrb.mxu1 %v3057_v63 }
 0x2aa   : > { %1620 = vmatpush.msra.mxu3 %v3039_v35  ;;  %v3032_v35 = vld [vmem:[%s5886_s3 + $0x318] sm:$0xff] }
 0x2ac   : > { %1470 = vmatmul.f32.gmra.mxu1 %v4147_v36  ;;  %2983 = vmatmul.msk.f32.gmra.mxu3 %vm4189_vm3, %v4265_v17 }
 0x2ad   : > { %3021 = vmatmul.msk.f32.vlgmr.msra.gmra.mxu2 %vm4140_vm2, %v4210_v58  ;;  %v3083_v58 = vld [vmem:[%s5886_s3 + $0x470] sm:$0xff]  ;;  %1621 = vmatpush.msra.mxu3 %v3038_v40  ;;  %v3056_v40 = vld [vmem:[%s5886_s3 + $0x398] sm:$0xff] }
 0x2ae   : > { %1772 = vmatpush.msrb.mxu2 %v3083_v58  ;;  %1701 = vmatpush.msrb.mxu1 %v3056_v40  ;;  %v3075_v58 = vld [vmem:[%s5886_s3 + $0x430] sm:$0xff] }
 0x2af   : > { %1622 = vmatpush.msra.mxu3 %v3037_v4  ;;  %v3054_v4 = vld [vmem:[%s5886_s3 + $0x388] sm:$0xff] }
 0x2b0   : > { %1773 = vmatpush.msrb.mxu2 %v3082_v6  ;;  %1702 = vmatpush.msrb.mxu1 %v3055_v47  ;;  %v3074_v6 = vld [vmem:[%s5886_s3 + $0x428] sm:$0xff] }
 0x2b1   : > { %1623 = vmatpush.msra.mxu3 %v3036_v11  ;;  %v3029_v11 = vld [vmem:[%s5886_s3 + $0x300] sm:$0xff] }
 0x2b2   : > { %1774 = vmatpush.msrb.mxu2 %v3081_v27  ;;  %1703 = vmatpush.msrb.mxu1 %v3054_v4  ;;  %v3073_v27 = vld [vmem:[%s5886_s3 + $0x420] sm:$0xff] }
 0x2b3   : > { %1624 = vmatpush.msra.mxu3 %v3035_v50  ;;  %v3072_v50 = vld [vmem:[%s5886_s3 + $0x418] sm:$0xff] }
 0x2b4   : > { %1473 = vmatmul.f32.gmra.mxu1 %v4200_v62  ;;  %2984 = vmatmul.msk.f32.gmra.mxu3 %vm4248_vm5, %v4318_v2 }
 0x2b5   : > { %3022 = vmatmul.msk.f32.gmra.mxu2 %vm4193_vm4, %v4267_v37  ;;  %1625 = vmatpush.msra.mxu3 %v3034_v31  ;;  %v4637_v31 = vpop.f32.mrf.mxu3 }
 0x2b6   : > { %1775 = vmatpush.msrb.mxu2 %v3080_v60  ;;  %1704 = vmatpush.msrb.mxu1 %v3053_v7  ;;  %v3070_v60 = vld [vmem:[%s5886_s3 + $0x408] sm:$0xff] }
 0x2b7   : > { %1626 = vmatpush.msra.mxu3 %v3033_v1 }
 0x2b8   : > { %1776 = vmatpush.msrb.mxu2 %v3079_v44  ;;  %v4639_v44 = vpop.f32.mrf.mxu1 }
 0x2b9   : > { %1627 = vmatpush.msra.mxu3 %v3032_v35  ;;  %v1223_v47 = vadd.f32 %v4639_v44, %v4637_v31 }
 0x2ba   : > { %1777 = vmatpush.msrb.mxu2 %v3078_v42 }
 0x2bb   : > { %1628 = vmatpush.msra.mxu3 %v3031_v53 }
 0x2bc   : > { %1476 = vmatmul.f32.gmra.mxu1 %v4257_v3  ;;  %2985 = vmatmul.msk.f32.gmra.mxu3 %vm4304_vm7, %v4356_v57 }
 0x2bd   : > { %3023 = vmatmul.msk.f32.gmra.mxu2 %vm4252_vm6, %v4320_v55  ;;  %1629 = vmatpush.msra.mxu3 %v3030_v59 }
 0x2be   : > { %1778 = vmatpush.msrb.mxu2 %v3077_v26 }
 0x2bf   : > { %1630 = vmatpush.msra.mxu3 %v3029_v11 }
 0x2c0   : > { %1779 = vmatpush.msrb.mxu2 %v3076_v33 }
 0x2c2   : > { %1780 = vmatpush.msrb.mxu2 %v3075_v58 }
 0x2c4   : > { %1479 = vmatmul.f32.gmra.mxu1 %v4313_v14  ;;  %2986 = vmatmul.msk.f32.gmra.mxu3 %vm4342_vm9, %v4385_v25 }
 0x2c5   : > { %3024 = vmatmul.msk.f32.gmra.mxu2 %vm4308_vm8, %v4358_v45 }
 0x2c6   : > { %1781 = vmatpush.msrb.mxu2 %v3074_v6 }
 0x2c8   : > { %1782 = vmatpush.msrb.mxu2 %v3073_v27 }
 0x2ca   : > { %1783 = vmatpush.msrb.mxu2 %v3072_v50 }
 0x2cc   : > { %1784 = vmatpush.msrb.mxu2 %v3071_v46  ;;  %1482 = vmatmul.f32.gmra.mxu1 %v4351_v5 }
 0x2cd   : > { %3025 = vmatmul.msk.f32.gmra.mxu2 %vm4346_vm10, %v4387_v0  ;;  %2987 = vmatmul.msk.f32.gmra.mxu3 %vm4374_vm11, %v4407_v23 }
 0x2ce   : > { %1785 = vmatpush.msrb.mxu2 %v3070_v60 }
 0x2d0   : > { %1786 = vmatpush.msrb.mxu2 %v3069_v9 }
 0x2d4   : > { %1485 = vmatmul.f32.gmra.mxu1 %v4383_v21 }
 0x2d5   : > { %3026 = vmatmul.msk.f32.gmra.mxu2 %vm4378_vm12, %v4409_v54  ;;  %2988 = vmatmul.msk.f32.gmra.mxu3 %vm4397_vm13, %v4436_v34 }
 0x2dc   : > { %1488 = vmatmul.f32.gmra.mxu1 %v4405_v22 }
 0x2dd   : > { %3027 = vmatmul.msk.f32.gmra.mxu2 %vm4401_vm14, %v4434_v38  ;;  %3045 = vmatmul.msk.f32.vlgmr.msra.gmra.mxu3 %vm4088_vm0, %v4208_v52  ;;  %vm1893_vm0 = vcmask 523264  }
 0x2e4   : > { %1705 = vmatmul.f32.vlgmr.msrb.gmra.mxu1 %v4147_v36 }
 0x2e5   : > { %3028 = vmatmul.msk.f32.gmra.mxu2 %vm4427_vm15, %v4438_v28  ;;  %3046 = vmatmul.msk.f32.gmra.mxu3 %vm4136_vm1, %v4265_v17 }
 0x2e7   : > { %v4648_v39 = vpop.f32.mrf.mxu3 }
 0x2e9   : > { %v4650_v1 = vpop.f32.mrf.mxu1 }
 0x2ea   : > { %v1226_v7 = vadd.f32 %v4650_v1, %v4648_v39 }
 0x2ec   : > { %1708 = vmatmul.f32.gmra.mxu1 %v4200_v62 }
 0x2ed   : > { %3085 = vmatmul.msk.f32.vlgmr.msrb.gmra.mxu2 %vm4140_vm2, %v4267_v37  ;;  %3047 = vmatmul.msk.f32.gmra.mxu3 %vm4189_vm3, %v4318_v2 }
 0x2ef   : > { %v4661_v36 = vpop.f32.mrf.mxu3 }
 0x2f0   : > { %v4659_v10 = vpop.f32.mrf.mxu2 }
 0x2f1   : > { %v4663_v20 = vpop.f32.mrf.mxu1  ;;  %v1336_v59 = vadd.f32 %v4659_v10, %v1223_v47 }
 0x2f2   : > { %v1229_v44 = vadd.f32 %v4663_v20, %v4661_v36 }
 0x2f4   : > { %1711 = vmatmul.f32.gmra.mxu1 %v4257_v3 }
 0x2f5   : > { %3086 = vmatmul.msk.f32.gmra.mxu2 %vm4193_vm4, %v4320_v55  ;;  %3048 = vmatmul.msk.f32.gmra.mxu3 %vm4248_vm5, %v4356_v57  ;;  %v1745_v57 = vld [vmem:[#allocation2 + $0x4a] sm:$0xff]  ;;  %vm2390_vm5 = vcmask 130048  }
 0x2f7   : > { %v4674_v12 = vpop.f32.mrf.mxu3 }
 0x2f8   : > { %v4672_v49 = vpop.f32.mrf.mxu2 }
 0x2f9   : > { %v4676_v62 = vpop.f32.mrf.mxu1  ;;  %v1337_v46 = vadd.f32 %v4672_v49, %v1226_v7 }
 0x2fa   : > { %v1232_v36 = vadd.f32 %v4676_v62, %v4674_v12 }
 0x2fc   : > { %1714 = vmatmul.f32.gmra.mxu1 %v4313_v14 }
 0x2fd   : > { %3087 = vmatmul.msk.f32.gmra.mxu2 %vm4252_vm6, %v4358_v45  ;;  %3049 = vmatmul.msk.f32.gmra.mxu3 %vm4304_vm7, %v4385_v25 }
 0x2ff   : > { %v4687_v52 = vpop.f32.mrf.mxu3 }
 0x300   : > { %v4685_v24 = vpop.f32.mrf.mxu2 }
 0x301   : > { %v4689_v18 = vpop.f32.mrf.mxu1  ;;  %v1338_v1 = vadd.f32 %v4685_v24, %v1229_v44 }
 0x304   : > { %1717 = vmatmul.f32.gmra.mxu1 %v4351_v5 }
 0x305   : > { %3088 = vmatmul.msk.f32.gmra.mxu2 %vm4308_vm8, %v4387_v0  ;;  %3050 = vmatmul.msk.f32.gmra.mxu3 %vm4342_vm9, %v4407_v23  ;;  %vm2833_vm8 = vcmask 35840  }
 0x307   : > { %v4700_v3 = vpop.f32.mrf.mxu3 }
 0x308   : > { %v4698_v13 = vpop.f32.mrf.mxu2 }
 0x309   : > { %v4702_v17 = vpop.f32.mrf.mxu1 }
 0x30c   : > { %1720 = vmatmul.f32.gmra.mxu1 %v4383_v21 }
 0x30d   : > { %3089 = vmatmul.msk.f32.gmra.mxu2 %vm4346_vm10, %v4409_v54  ;;  %3051 = vmatmul.msk.f32.gmra.mxu3 %vm4374_vm11, %v4436_v34 }
 0x30f   : > { %v4713_v41 = vpop.f32.mrf.mxu3 }
 0x310   : > { %v4711_v37 = vpop.f32.mrf.mxu2 }
 0x311   : > { %v4715_v61 = vpop.f32.mrf.mxu1 }
 0x314   : > { %1723 = vmatmul.f32.gmra.mxu1 %v4405_v22 }
 0x315   : > { %3090 = vmatmul.msk.f32.gmra.mxu2 %vm4378_vm12, %v4434_v38  ;;  %3052 = vmatmul.msk.f32.gmra.mxu3 %vm4397_vm13, %v4459_v56 }
 0x317   : > { %v1202_v2 = vpop.f32.mrf.mxu3 }
 0x318   : > { %v4724_v14 = vpop.f32.mrf.mxu2 }
 0x319   : > { %v1243_v55 = vpop.f32.mrf.mxu1 }
 0x31a   : > { %v1244_v45 = vadd.f32 %v1243_v55, %v1202_v2 }
 0x31c   : > { %1726 = vmatmul.f32.gmra.mxu1 %v4450_v51 }
 0x31d   : > { %3091 = vmatmul.msk.f32.gmra.mxu2 %vm4401_vm14, %v4438_v28 }
 0x31f   : > { %v1394_v32 = vpop.f32.mrf.mxu3 }
 0x320   : > { %v4730_v19 = vpop.f32.mrf.mxu2  ;;  %v1418_v11 = vadd.f32 %v1394_v32, %v1336_v59  ;;  %v4771_v32 = vld [vmem:[%s5887_s4] ss:$0 sm:$0xff] }
 0x321   : > { %v1468_v5 = vpop.f32.mrf.mxu1 }
 0x322   : > { %v1492_v27 = vadd.f32 %v1468_v5, %v1418_v11 }
 0x325   : > { %3092 = vmatmul.msk.f32.gmra.mxu2 %vm4427_vm15, %v1745_v57 }
 0x327   : > { %v1397_v21 = vpop.f32.mrf.mxu3 }
 0x328   : > { %v1333_v15 = vpop.f32.mrf.mxu2  ;;  %v1419_v55 = vadd.f32 %v1397_v21, %v1337_v46 }
 0x329   : > { %v4734_v16 = vadd.f32 %v1333_v15, %v1244_v45  ;;  %v1471_v25 = vpop.f32.mrf.mxu1 }
 0x32a   : > { %v1493_v10 = vadd.f32 %v1471_v25, %v1419_v55 }
 0x32f   : > { %v1400_v43 = vpop.f32.mrf.mxu3 }
 0x330   : > { %v1550_v0 = vpop.f32.mrf.mxu2 }
 0x331   : > { %v1474_v30 = vpop.f32.mrf.mxu1  ;;  %v1574_v60 = vadd.f32 %v1550_v0, %v1492_v27  ;;  %v1420_v0 = vadd.f32 %v1400_v43, %v1338_v1 }
 0x333   : > { %v1494_v20 = vadd.f32 %v1474_v30, %v1420_v0 }
 0x337   : > { %v1403_v23 = vpop.f32.mrf.mxu3 }
 0x338   : > { %v1553_v22 = vpop.f32.mrf.mxu2 }
 0x339   : > { %v1477_v54 = vpop.f32.mrf.mxu1  ;;  %v1575_v5 = vadd.f32 %v1553_v22, %v1493_v10 }
 0x33f   : > { %v4736_v34 = vpop.f32.mrf.mxu3 }
 0x340   : > { %v1556_v38 = vpop.f32.mrf.mxu2 }
 0x341   : > { %v4738_v28 = vpop.f32.mrf.mxu1  ;;  %v1576_v11 = vadd.f32 %v1556_v38, %v1494_v20 }
 0x347   : > { %v4740_v29 = vpop.f32.mrf.mxu3 }
 0x348   : > { %v1559_v56 = vpop.f32.mrf.mxu2 }
 0x349   : > { %v4742_v42 = vpop.f32.mrf.mxu1 }
 0x350   : > { %v4744_v63 = vpop.f32.mrf.mxu2  ;;  %v4746_v26 = vpop.f32.mrf.mxu3 }
 0x351   : > { %v4748_v35 = vpop.f32.mrf.mxu1 }
 0x358   : > { %v4750_v40 = vpop.f32.mrf.mxu2  ;;  %v4752_v33 = vpop.f32.mrf.mxu3 }
 0x359   : > { %v4754_v53 = vpop.f32.mrf.mxu1 }
 0x360   : > { %v4758_v58 = vpop.f32.mrf.mxu2  ;;  %v1632_v4 = vpop.f32.mrf.mxu3 }
 0x361   : > { %v1706_v6 = vpop.f32.mrf.mxu1  ;;  %v1656_v31 = vadd.f32 %v1632_v4, %v1574_v60 }
 0x363   : > { %v1730_v57 = vadd.f32 %v1706_v6, %v1656_v31  ;;  %v1339_v6 = vadd.f32 %v4698_v13, %v1232_v36  ;;  %v1978_v13 = vld [vmem:[%s5888_s5 + $0x78] sm:$0xff] }
 0x364   : > { %2021 = vmatpush.msrb.mxu0 %v1978_v13 }
 0x365   : > { %v1421_v7 = vadd.f32 %v1403_v23, %v1339_v6 }
 0x367   : > { %v1495_v12 = vadd.f32 %v1477_v54, %v1421_v7 }
 0x368   : > { %v4763_v50 = vpop.f32.mrf.mxu2  ;;  %v1635_v9 = vpop.f32.mrf.mxu3 }
 0x369   : > { %v1709_v2 = vpop.f32.mrf.mxu1  ;;  %v1657_v21 = vadd.f32 %v1635_v9, %v1575_v5  ;;  %v1235_v9 = vadd.f32 %v4689_v18, %v4687_v52  ;;  %v1577_v38 = vadd.f32 %v1559_v56, %v1495_v12 }
 0x36b   : > { %v1731_v25 = vadd.f32 %v1709_v2, %v1657_v21  ;;  %v1340_v23 = vadd.f32 %v4711_v37, %v1235_v9  ;;  %v1241_v21 = vadd.f32 %v4715_v61, %v4713_v41 }
 0x36d   : > { %v1422_v31 = vadd.f32 %v4736_v34, %v1340_v23  ;;  %v1342_v36 = vadd.f32 %v4730_v19, %v1241_v21 }
 0x370   : > { %v1788_v39 = vpop.f32.mrf.mxu2  ;;  %v1638_v45 = vpop.f32.mrf.mxu3 }
 0x371   : > { %v1812_v49 = vadd.f32 %v1788_v39, %v1730_v57  ;;  %v1712_v15 = vpop.f32.mrf.mxu1  ;;  %v1658_v27 = vadd.f32 %v1638_v45, %v1576_v11  ;;  %v1238_v57 = vadd.f32 %v4702_v17, %v4700_v3  ;;  %v1496_v39 = vadd.f32 %v4738_v28, %v1422_v31 }
 0x373   : > { %v1824_v47 = vadd.f32 %v4771_v32, %v1812_v49  ;;  %v1732_v62 = vadd.f32 %v1712_v15, %v1658_v27  ;;  %v1341_v34 = vadd.f32 %v4724_v14, %v1238_v57  ;;  %v1578_v5 = vadd.f32 %v4744_v63, %v1496_v39  ;;  %v1973_v57 = vld [vmem:[%s5888_s5 + $0x50] sm:$0xff] }
 0x375   : > { %v1832_v59 = vmax.f32 %v1824_v47, 0.0  ;;  %v1423_v3 = vadd.f32 %v4740_v29, %v1341_v34  ;;  %v1972_v34 = vld [vmem:[%s5888_s5 + $0x48] sm:$0xff] }
 0x377   : > { %1842 = vst [vmem:[#allocation2] sm:$0xff] %v1832_v59  ;;  %v1497_v47 = vadd.f32 %v4742_v42, %v1423_v3 }
 0x378   : > { %v1791_v4 = vpop.f32.mrf.mxu2  ;;  %v1641_v22 = vpop.f32.mrf.mxu3 }
 0x379   : > { %v1813_v24 = vadd.f32 %v1791_v4, %v1731_v25  ;;  %v1715_v46 = vpop.f32.mrf.mxu1  ;;  %v1659_v44 = vadd.f32 %v1641_v22, %v1577_v38  ;;  %v1579_v29 = vadd.f32 %v4750_v40, %v1497_v47  ;;  %v1424_v25 = vadd.f32 %v4746_v26, %v1342_v36  ;;  %v1977_v40 = vld [vmem:[%s5888_s5 + $0x70] sm:$0xff]  ;;  %v1976_v26 = vld [vmem:[%s5888_s5 + $0x68] sm:$0xff]  ;;  %v1970_v47 = vld [vmem:[%s5888_s5 + $0x38] sm:$0xff] }
 0x37a   : > { %2022 = vmatpush.msrb.mxu0 %v1977_v40 }
 0x37b   : > { %v1825_v43 = vadd.f32 %v4771_v32, %v1813_v24  ;;  %v1733_v37 = vadd.f32 %v1715_v46, %v1659_v44  ;;  %v1498_v61 = vadd.f32 %v4748_v35, %v1424_v25  ;;  %v1425_v35 = vadd.f32 %v4752_v33, %v4734_v16 }
 0x37c   : > { %2023 = vmatpush.msrb.mxu0 %v1976_v26 }
 0x37d   : > { %v4779_v60 = vmax.f32 %v1825_v43, 0.0  ;;  %v1580_v22 = vadd.f32 %v4758_v58, %v1498_v61  ;;  %v1499_v58 = vadd.f32 %v4754_v53, %v1425_v35  ;;  %v3128_v35 = vld [vmem:[%s5888_s5 + $0x178] sm:$0xff] }
 0x37e   : > { %2069 = vmatpush.msra.mxu1 %v3128_v35  ;;  %v3180_v35 = vld [vmem:[%s5888_s5 + $0x2f8] sm:$0xff] }
 0x37f   : > { %1843 = vst [vmem:[#allocation2 + $0x8] sm:$0xff] %v4779_v60  ;;  %v1581_v23 = vadd.f32 %v4763_v50, %v1499_v58  ;;  %v1974_v50 = vld [vmem:[%s5888_s5 + $0x58] sm:$0xff]  ;;  %v3143_v58 = vld [vmem:[%s5888_s5 + $0x1e0] sm:$0xff] }
 0x380   : > { %v1794_v30 = vpop.f32.mrf.mxu2  ;;  %v1644_v55 = vpop.f32.mrf.mxu3 }
 0x381   : > { %v1814_v2 = vadd.f32 %v1794_v30, %v1732_v62  ;;  %v1718_v54 = vpop.f32.mrf.mxu1  ;;  %v1660_v17 = vadd.f32 %v1644_v55, %v1578_v5 }
 0x383   : > { %v1826_v52 = vadd.f32 %v4771_v32, %v1814_v2  ;;  %v1734_v14 = vadd.f32 %v1718_v54, %v1660_v17  ;;  %v1971_v17 = vld [vmem:[%s5888_s5 + $0x40] sm:$0xff] }
 0x385   : > { %v4790_v18 = vmax.f32 %v1826_v52, 0.0  ;;  %v1975_v52 = vld [vmem:[%s5888_s5 + $0x60] sm:$0xff] }
 0x386   : > { %v1850_v10 = vld [vmem:[#allocation2 + $0x1] sm:$0xff]  ;;  %2024 = vmatpush.msrb.mxu0 %v1975_v52 }
 0x387   : > { %1844 = vst [vmem:[#allocation2 + $0x10] sm:$0xff] %v4790_v18  ;;  %v4796_v56 = vmax.f32 %v1832_v59, %v1850_v10  ;;  %v3122_v52 = vld [vmem:[%s5888_s5 + $0x148] sm:$0xff] }
 0x388   : > { %v1797_v1 = vpop.f32.mrf.mxu2  ;;  %1923 = vst [vmem:[#allocation2] sm:$0x1f] %v4450_v51  ;;  %v1647_v15 = vpop.f32.mrf.mxu3  ;;  %2025 = vmatpush.msrb.mxu0 %v1974_v50  ;;  %v1967_v50 = vld [vmem:[%s5888_s5 + $0x20] sm:$0xff] }
 0x389   : > { %v1815_v49 = vadd.f32 %v1797_v1, %v1733_v37  ;;  %v1874_v45 = vmax.f32 %v4796_v56, %v4779_v60  ;;  %v1721_v63 = vpop.f32.mrf.mxu1  ;;  %v1661_v4 = vadd.f32 %v1647_v15, %v1579_v29  ;;  %v3145_v56 = vld [vmem:[%s5888_s5 + $0x1f0] sm:$0xff] }
 0x38a   : > { %2026 = vmatpush.msrb.mxu0 %v1973_v57  ;;  %v3121_v57 = vld [vmem:[%s5888_s5 + $0x140] sm:$0xff] }
 0x38b   : > { %v1827_v28 = vadd.f32 %v4771_v32, %v1815_v49  ;;  %v1735_v42 = vadd.f32 %v1721_v63, %v1661_v4  ;;  %v1882_v49 = vld [vmem:[#allocation2 + $0x41] sm:$0xff] }
 0x38c   : > { %2027 = vmatpush.msrb.mxu0 %v1972_v34  ;;  %v3136_v34 = vld [vmem:[%s5888_s5 + $0x1a8] sm:$0xff] }
 0x38d   : > { %v4805_v0 = vmax.f32 %v1827_v28, 0.0 }
 0x38e   : > { %2028 = vmatpush.msrb.mxu0 %v1971_v17  ;;  %v3098_v17 = vld [vmem:[%s5888_s5 + $0x98] sm:$0xff] }
 0x38f   : > { %1845 = vst [vmem:[#allocation2 + $0x18] sm:$0xff] %v4805_v0 }
 0x390   : > { %v1800_v59 = vpop.f32.mrf.mxu2  ;;  %v1650_v41 = vpop.f32.mrf.mxu3  ;;  %2029 = vmatpush.msrb.mxu0 %v1970_v47  ;;  %v3164_v47 = vld [vmem:[%s5888_s5 + $0x278] sm:$0xff] }
 0x391   : > { %v1816_v20 = vadd.f32 %v1800_v59, %v1734_v14  ;;  %v1724_v7 = vpop.f32.mrf.mxu1  ;;  %v1662_v27 = vadd.f32 %v1650_v41, %v1580_v22  ;;  %v1969_v59 = vld [vmem:[%s5888_s5 + $0x30] sm:$0xff] }
 0x392   : > { %2030 = vmatpush.msrb.mxu0 %v1969_v59  ;;  %v3161_v59 = vld [vmem:[%s5888_s5 + $0x260] sm:$0xff] }
 0x393   : > { %v1828_v6 = vadd.f32 %v4771_v32, %v1816_v20  ;;  %v1736_v9 = vadd.f32 %v1724_v7, %v1662_v27  ;;  %v1851_v20 = vld [vmem:[#allocation2 + $0x9] sm:$0xff] }
 0x394   : > { %v1883_v7 = vmax.f32 %v1874_v45, %v1851_v20  ;;  %v3109_v45 = vld [vmem:[%s5888_s5 + $0xf0] sm:$0xff]  ;;  %v3144_v27 = vld [vmem:[%s5888_s5 + $0x1e8] sm:$0xff] }
 0x395   : > { %v4815_v11 = vmax.f32 %v1828_v6, 0.0 }
 0x396   : > { %v4832_v62 = vld [vmem:[#allocation2 + $0x11] sm:$0xff] }
 0x397   : > { %1846 = vst [vmem:[#allocation2 + $0x20] sm:$0xff] %v4815_v11  ;;  %v1860_v6 = vmax.f32 %v4790_v18, %v4832_v62 }
 0x398   : > { %v1803_v24 = vpop.f32.mrf.mxu2  ;;  %v1653_v13 = vpop.f32.mrf.mxu3 }
 0x399   : > { %v1817_v19 = vadd.f32 %v1803_v24, %v1735_v42  ;;  %v1663_v33 = vadd.f32 %v1653_v13, %v1581_v23  ;;  %v1727_v2 = vpop.f32.mrf.mxu1  ;;  %v1859_v42 = vmax.f32 %v4779_v60, %v1851_v20  ;;  %v1876_v22 = vmax.f32 %v1860_v6, %v4805_v0  ;;  %v1968_v60 = vld [vmem:[%s5888_s5 + $0x28] sm:$0xff]  ;;  %v3125_v23 = vld [vmem:[%s5888_s5 + $0x160] sm:$0xff] }
 0x39a   : > { %2031 = vmatpush.msrb.mxu0 %v1968_v60  ;;  %v1892_v13 = vld [vmem:[%s5895_s12 + $0x8] sm:$0xff]  ;;  %v3157_v20 = vld [vmem:[%s5888_s5 + $0x240] sm:$0xff] }
 0x39b   : > { %v1829_v43 = vadd.f32 %v4771_v32, %v1817_v19  ;;  %v1737_v53 = vadd.f32 %v1727_v2, %v1663_v33  ;;  %v1875_v40 = vmax.f32 %v1859_v42, %v4790_v18  ;;  %v3110_v18 = vld [vmem:[%s5888_s5 + $0xf8] sm:$0xff]  ;;  %v3105_v33 = vld [vmem:[%s5888_s5 + $0xd0] sm:$0xff]  ;;  %v3140_v2 = vld [vmem:[%s5888_s5 + $0x1c8] sm:$0xff] }
 0x39c   : > { %2032 = vmatpush.msrb.mxu0 %v1967_v50  ;;  %v3154_v6 = vld [vmem:[%s5888_s5 + $0x228] sm:$0xff]  ;;  %v3134_v42 = vld [vmem:[%s5888_s5 + $0x198] sm:$0xff]  ;;  %v1963_v60 = vld [vmem:[%s5888_s5] sm:$0xff] }
 0x39d   : > { %v1837_v46 = vmax.f32 %v1829_v43, 0.0  ;;  %v1884_v26 = vmax.f32 %v1875_v40, %v4832_v62  ;;  %v3108_v43 = vld [vmem:[%s5888_s5 + $0xe8] sm:$0xff]  ;;  %v3142_v62 = vld [vmem:[%s5888_s5 + $0x1d8] sm:$0xff]  ;;  %v1965_v40 = vld [vmem:[%s5888_s5 + $0x10] sm:$0xff] }
 0x39e   : > { %v4830_v12 = vld [vmem:[#allocation2 + $0x19] sm:$0xff]  ;;  %v3193_v50 = vld [vmem:[%s5888_s5 + $0x350] sm:$0xff] }
 0x39f   : > { %1847 = vst [vmem:[#allocation2 + $0x28] sm:$0xff] %v1837_v46  ;;  %v1885_v19 = vmax.f32 %v1876_v22, %v4830_v12  ;;  %v3116_v22 = vld [vmem:[%s5888_s5 + $0x118] sm:$0xff] }
 0x3a0   : > { %v1806_v30 = vpop.f32.mrf.mxu2  ;;  %1924 = vst [vmem:[#allocation2 + $0x15] sm:$0x1f] %v4450_v51 }
 0x3a1   : > { %v1818_v16 = vadd.f32 %v1806_v30, %v1736_v9  ;;  %v3107_v9 = vld [vmem:[%s5888_s5 + $0xe0] sm:$0xff]  ;;  %v3106_v30 = vld [vmem:[%s5888_s5 + $0xd8] sm:$0xff] }
 0x3a3   : > { %v1830_v38 = vadd.f32 %v4771_v32, %v1818_v16  ;;  %v3141_v16 = vld [vmem:[%s5888_s5 + $0x1d0] sm:$0xff] }
 0x3a5   : > { %v1838_v55 = vmax.f32 %v1830_v38, 0.0  ;;  %v3124_v38 = vld [vmem:[%s5888_s5 + $0x158] sm:$0xff] }
 0x3a6   : > { %v1854_v3 = vld [vmem:[#allocation2 + $0x21] sm:$0xff] }
 0x3a7   : > { %1848 = vst [vmem:[#allocation2 + $0x30] sm:$0xff] %v1838_v55  ;;  %v1862_v63 = vmax.f32 %v4815_v11, %v1854_v3 }
 0x3a8   : > { %v1809_v31 = vpop.f32.mrf.mxu2 }
 0x3a9   : > { %v1819_v44 = vadd.f32 %v1809_v31, %v1737_v53  ;;  %v1878_v4 = vmax.f32 %v1862_v63, %v1837_v46  ;;  %v3123_v53 = vld [vmem:[%s5888_s5 + $0x150] sm:$0xff]  ;;  %v3139_v31 = vld [vmem:[%s5888_s5 + $0x1c0] sm:$0xff]  ;;  %v3162_v63 = vld [vmem:[%s5888_s5 + $0x268] sm:$0xff] }
 0x3ab   : > { %v1831_v54 = vadd.f32 %v4771_v32, %v1819_v44  ;;  %v3103_v44 = vld [vmem:[%s5888_s5 + $0xc0] sm:$0xff] }
 0x3ad   : > { %v1839_v10 = vmax.f32 %v1831_v54, 0.0  ;;  %v3138_v54 = vld [vmem:[%s5888_s5 + $0x1b8] sm:$0xff] }
 0x3ae   : > { %v1855_v39 = vld [vmem:[#allocation2 + $0x29] sm:$0xff] }
 0x3af   : > { %1849 = vst [vmem:[#allocation2 + $0x38] sm:$0xff] %v1839_v10  ;;  %v1863_v21 = vmax.f32 %v1837_v46, %v1855_v39  ;;  %v1887_v41 = vmax.f32 %v1878_v4, %v1855_v39  ;;  %v3127_v46 = vld [vmem:[%s5888_s5 + $0x170] sm:$0xff] }
 0x3b0   : > { %2070 = vmatpush.msra.mxu1 %v3127_v46  ;;  %v3137_v39 = vld [vmem:[%s5888_s5 + $0x1b0] sm:$0xff] }
 0x3b1   : > { %v1879_v29 = vmax.f32 %v1863_v21, %v1838_v55  ;;  %v3095_v21 = vld [vmem:[%s5888_s5 + $0x80] sm:$0xff]  ;;  %v3155_v4 = vld [vmem:[%s5888_s5 + $0x230] sm:$0xff] }
 0x3b2   : > { %v3179_v46 = vld [vmem:[%s5888_s5 + $0x2f0] sm:$0xff] }
 0x3b6   : > { %v1857_v37 = vld [vmem:[#allocation2 + $0x39] sm:$0xff]  ;;  %v1856_v1 = vld [vmem:[#allocation2 + $0x31] sm:$0xff] }
 0x3b7   : > { %v1865_v5 = vmax.f32 %v1839_v10, %v1857_v37  ;;  %v1864_v32 = vmax.f32 %v1838_v55, %v1856_v1  ;;  %v1888_v25 = vmax.f32 %v1879_v29, %v1856_v1  ;;  %v3104_v55 = vld [vmem:[%s5888_s5 + $0xc8] sm:$0xff]  ;;  %v3120_v1 = vld [vmem:[%s5888_s5 + $0x138] sm:$0xff]  ;;  %v3159_v29 = vld [vmem:[%s5888_s5 + $0x250] sm:$0xff] }
 0x3b9   : > { %v1881_v28 = vmax.f32 %v1865_v5, %v4450_v51  ;;  %v1880_v15 = vmax.f32 %v1864_v32, %v1839_v10  ;;  %v1861_v51 = vmax.f32 %v4805_v0, %v4830_v12  ;;  %v3146_v0 = vld [vmem:[%s5888_s5 + $0x1f8] sm:$0xff]  ;;  %v3126_v12 = vld [vmem:[%s5888_s5 + $0x168] sm:$0xff]  ;;  %v3119_v32 = vld [vmem:[%s5888_s5 + $0x130] sm:$0xff] }
 0x3ba   : > { %2115 = vmatpush.msra.mxu2 %v3146_v0  ;;  %2071 = vmatpush.msra.mxu1 %v3126_v12  ;;  %v3102_v10 = vld [vmem:[%s5888_s5 + $0xb8] sm:$0xff]  ;;  %v3100_v5 = vld [vmem:[%s5888_s5 + $0xa8] sm:$0xff] }
 0x3bb   : > { %v1890_v14 = vmax.f32 %v1881_v28, %v1882_v49  ;;  %v1889_v36 = vmax.f32 %v1880_v15, %v1857_v37  ;;  %v1877_v61 = vmax.f32 %v1861_v51, %v4815_v11  ;;  %v1891_v11 = vld [vmem:[%s5895_s12] sm:$0xff]  ;;  %v3101_v37 = vld [vmem:[%s5888_s5 + $0xb0] sm:$0xff]  ;;  %v3096_v15 = vld [vmem:[%s5888_s5 + $0x88] sm:$0xff] }
 0x3bc   : > { %2116 = vmatpush.msra.mxu2 %v3145_v56  ;;  %2072 = vmatpush.msra.mxu1 %v3125_v23  ;;  %v3135_v49 = vld [vmem:[%s5888_s5 + $0x1a0] sm:$0xff]  ;;  %v3097_v28 = vld [vmem:[%s5888_s5 + $0x90] sm:$0xff]  ;;  %v3158_v51 = vld [vmem:[%s5888_s5 + $0x248] sm:$0xff] }
 0x3bd   : > { %1908 = vmatpush.msrb.mxu3 %v1890_v14  ;;  %v1886_v24 = vmax.f32 %v1877_v61, %v1854_v3  ;;  %v3099_v3 = vld [vmem:[%s5888_s5 + $0xa0] sm:$0xff]  ;;  %v3163_v14 = vld [vmem:[%s5888_s5 + $0x270] sm:$0xff]  ;;  %v3114_v0 = vld [vmem:[%s5888_s5 + $0x108] sm:$0xff] }
 0x3be   : > { %2117 = vmatpush.msra.mxu2 %v3144_v27  ;;  %2073 = vmatpush.msra.mxu1 %v3124_v38  ;;  %v3117_v61 = vld [vmem:[%s5888_s5 + $0x120] sm:$0xff]  ;;  %v3198_v27 = vld [vmem:[%s5888_s5 + $0x378] sm:$0xff]  ;;  %v3178_v12 = vld [vmem:[%s5888_s5 + $0x2e8] sm:$0xff] }
 0x3bf   : > { %1909 = vmatpush.msrb.mxu3 %v1889_v36  ;;  %v3160_v36 = vld [vmem:[%s5888_s5 + $0x258] sm:$0xff]  ;;  %v3113_v56 = vld [vmem:[%s5888_s5 + $0x100] sm:$0xff]  ;;  %v3151_v23 = vld [vmem:[%s5888_s5 + $0x210] sm:$0xff] }
 0x3c0   : > { %2118 = vmatpush.msra.mxu2 %v3143_v58  ;;  %2074 = vmatpush.msra.mxu1 %v3123_v53  ;;  %v3197_v58 = vld [vmem:[%s5888_s5 + $0x370] sm:$0xff]  ;;  %v3212_v38 = vld [vmem:[%s5888_s5 + $0x3d8] sm:$0xff]  ;;  %v3150_v53 = vld [vmem:[%s5888_s5 + $0x208] sm:$0xff] }
 0x3c1   : > { %1910 = vmatpush.msrb.mxu3 %v1888_v25  ;;  %v3156_v25 = vld [vmem:[%s5888_s5 + $0x238] sm:$0xff] }
 0x3c2   : > { %2119 = vmatpush.msra.mxu2 %v3142_v62  ;;  %2075 = vmatpush.msra.mxu1 %v3122_v52  ;;  %v3153_v62 = vld [vmem:[%s5888_s5 + $0x220] sm:$0xff]  ;;  %v3194_v52 = vld [vmem:[%s5888_s5 + $0x358] sm:$0xff] }
 0x3c3   : > { %1911 = vmatpush.msrb.mxu3 %v1887_v41  ;;  %v3118_v41 = vld [vmem:[%s5888_s5 + $0x128] sm:$0xff] }
 0x3c4   : > { %2120 = vmatpush.msra.mxu2 %v3141_v16  ;;  %2076 = vmatpush.msra.mxu1 %v3121_v57  ;;  %v3213_v16 = vld [vmem:[%s5888_s5 + $0x3e0] sm:$0xff] }
 0x3c5   : > { %1912 = vmatpush.msrb.mxu3 %v1886_v24  ;;  %v1966_v24 = vld [vmem:[%s5888_s5 + $0x18] sm:$0xff]  ;;  %v3149_v57 = vld [vmem:[%s5888_s5 + $0x200] sm:$0xff] }
 0x3c6   : > { %2121 = vmatpush.msra.mxu2 %v3140_v2  ;;  %2077 = vmatpush.msra.mxu1 %v3120_v1  ;;  %v3176_v2 = vld [vmem:[%s5888_s5 + $0x2d8] sm:$0xff]  ;;  %v3173_v1 = vld [vmem:[%s5888_s5 + $0x2c0] sm:$0xff] }
 0x3c7   : > { %1913 = vmatpush.msrb.mxu3 %v1885_v19  ;;  %2033 = vmatpush.msrb.mxu0 %v1966_v24  ;;  %v3133_v19 = vld [vmem:[%s5888_s5 + $0x190] sm:$0xff]  ;;  %v3184_v24 = vld [vmem:[%s5888_s5 + $0x308] sm:$0xff] }
 0x3c8   : > { %2122 = vmatpush.msra.mxu2 %v3139_v31  ;;  %2078 = vmatpush.msra.mxu1 %v3119_v32  ;;  %v3211_v31 = vld [vmem:[%s5888_s5 + $0x3d0] sm:$0xff]  ;;  %v3191_v32 = vld [vmem:[%s5888_s5 + $0x340] sm:$0xff] }
 0x3c9   : > { %1914 = vmatpush.msrb.mxu3 %v1884_v26  ;;  %v3115_v26 = vld [vmem:[%s5888_s5 + $0x110] sm:$0xff]  ;;  %2034 = vmatpush.msrb.mxu0 %v1965_v40  ;;  %v1931_v40 = vand.u32 3, %v4070_v48 }
 0x3ca   : > { %2123 = vmatpush.msra.mxu2 %v3138_v54  ;;  %2079 = vmatpush.msra.mxu1 %v3118_v41  ;;  %v3210_v54 = vld [vmem:[%s5888_s5 + $0x3c8] sm:$0xff]  ;;  %v3185_v41 = vld [vmem:[%s5888_s5 + $0x310] sm:$0xff] }
 0x3cb   : > { %1915 = vmatpush.msrb.mxu3 %v1883_v7  ;;  %v3132_v7 = vld [vmem:[%s5888_s5 + $0x188] sm:$0xff]  ;;  %vm5237_vm1 = vcmp.ge.s32.totalorder %v1931_v40, 1  ;;  %vm5244_vm2 = vcmp.le.s32.totalorder %v1931_v40, 2 }
 0x3cc   : > { %3093 = vmatmul.msk.f32.vlgmr.msrb.gmra.mxu3 %vm1893_vm0, %v1891_v11  ;;  %2124 = vmatpush.msra.mxu2 %v3137_v39  ;;  %v1964_v11 = vld [vmem:[%s5888_s5 + $0x8] sm:$0xff]  ;;  %v3209_v39 = vld [vmem:[%s5888_s5 + $0x3c0] sm:$0xff] }
 0x3cd   : > { %1998 = vmatpush.msra.mxu3 %v3110_v18  ;;  %2080 = vmatpush.msra.mxu1 %v3117_v61  ;;  %v3131_v18 = vld [vmem:[%s5888_s5 + $0x180] sm:$0xff] }
 0x3ce   : > { %2125 = vmatpush.msra.mxu2 %v3136_v34  ;;  %2035 = vmatpush.msrb.mxu0 %v1964_v11  ;;  %v3208_v34 = vld [vmem:[%s5888_s5 + $0x3b8] sm:$0xff]  ;;  %v3201_v61 = vld [vmem:[%s5888_s5 + $0x380] sm:$0xff] }
 0x3cf   : > { %1999 = vmatpush.msra.mxu3 %v3109_v45  ;;  %2081 = vmatpush.msra.mxu1 %v3116_v22  ;;  %v3216_v45 = vld [vmem:[%s5888_s5 + $0x3f8] sm:$0xff]  ;;  %v3183_v22 = vld [vmem:[%s5888_s5 + $0x300] sm:$0xff] }
 0x3d0   : > { %2126 = vmatpush.msra.mxu2 %v3135_v49  ;;  %2036 = vmatpush.msrb.mxu0 %v1963_v60  ;;  %v3207_v49 = vld [vmem:[%s5888_s5 + $0x3b0] sm:$0xff] }
 0x3d1   : > { %2000 = vmatpush.msra.mxu3 %v3108_v43  ;;  %2082 = vmatpush.msra.mxu1 %v3115_v26  ;;  %v3215_v43 = vld [vmem:[%s5888_s5 + $0x3f0] sm:$0xff] }
 0x3d2   : > { %2127 = vmatpush.msra.mxu2 %v3134_v42  ;;  %2205 = vmatpush.msra.mxu0 %v3180_v35  ;;  %v3165_v42 = vld [vmem:[%s5888_s5 + $0x280] sm:$0xff] }
 0x3d3   : > { %2001 = vmatpush.msra.mxu3 %v3107_v9  ;;  %2083 = vmatpush.msra.mxu1 %v3114_v0  ;;  %v3214_v9 = vld [vmem:[%s5888_s5 + $0x3e8] sm:$0xff] }
 0x3d4   : > { %3094 = vmatmul.msk.f32.gmra.mxu3 %vm1893_vm0, %v1892_v13  ;;  %2128 = vmatpush.msra.mxu2 %v3133_v19  ;;  %v3152_v13 = vld [vmem:[%s5888_s5 + $0x218] sm:$0xff] }
 0x3d5   : > { %2002 = vmatpush.msra.mxu3 %v3106_v30  ;;  %2084 = vmatpush.msra.mxu1 %v3113_v56  ;;  %v3196_v30 = vld [vmem:[%s5888_s5 + $0x368] sm:$0xff] }
 0x3d6   : > { %2129 = vmatpush.msra.mxu2 %v3132_v7  ;;  %2206 = vmatpush.msra.mxu0 %v3179_v46  ;;  %v3232_v7 = vld [vmem:[%s5888_s5 + $0x478] sm:$0xff]  ;;  %v3229_v46 = vld [vmem:[%s5888_s5 + $0x460] sm:$0xff] }
 0x3d7   : > { %2003 = vmatpush.msra.mxu3 %v3105_v33  ;;  %2251 = vmatpush.msrb.mxu1 %v3198_v27  ;;  %v3177_v33 = vld [vmem:[%s5888_s5 + $0x2e0] sm:$0xff]  ;;  %v1938_v27 = vand.u32 3, %v4111_v8  ;;  %v3228_v8 = vld [vmem:[%s5888_s5 + $0x458] sm:$0xff] }
 0x3d8   : > { %2130 = vmatpush.msra.mxu2 %v3131_v18  ;;  %2207 = vmatpush.msra.mxu0 %v3178_v12 }
 0x3d9   : > { %2004 = vmatpush.msra.mxu3 %v3104_v55  ;;  %2252 = vmatpush.msrb.mxu1 %v3197_v58  ;;  %v3195_v55 = vld [vmem:[%s5888_s5 + $0x360] sm:$0xff]  ;;  %vm5264_vm3 = vcmp.ge.s32.totalorder %v1938_v27, 1  ;;  %vm5271_vm4 = vcmp.le.s32.totalorder %v1938_v27, 2 }
 0x3da   : > { %2295 = vmatpush.msrb.mxu2 %v3216_v45  ;;  %2208 = vmatpush.msra.mxu0 %v3177_v33  ;;  %v3231_v45 = vld [vmem:[%s5888_s5 + $0x470] sm:$0xff]  ;;  %v3248_v27 = vld [vmem:[%s5890_s7 + $0xe0] sm:$0xff] }
 0x3db   : > { %2005 = vmatpush.msra.mxu3 %v3103_v44  ;;  %2253 = vmatpush.msrb.mxu1 %v3196_v30  ;;  %v3175_v44 = vld [vmem:[%s5888_s5 + $0x2d0] sm:$0xff] }
 0x3dc   : > { %2296 = vmatpush.msrb.mxu2 %v3215_v43  ;;  %2209 = vmatpush.msra.mxu0 %v3176_v2  ;;  %v3230_v43 = vld [vmem:[%s5888_s5 + $0x468] sm:$0xff]  ;;  %v3227_v30 = vld [vmem:[%s5888_s5 + $0x450] sm:$0xff] }
 0x3dd   : > { %2006 = vmatpush.msra.mxu3 %v3102_v10  ;;  %2254 = vmatpush.msrb.mxu1 %v3195_v55  ;;  %v3174_v10 = vld [vmem:[%s5888_s5 + $0x2c8] sm:$0xff] }
 0x3de   : > { %2297 = vmatpush.msrb.mxu2 %v3214_v9  ;;  %2210 = vmatpush.msra.mxu0 %v3175_v44  ;;  %v3226_v55 = vld [vmem:[%s5888_s5 + $0x448] sm:$0xff]  ;;  %v3224_v44 = vld [vmem:[%s5888_s5 + $0x438] sm:$0xff] }
 0x3df   : > { %2007 = vmatpush.msra.mxu3 %v3101_v37  ;;  %2255 = vmatpush.msrb.mxu1 %v3194_v52  ;;  %v3192_v37 = vld [vmem:[%s5888_s5 + $0x348] sm:$0xff]  ;;  %v3223_v52 = vld [vmem:[%s5888_s5 + $0x430] sm:$0xff] }
 0x3e0   : > { %2298 = vmatpush.msrb.mxu2 %v3213_v16  ;;  %2211 = vmatpush.msra.mxu0 %v3174_v10  ;;  %v3222_v10 = vld [vmem:[%s5888_s5 + $0x428] sm:$0xff] }
 0x3e1   : > { %2008 = vmatpush.msra.mxu3 %v3100_v5  ;;  %2256 = vmatpush.msrb.mxu1 %v3193_v50  ;;  %v3172_v5 = vld [vmem:[%s5888_s5 + $0x2b8] sm:$0xff]  ;;  %v3221_v50 = vld [vmem:[%s5888_s5 + $0x420] sm:$0xff] }
 0x3e2   : > { %2299 = vmatpush.msrb.mxu2 %v3212_v38  ;;  %2212 = vmatpush.msra.mxu0 %v3173_v1  ;;  %v3217_v1 = vld [vmem:[%s5888_s5 + $0x400] sm:$0xff] }
 0x3e3   : > { %2009 = vmatpush.msra.mxu3 %v3099_v3  ;;  %2257 = vmatpush.msrb.mxu1 %v3192_v37  ;;  %v3171_v3 = vld [vmem:[%s5888_s5 + $0x2b0] sm:$0xff]  ;;  %v3218_v37 = vld [vmem:[%s5888_s5 + $0x408] sm:$0xff] }
 0x3e4   : > { %2300 = vmatpush.msrb.mxu2 %v3211_v31  ;;  %2213 = vmatpush.msra.mxu0 %v3172_v5  ;;  %v3225_v31 = vld [vmem:[%s5888_s5 + $0x440] sm:$0xff] }
 0x3e5   : > { %2010 = vmatpush.msra.mxu3 %v3098_v17  ;;  %v3190_v17 = vld [vmem:[%s5888_s5 + $0x338] sm:$0xff]  ;;  %2258 = vmatpush.msrb.mxu1 %v3191_v32 }
 0x3e6   : > { %2301 = vmatpush.msrb.mxu2 %v3210_v54  ;;  %2214 = vmatpush.msra.mxu0 %v3171_v3 }
 0x3e7   : > { %2011 = vmatpush.msra.mxu3 %v3097_v28  ;;  %v3206_v28 = vld [vmem:[%s5888_s5 + $0x3a8] sm:$0xff]  ;;  %2259 = vmatpush.msrb.mxu1 %v3190_v17 }
 0x3e8   : > { %2302 = vmatpush.msrb.mxu2 %v3209_v39  ;;  %v3219_v39 = vld [vmem:[%s5888_s5 + $0x410] sm:$0xff] }
 0x3e9   : > { %2012 = vmatpush.msra.mxu3 %v3096_v15  ;;  %v3170_v15 = vld [vmem:[%s5888_s5 + $0x2a8] sm:$0xff] }
 0x3ea   : > { %2303 = vmatpush.msrb.mxu2 %v3208_v34  ;;  %2215 = vmatpush.msra.mxu0 %v3170_v15 }
 0x3eb   : > { %2013 = vmatpush.msra.mxu3 %v3095_v21  ;;  %v3189_v21 = vld [vmem:[%s5888_s5 + $0x330] sm:$0xff] }
 0x3ec   : > { %2304 = vmatpush.msrb.mxu2 %v3207_v49  ;;  %2260 = vmatpush.msrb.mxu1 %v3189_v21 }
 0x3ed   : > { %2159 = vmatpush.msrb.mxu3 %v3164_v47  ;;  %v3205_v47 = vld [vmem:[%s5888_s5 + $0x3a0] sm:$0xff] }
 0x3ee   : > { %2305 = vmatpush.msrb.mxu2 %v3206_v28 }
 0x3ef   : > { %2160 = vmatpush.msrb.mxu3 %v3163_v14  ;;  %v3169_v14 = vld [vmem:[%s5888_s5 + $0x2a0] sm:$0xff] }
 0x3f0   : > { %2306 = vmatpush.msrb.mxu2 %v3205_v47  ;;  %2216 = vmatpush.msra.mxu0 %v3169_v14 }
 0x3f1   : > { %2161 = vmatpush.msrb.mxu3 %v3162_v63  ;;  %v3188_v63 = vld [vmem:[%s5888_s5 + $0x328] sm:$0xff] }
 0x3f2   : > { %2261 = vmatpush.msrb.mxu1 %v3188_v63 }
 0x3f3   : > { %2162 = vmatpush.msrb.mxu3 %v3161_v59  ;;  %v3204_v59 = vld [vmem:[%s5888_s5 + $0x398] sm:$0xff] }
 0x3f4   : > { %2307 = vmatpush.msrb.mxu2 %v3204_v59 }
 0x3f5   : > { %2163 = vmatpush.msrb.mxu3 %v3160_v36  ;;  %v3168_v36 = vld [vmem:[%s5888_s5 + $0x298] sm:$0xff] }
 0x3f6   : > { %2217 = vmatpush.msra.mxu0 %v3168_v36 }
 0x3f7   : > { %2164 = vmatpush.msrb.mxu3 %v3159_v29  ;;  %v3187_v29 = vld [vmem:[%s5888_s5 + $0x320] sm:$0xff] }
 0x3f8   : > { %2262 = vmatpush.msrb.mxu1 %v3187_v29 }
 0x3f9   : > { %2165 = vmatpush.msrb.mxu3 %v3158_v51  ;;  %v3203_v51 = vld [vmem:[%s5888_s5 + $0x390] sm:$0xff] }
 0x3fa   : > { %2308 = vmatpush.msrb.mxu2 %v3203_v51 }
 0x3fb   : > { %2166 = vmatpush.msrb.mxu3 %v3157_v20  ;;  %v3167_v20 = vld [vmem:[%s5888_s5 + $0x290] sm:$0xff] }
 0x3fc   : > { %2218 = vmatpush.msra.mxu0 %v3167_v20 }
 0x3fd   : > { %2167 = vmatpush.msrb.mxu3 %v3156_v25  ;;  %v3186_v25 = vld [vmem:[%s5888_s5 + $0x318] sm:$0xff] }
 0x3fe   : > { %2263 = vmatpush.msrb.mxu1 %v3186_v25 }
 0x3ff   : > { %2168 = vmatpush.msrb.mxu3 %v3155_v4  ;;  %v3202_v4 = vld [vmem:[%s5888_s5 + $0x388] sm:$0xff] }
 0x400   : > { %2309 = vmatpush.msrb.mxu2 %v3202_v4  ;;  %2264 = vmatpush.msrb.mxu1 %v3185_v41 }
 0x401   : > { %2169 = vmatpush.msrb.mxu3 %v3154_v6  ;;  %v3166_v6 = vld [vmem:[%s5888_s5 + $0x288] sm:$0xff] }
 0x402   : > { %2219 = vmatpush.msra.mxu0 %v3166_v6  ;;  %2310 = vmatpush.msrb.mxu2 %v3201_v61 }
 0x403   : > { %2170 = vmatpush.msrb.mxu3 %v3153_v62  ;;  %2265 = vmatpush.msrb.mxu1 %v3184_v24 }
 0x404   : > { %2220 = vmatpush.msra.mxu0 %v3165_v42 }
 0x405   : > { %2171 = vmatpush.msrb.mxu3 %v3152_v13  ;;  %2266 = vmatpush.msrb.mxu1 %v3183_v22  ;;  %v3266_v13 = vld [vmem:[%s5890_s7 + $0x168] sm:$0xff] }
 0x407   : > { %2172 = vmatpush.msrb.mxu3 %v3151_v23 }
 0x409   : > { %2173 = vmatpush.msrb.mxu3 %v3150_v53  ;;  %v5287_v53 = vld [vmem:[#allocation2 + $0x100] sm:$0xff] }
 0x40b   : > { %2174 = vmatpush.msrb.mxu3 %v3149_v57  ;;  %v3220_v57 = vld [vmem:[%s5888_s5 + $0x418] sm:$0xff] }
 0x44f   : > { %v1917_v19 = vpop.f32.mrf.mxu3 }
 0x450   : > { %1925 = vst [vmem:[#allocation2 + $0x5] sm:$0xff] %v1917_v19 }
 0x457   : > { %v1920_v11 = vpop.f32.mrf.mxu3  ;;  %v1979_v0 = vld [vmem:[#allocation2 + $0x1] sm:$0xff] }
 0x458   : > { %v2094_v18 = vld [vmem:[#allocation2 + $0x4] sm:$0xff]  ;;  %1926 = vst [vmem:[#allocation2 + $0xd] sm:$0xff] %v1920_v11  ;;  %2014 = vmatmul.f32.vlgmr.msra.gmra.mxu3 %v1979_v0 }
 0x459   : > { %v1955_v60 = vld [vmem:[#allocation2] sm:$0xff]  ;;  %3147 = vmatmul.msk.f32.vlgmr.msra.gmra.mxu2 %vm5237_vm1, %v2094_v18  ;;  %2341 = vmatpush.msra.mxu3 %v3232_v7  ;;  %v3251_v7 = vld [vmem:[%s5890_s7 + $0xf8] sm:$0xff] }
 0x45a   : > { %v2044_v35 = vld [vmem:[#allocation2 + $0x2] sm:$0xff]  ;;  %3111 = vmatmul.msk.f32.vlgmr.msrb.gmra.mxu0 %vm5237_vm1, %v1955_v60 }
 0x45b   : > { %3129 = vmatmul.msk.f32.vlgmr.msra.gmra.mxu1 %vm5244_vm2, %v2044_v35  ;;  %2342 = vmatpush.msra.mxu3 %v3231_v45  ;;  %v3249_v60 = vld [vmem:[%s5890_s7 + $0xe8] sm:$0xff]  ;;  %v2450_v35 = vld [vmem:[%s5890_s7 + $0x78] sm:$0xff] }
 0x45c   : > { %2469 = vmatpush.msra.mxu1 %v3251_v7  ;;  %2489 = vmatpush.msra.mxu2 %v2450_v35  ;;  %v3256_v7 = vld [vmem:[%s5890_s7 + $0x118] sm:$0xff]  ;;  %v3301_v35 = vld [vmem:[%s5890_s7 + $0x270] sm:$0xff] }
 0x45d   : > { %2343 = vmatpush.msra.mxu3 %v3230_v43  ;;  %v2449_v43 = vld [vmem:[%s5890_s7 + $0x70] sm:$0xff] }
 0x45e   : > { %2490 = vmatpush.msra.mxu2 %v2449_v43  ;;  %v3284_v43 = vld [vmem:[%s5890_s7 + $0x1f0] sm:$0xff] }
 0x45f   : > { %2344 = vmatpush.msra.mxu3 %v3229_v46  ;;  %v1980_v9 = vld [vmem:[#allocation2 + $0x9] sm:$0xff]  ;;  %v2277_v16 = vld [vmem:[#allocation2 + $0x11] sm:$0xff] }
 0x460   : > { %v2095_v12 = vld [vmem:[#allocation2 + $0xc] sm:$0xff]  ;;  %2017 = vmatmul.f32.gmra.mxu3 %v1980_v9  ;;  %v3268_v46 = vld [vmem:[%s5890_s7 + $0x178] sm:$0xff] }
 0x461   : > { %v1956_v62 = vld [vmem:[#allocation2 + $0x8] sm:$0xff]  ;;  %3148 = vmatmul.msk.f32.gmra.mxu2 %vm5264_vm3, %v2095_v12  ;;  %2345 = vmatpush.msra.mxu3 %v3228_v8  ;;  %v2321_v38 = vld [vmem:[#allocation2 + $0x12] sm:$0xff] }
 0x462   : > { %v2045_v23 = vld [vmem:[#allocation2 + $0xa] sm:$0xff]  ;;  %3112 = vmatmul.msk.f32.gmra.mxu0 %vm5264_vm3, %v1956_v62 }
 0x463   : > { %v2185_v33 = vld [vmem:[#allocation2 + $0xe] sm:$0xff]  ;;  %3130 = vmatmul.msk.f32.gmra.mxu1 %vm5271_vm4, %v2045_v23  ;;  %2346 = vmatpush.msra.mxu3 %v3227_v30  ;;  %v2184_v54 = vld [vmem:[#allocation2 + $0x6] sm:$0xff] }
 0x464   : > { %v2231_v2 = vld [vmem:[#allocation2 + $0x10] sm:$0xff]  ;;  %v2448_v8 = vld [vmem:[%s5890_s7 + $0x68] sm:$0xff] }
 0x465   : > { %2374 = vst [vmem:[#allocation2 + $0x10] sm:$0x1f] %v5287_v53  ;;  %2347 = vmatpush.msra.mxu3 %v3226_v55  ;;  %2491 = vmatpush.msra.mxu2 %v2448_v8  ;;  %v2446_v55 = vld [vmem:[%s5890_s7 + $0x58] sm:$0xff]  ;;  %v3254_v8 = vld [vmem:[%s5890_s7 + $0x108] sm:$0xff] }
 0x467   : > { %2348 = vmatpush.msra.mxu3 %v3225_v31  ;;  %v3245_v31 = vld [vmem:[%s5890_s7 + $0xc8] sm:$0xff] }
 0x468   : > { %2175 = vmatmul.f32.vlgmr.msrb.gmra.mxu3 %v1917_v19  ;;  %v3417_v19 = vld [vmem:[%s5889_s6] ss:$0 sm:$0xff] }
 0x469   : > { %2311 = vmatmul.f32.vlgmr.msrb.gmra.mxu2 %v1980_v9  ;;  %2349 = vmatpush.msra.mxu3 %v3224_v44  ;;  %v3267_v9 = vld [vmem:[%s5890_s7 + $0x170] sm:$0xff]  ;;  %v3264_v44 = vld [vmem:[%s5890_s7 + $0x158] sm:$0xff] }
 0x46a   : > { %3181 = vmatmul.msk.f32.vlgmr.msra.gmra.mxu0 %vm5244_vm2, %v2184_v54  ;;  %v2445_v54 = vld [vmem:[%s5890_s7 + $0x50] sm:$0xff] }
 0x46b   : > { %3199 = vmatmul.msk.f32.vlgmr.msrb.gmra.mxu1 %vm5237_vm1, %v1956_v62  ;;  %2350 = vmatpush.msra.mxu3 %v3223_v52  ;;  %v3247_v62 = vld [vmem:[%s5890_s7 + $0xd8] sm:$0xff] }
 0x46d   : > { %2351 = vmatpush.msra.mxu3 %v3222_v10  ;;  %v3244_v10 = vld [vmem:[%s5890_s7 + $0xc0] sm:$0xff] }
 0x46f   : > { %2352 = vmatpush.msra.mxu3 %v3221_v50  ;;  %v3263_v50 = vld [vmem:[%s5890_s7 + $0x150] sm:$0xff] }
 0x470   : > { %2178 = vmatmul.f32.gmra.mxu3 %v1920_v11  ;;  %v3250_v11 = vld [vmem:[%s5890_s7 + $0xf0] sm:$0xff] }
 0x471   : > { %2314 = vmatmul.f32.gmra.mxu2 %v2277_v16  ;;  %2353 = vmatpush.msra.mxu3 %v3220_v57 }
 0x472   : > { %3182 = vmatmul.msk.f32.gmra.mxu0 %vm5271_vm4, %v2185_v33  ;;  %2470 = vmatpush.msra.mxu1 %v3250_v11  ;;  %v3246_v33 = vld [vmem:[%s5890_s7 + $0xd0] sm:$0xff]  ;;  %v3236_v11 = vld [vmem:[%s5890_s7 + $0x80] sm:$0xff] }
 0x473   : > { %3200 = vmatmul.msk.f32.gmra.mxu1 %vm5264_vm3, %v2231_v2  ;;  %2354 = vmatpush.msra.mxu3 %v3219_v39  ;;  %v2444_v39 = vld [vmem:[%s5890_s7 + $0x48] sm:$0xff] }
 0x474   : > { %2471 = vmatpush.msra.mxu1 %v3249_v60  ;;  %v3302_v60 = vld [vmem:[%s5890_s7 + $0x278] sm:$0xff] }
 0x475   : > { %2355 = vmatpush.msra.mxu3 %v3218_v37  ;;  %v3243_v37 = vld [vmem:[%s5890_s7 + $0xb8] sm:$0xff] }
 0x476   : > { %2472 = vmatpush.msra.mxu1 %v3248_v27  ;;  %v3255_v27 = vld [vmem:[%s5890_s7 + $0x110] sm:$0xff] }
 0x477   : > { %2356 = vmatpush.msra.mxu3 %v3217_v1  ;;  %v3262_v1 = vld [vmem:[%s5890_s7 + $0x148] sm:$0xff] }
 0x478   : > { %3233 = vmatmul.msk.f32.vlgmr.msra.gmra.mxu3 %vm5244_vm2, %v2045_v23  ;;  %v2447_v23 = vld [vmem:[%s5890_s7 + $0x60] sm:$0xff]  ;;  %2473 = vmatpush.msra.mxu1 %v3247_v62 }
 0x479   : > { %2530 = vmatpush.msrb.mxu3 %v3268_v46  ;;  %2492 = vmatpush.msra.mxu2 %v2447_v23  ;;  %v2435_v46 = vld [vmem:[%s5890_s7] sm:$0xff]  ;;  %v3317_v23 = vld [vmem:[%s5890_s7 + $0x2f0] sm:$0xff] }
 0x47a   : > { %2474 = vmatpush.msra.mxu1 %v3246_v33  ;;  %v3299_v62 = vld [vmem:[%s5890_s7 + $0x260] sm:$0xff]  ;;  %v3335_v33 = vld [vmem:[%s5890_s7 + $0x378] sm:$0xff] }
 0x47b   : > { %2531 = vmatpush.msrb.mxu3 %v3267_v9  ;;  %2493 = vmatpush.msra.mxu2 %v2446_v55  ;;  %v3283_v9 = vld [vmem:[%s5890_s7 + $0x1e8] sm:$0xff]  ;;  %v3280_v55 = vld [vmem:[%s5890_s7 + $0x1d0] sm:$0xff] }
 0x47c   : > { %2475 = vmatpush.msra.mxu1 %v3245_v31  ;;  %v3296_v31 = vld [vmem:[%s5890_s7 + $0x248] sm:$0xff] }
 0x47d   : > { %2532 = vmatpush.msrb.mxu3 %v3266_v13  ;;  %2494 = vmatpush.msra.mxu2 %v2445_v54  ;;  %v3253_v13 = vld [vmem:[%s5890_s7 + $0x100] sm:$0xff] }
 0x47e   : > { %2476 = vmatpush.msra.mxu1 %v3244_v10  ;;  %v3278_v54 = vld [vmem:[%s5890_s7 + $0x1c0] sm:$0xff]  ;;  %v3294_v10 = vld [vmem:[%s5890_s7 + $0x238] sm:$0xff] }
 0x47f   : > { %2495 = vmatpush.msra.mxu2 %v2444_v39  ;;  %v3276_v39 = vld [vmem:[%s5890_s7 + $0x1b0] sm:$0xff] }
 0x480   : > { %3234 = vmatmul.msk.f32.gmra.mxu3 %vm5271_vm4, %v2321_v38  ;;  %v3265_v38 = vld [vmem:[%s5890_s7 + $0x160] sm:$0xff]  ;;  %2477 = vmatpush.msra.mxu1 %v3243_v37  ;;  %v3292_v37 = vld [vmem:[%s5890_s7 + $0x228] sm:$0xff] }
 0x481   : > { %2533 = vmatpush.msrb.mxu3 %v3265_v38  ;;  %v3281_v38 = vld [vmem:[%s5890_s7 + $0x1d8] sm:$0xff] }
 0x483   : > { %2534 = vmatpush.msrb.mxu3 %v3264_v44  ;;  %v3279_v44 = vld [vmem:[%s5890_s7 + $0x1c8] sm:$0xff] }
 0x485   : > { %2535 = vmatpush.msrb.mxu3 %v3263_v50  ;;  %v3277_v50 = vld [vmem:[%s5890_s7 + $0x1b8] sm:$0xff] }
 0x487   : > { %2536 = vmatpush.msrb.mxu3 %v3262_v1  ;;  %v3275_v1 = vld [vmem:[%s5890_s7 + $0x1a8] sm:$0xff] }
 0x4d7   : > { %v2038_v5 = vpop.f32.mrf.mxu0 }
 0x4d8   : > { %v2086_v32 = vpop.f32.mrf.mxu1 }
 0x4db   : > { %v2015_v34 = vpop.f32.mrf.mxu3 }
 0x4dc   : > { %v2132_v3 = vpop.f32.mrf.mxu2  ;;  %v2039_v17 = vadd.f32 %v2038_v5, %v2015_v34  ;;  %v2443_v34 = vld [vmem:[%s5890_s7 + $0x40] sm:$0xff]  ;;  %v3242_v5 = vld [vmem:[%s5890_s7 + $0xb0] sm:$0xff] }
 0x4dd   : > { %2496 = vmatpush.msra.mxu2 %v2443_v34  ;;  %2478 = vmatpush.msra.mxu1 %v3242_v5  ;;  %v3274_v34 = vld [vmem:[%s5890_s7 + $0x1a0] sm:$0xff]  ;;  %v3273_v5 = vld [vmem:[%s5890_s7 + $0x198] sm:$0xff] }
 0x4de   : > { %v2092_v15 = vadd.f32 %v2086_v32, %v2039_v17  ;;  %v3261_v32 = vld [vmem:[%s5890_s7 + $0x140] sm:$0xff]  ;;  %v3260_v17 = vld [vmem:[%s5890_s7 + $0x138] sm:$0xff] }
 0x4df   : > { %v2041_v28 = vpop.f32.mrf.mxu0  ;;  %2537 = vmatpush.msrb.mxu3 %v3261_v32  ;;  %v3272_v32 = vld [vmem:[%s5890_s7 + $0x190] sm:$0xff] }
 0x4e0   : > { %v2089_v21 = vpop.f32.mrf.mxu1  ;;  %v2138_v14 = vadd.f32 %v2132_v3, %v2092_v15  ;;  %v3241_v3 = vld [vmem:[%s5890_s7 + $0xa8] sm:$0xff]  ;;  %v3240_v15 = vld [vmem:[%s5890_s7 + $0xa0] sm:$0xff] }
 0x4e1   : > { %2479 = vmatpush.msra.mxu1 %v3241_v3  ;;  %2538 = vmatpush.msrb.mxu3 %v3260_v17  ;;  %v3270_v3 = vld [vmem:[%s5890_s7 + $0x180] sm:$0xff]  ;;  %v3352_v17 = vld [vmem:[%s5890_s7 + $0x3f8] sm:$0xff] }
 0x4e3   : > { %v2018_v49 = vpop.f32.mrf.mxu3  ;;  %2480 = vmatpush.msra.mxu1 %v3240_v15  ;;  %v3351_v15 = vld [vmem:[%s5890_s7 + $0x3f0] sm:$0xff] }
 0x4e4   : > { %v2042_v63 = vadd.f32 %v2041_v28, %v2018_v49  ;;  %v2135_v59 = vpop.f32.mrf.mxu2  ;;  %v2442_v49 = vld [vmem:[%s5890_s7 + $0x38] sm:$0xff]  ;;  %v2441_v28 = vld [vmem:[%s5890_s7 + $0x30] sm:$0xff] }
 0x4e5   : > { %2497 = vmatpush.msra.mxu2 %v2442_v49  ;;  %v3271_v49 = vld [vmem:[%s5890_s7 + $0x188] sm:$0xff] }
 0x4e6   : > { %v2093_v51 = vadd.f32 %v2089_v21, %v2042_v63  ;;  %v3259_v21 = vld [vmem:[%s5890_s7 + $0x130] sm:$0xff] }
 0x4e7   : > { %v2222_v29 = vpop.f32.mrf.mxu0  ;;  %2498 = vmatpush.msra.mxu2 %v2441_v28  ;;  %2539 = vmatpush.msrb.mxu3 %v3259_v21  ;;  %v3334_v28 = vld [vmem:[%s5890_s7 + $0x370] sm:$0xff]  ;;  %v3316_v21 = vld [vmem:[%s5890_s7 + $0x2e8] sm:$0xff] }
 0x4e8   : > { %v2268_v4 = vpop.f32.mrf.mxu1  ;;  %v2139_v6 = vadd.f32 %v2135_v59, %v2093_v51  ;;  %v3238_v59 = vld [vmem:[%s5890_s7 + $0x90] sm:$0xff] }
 0x4eb   : > { %v2176_v47 = vpop.f32.mrf.mxu3 }
 0x4ec   : > { %v2182_v36 = vadd.f32 %v2176_v47, %v2138_v14  ;;  %v2312_v42 = vpop.f32.mrf.mxu2  ;;  %v3239_v47 = vld [vmem:[%s5890_s7 + $0x98] sm:$0xff]  ;;  %v2440_v14 = vld [vmem:[%s5890_s7 + $0x28] sm:$0xff] }
 0x4ed   : > { %2499 = vmatpush.msra.mxu2 %v2440_v14  ;;  %2481 = vmatpush.msra.mxu1 %v3239_v47  ;;  %v3333_v47 = vld [vmem:[%s5890_s7 + $0x368] sm:$0xff] }
 0x4ee   : > { %v2228_v20 = vadd.f32 %v2222_v29, %v2182_v36  ;;  %v3258_v36 = vld [vmem:[%s5890_s7 + $0x128] sm:$0xff] }
 0x4ef   : > { %v2225_v24 = vpop.f32.mrf.mxu0  ;;  %2540 = vmatpush.msrb.mxu3 %v3258_v36  ;;  %2482 = vmatpush.msra.mxu1 %v3238_v59  ;;  %v3350_v14 = vld [vmem:[%s5890_s7 + $0x3e8] sm:$0xff]  ;;  %v3332_v59 = vld [vmem:[%s5890_s7 + $0x360] sm:$0xff] }
 0x4f0   : > { %v2274_v61 = vadd.f32 %v2268_v4, %v2228_v20  ;;  %v2271_v18 = vpop.f32.mrf.mxu1  ;;  %v2439_v20 = vld [vmem:[%s5890_s7 + $0x20] sm:$0xff] }
 0x4f1   : > { %2500 = vmatpush.msra.mxu2 %v2439_v20  ;;  %v3349_v36 = vld [vmem:[%s5890_s7 + $0x3e0] sm:$0xff]  ;;  %v3348_v20 = vld [vmem:[%s5890_s7 + $0x3d8] sm:$0xff] }
 0x4f2   : > { %v2318_v22 = vadd.f32 %v2312_v42, %v2274_v61 }
 0x4f3   : > { %v2179_v25 = vpop.f32.mrf.mxu3 }
 0x4f4   : > { %v2183_v41 = vadd.f32 %v2179_v25, %v2139_v6  ;;  %v2315_v12 = vpop.f32.mrf.mxu2  ;;  %v3257_v25 = vld [vmem:[%s5890_s7 + $0x120] sm:$0xff] }
 0x4f5   : > { %2541 = vmatpush.msrb.mxu3 %v3257_v25  ;;  %v3313_v25 = vld [vmem:[%s5890_s7 + $0x2d0] sm:$0xff] }
 0x4f6   : > { %v2229_v40 = vadd.f32 %v2225_v24, %v2183_v41  ;;  %v2438_v24 = vld [vmem:[%s5890_s7 + $0x18] sm:$0xff] }
 0x4f7   : > { %2501 = vmatpush.msra.mxu2 %v2438_v24  ;;  %2542 = vmatpush.msrb.mxu3 %v3256_v7  ;;  %v3291_v24 = vld [vmem:[%s5890_s7 + $0x220] sm:$0xff]  ;;  %v3327_v7 = vld [vmem:[%s5890_s7 + $0x338] sm:$0xff] }
 0x4f8   : > { %v2275_v45 = vadd.f32 %v2271_v18, %v2229_v40  ;;  %v3237_v40 = vld [vmem:[%s5890_s7 + $0x88] sm:$0xff]  ;;  %v2389_v18 = vld [vmem:[%s5896_s13] sm:$0xf] }
 0x4f9   : > { %2483 = vmatpush.msra.mxu1 %v3237_v40  ;;  %2543 = vmatpush.msrb.mxu3 %v3255_v27  ;;  %v3311_v40 = vld [vmem:[%s5890_s7 + $0x2c0] sm:$0xff]  ;;  %v3308_v27 = vld [vmem:[%s5890_s7 + $0x2a8] sm:$0xff] }
 0x4fa   : > { %v2319_v30 = vadd.f32 %v2315_v12, %v2275_v45  ;;  %v2436_v45 = vld [vmem:[%s5890_s7 + $0x8] sm:$0xff]  ;;  %v3318_v12 = vld [vmem:[%s5890_s7 + $0x2f8] sm:$0xff] }
 0x4fb   : > { %v2358_v26 = vpop.f32.mrf.mxu3  ;;  %2484 = vmatpush.msra.mxu1 %v3236_v11  ;;  %2544 = vmatpush.msrb.mxu3 %v3254_v8  ;;  %v3345_v11 = vld [vmem:[%s5890_s7 + $0x3c0] sm:$0xff] }
 0x4fc   : > { %v2364_v0 = vadd.f32 %v2358_v26, %v2318_v22  ;;  %v3324_v8 = vld [vmem:[%s5890_s7 + $0x320] sm:$0xff] }
 0x4fd   : > { %2608 = vmatpush.msrb.mxu1 %v3302_v60  ;;  %2545 = vmatpush.msrb.mxu3 %v3253_v13  ;;  %v3309_v60 = vld [vmem:[%s5890_s7 + $0x2b0] sm:$0xff]  ;;  %v3340_v13 = vld [vmem:[%s5890_s7 + $0x398] sm:$0xff] }
 0x4fe   : > { %v5341_v56 = vadd.f32 %v3417_v19, %v2364_v0 }
 0x4ff   : > { %2609 = vmatpush.msrb.mxu1 %v3301_v35  ;;  %2687 = vmatpush.msra.mxu3 %v3335_v33  ;;  %v3287_v35 = vld [vmem:[%s5890_s7 + $0x200] sm:$0xff]  ;;  %v3304_v33 = vld [vmem:[%s5890_s7 + $0x288] sm:$0xff] }
 0x500   : > { %v2372_v58 = vmax.f32 %v5341_v56, 0.0  ;;  %v3285_v56 = vld [vmem:[%s5890_s7 + $0x1f8] sm:$0xff] }
 0x501   : > { %2688 = vmatpush.msra.mxu3 %v3334_v28 }
 0x502   : > { %2375 = vst [vmem:[#allocation2] sm:$0xff] %v2372_v58 }
 0x503   : > { %v2361_v16 = vpop.f32.mrf.mxu3  ;;  %2689 = vmatpush.msra.mxu3 %v3333_v47  ;;  %v3363_v47 = vld [vmem:[%s5890_s7 + $0x450] sm:$0xff] }
 0x504   : > { %v2365_v2 = vadd.f32 %v2361_v16, %v2319_v30  ;;  %v3282_v30 = vld [vmem:[%s5890_s7 + $0x1e0] sm:$0xff]  ;;  %v3298_v16 = vld [vmem:[%s5890_s7 + $0x258] sm:$0xff] }
 0x505   : > { %2690 = vmatpush.msra.mxu3 %v3332_v59  ;;  %v3361_v59 = vld [vmem:[%s5890_s7 + $0x440] sm:$0xff] }
 0x506   : > { %v2371_v52 = vadd.f32 %v3417_v19, %v2365_v2  ;;  %v3297_v2 = vld [vmem:[%s5890_s7 + $0x250] sm:$0xff] }
 0x508   : > { %v2373_v57 = vmax.f32 %v2371_v52, 0.0  ;;  %v3295_v52 = vld [vmem:[%s5890_s7 + $0x240] sm:$0xff] }
 0x50a   : > { %2376 = vst [vmem:[#allocation2 + $0x8] sm:$0xff] %v2373_v57 }
 0x511   : > { %v2378_v63 = vld [vmem:[#allocation2 + $0x9] sm:$0xff]  ;;  %v2377_v51 = vld [vmem:[#allocation2 + $0x1] sm:$0xff] }
 0x512   : > { %v2380_v29 = vmax.f32 %v2373_v57, %v2378_v63  ;;  %v2382_v4 = vld [vmem:[#allocation2 + $0xc] sm:$0xff]  ;;  %v2379_v6 = vmax.f32 %v2372_v58, %v2377_v51  ;;  %v2381_v41 = vld [vmem:[#allocation2 + $0x4] sm:$0xff]  ;;  %2414 = vst [vmem:[#allocation2] sm:$0x7] %v5287_v53  ;;  %v3331_v51 = vld [vmem:[%s5890_s7 + $0x358] sm:$0xff] }
 0x513   : > { %v2385_v61 = vld [vmem:[#allocation2 + $0x5] sm:$0xff]  ;;  %v2386_v22 = vld [vmem:[#allocation2 + $0xd] sm:$0xff]  ;;  %2691 = vmatpush.msra.mxu3 %v3331_v51 }
 0x514   : > { %v2384_v42 = vmax.f32 %v2380_v29, %v2382_v4  ;;  %2415 = vst [vmem:[#allocation2 + $0x7] sm:$0x7] %v5287_v53  ;;  %v2383_v19 = vmax.f32 %v2379_v6, %v2381_v41  ;;  %v2437_v53 = vld [vmem:[%s5890_s7 + $0x10] sm:$0xff]  ;;  %v3300_v58 = vld [vmem:[%s5890_s7 + $0x268] sm:$0xff]  ;;  %v3315_v63 = vld [vmem:[%s5890_s7 + $0x2e0] sm:$0xff] }
 0x515   : > { %2502 = vmatpush.msra.mxu2 %v2437_v53  ;;  %2610 = vmatpush.msrb.mxu1 %v3300_v58  ;;  %v3293_v57 = vld [vmem:[%s5890_s7 + $0x230] sm:$0xff]  ;;  %v3314_v29 = vld [vmem:[%s5890_s7 + $0x2d8] sm:$0xff]  ;;  %v3312_v41 = vld [vmem:[%s5890_s7 + $0x2c8] sm:$0xff] }
 0x516   : > { %v2388_v26 = vmax.f32 %v2384_v42, %v2386_v22  ;;  %v2387_v0 = vmax.f32 %v2383_v19, %v2385_v61  ;;  %v3330_v4 = vld [vmem:[%s5890_s7 + $0x350] sm:$0xff]  ;;  %v3329_v61 = vld [vmem:[%s5890_s7 + $0x348] sm:$0xff]  ;;  %v3290_v22 = vld [vmem:[%s5890_s7 + $0x218] sm:$0xff] }
 0x517   : > { %2503 = vmatpush.msra.mxu2 %v2436_v45  ;;  %2611 = vmatpush.msrb.mxu1 %v3299_v62  ;;  %v3347_v6 = vld [vmem:[%s5890_s7 + $0x3d0] sm:$0xff]  ;;  %v3346_v42 = vld [vmem:[%s5890_s7 + $0x3c8] sm:$0xff]  ;;  %v3328_v53 = vld [vmem:[%s5890_s7 + $0x340] sm:$0xff] }
 0x518   : > { %2408 = vmatpush.msrb.mxu0 %v2388_v26  ;;  %2692 = vmatpush.msra.mxu3 %v3330_v4  ;;  %v3289_v19 = vld [vmem:[%s5890_s7 + $0x210] sm:$0xff]  ;;  %v3310_v26 = vld [vmem:[%s5890_s7 + $0x2b8] sm:$0xff]  ;;  %v3307_v58 = vld [vmem:[%s5890_s7 + $0x2a0] sm:$0xff] }
 0x519   : > { %2504 = vmatpush.msra.mxu2 %v2435_v46  ;;  %2612 = vmatpush.msrb.mxu1 %v3298_v16  ;;  %v3343_v45 = vld [vmem:[%s5890_s7 + $0x3b0] sm:$0xff]  ;;  %v3342_v46 = vld [vmem:[%s5890_s7 + $0x3a8] sm:$0xff]  ;;  %v3323_v62 = vld [vmem:[%s5890_s7 + $0x318] sm:$0xff] }
 0x51a   : > { %2409 = vmatpush.msrb.mxu0 %v2387_v0  ;;  %2693 = vmatpush.msra.mxu3 %v3329_v61  ;;  %v3344_v0 = vld [vmem:[%s5890_s7 + $0x3b8] sm:$0xff]  ;;  %v3339_v16 = vld [vmem:[%s5890_s7 + $0x390] sm:$0xff]  ;;  %v3358_v51 = vld [vmem:[%s5890_s7 + $0x428] sm:$0xff] }
 0x51b   : > { %3235 = vmatmul.msk.f32.vlgmr.msrb.gmra.mxu0 %vm2390_vm5, %v2389_v18  ;;  %2648 = vmatpush.msrb.mxu2 %v3318_v12  ;;  %v3288_v18 = vld [vmem:[%s5890_s7 + $0x208] sm:$0xff]  ;;  %v3306_v12 = vld [vmem:[%s5890_s7 + $0x298] sm:$0xff]  ;;  %v3355_v4 = vld [vmem:[%s5890_s7 + $0x410] sm:$0xff] }
 0x51c   : > { %2569 = vmatpush.msra.mxu0 %v3285_v56  ;;  %2613 = vmatpush.msrb.mxu1 %v3297_v2  ;;  %v3326_v56 = vld [vmem:[%s5890_s7 + $0x330] sm:$0xff]  ;;  %v3338_v2 = vld [vmem:[%s5890_s7 + $0x388] sm:$0xff] }
 0x51d   : > { %2649 = vmatpush.msrb.mxu2 %v3317_v23  ;;  %2694 = vmatpush.msra.mxu3 %v3328_v53  ;;  %v3322_v23 = vld [vmem:[%s5890_s7 + $0x310] sm:$0xff]  ;;  %v2798_v53 = vld [vmem:[%s5892_s9 + $0x28] sm:$0xff] }
 0x51e   : > { %2570 = vmatpush.msra.mxu0 %v3284_v43  ;;  %2614 = vmatpush.msrb.mxu1 %v3296_v31  ;;  %v3325_v43 = vld [vmem:[%s5890_s7 + $0x328] sm:$0xff]  ;;  %v3320_v31 = vld [vmem:[%s5890_s7 + $0x300] sm:$0xff] }
 0x51f   : > { %2650 = vmatpush.msrb.mxu2 %v3316_v21  ;;  %2695 = vmatpush.msra.mxu3 %v3327_v7  ;;  %v2805_v21 = vld [vmem:[%s5892_s9 + $0x60] sm:$0xff] }
 0x520   : > { %2571 = vmatpush.msra.mxu0 %v3283_v9  ;;  %2615 = vmatpush.msrb.mxu1 %v3295_v52  ;;  %v3341_v9 = vld [vmem:[%s5890_s7 + $0x3a0] sm:$0xff] }
 0x521   : > { %2651 = vmatpush.msrb.mxu2 %v3315_v63  ;;  %2696 = vmatpush.msra.mxu3 %v3326_v56  ;;  %v3362_v63 = vld [vmem:[%s5890_s7 + $0x448] sm:$0xff]  ;;  %v2797_v7 = vld [vmem:[%s5892_s9 + $0x20] sm:$0xff] }
 0x522   : > { %2572 = vmatpush.msra.mxu0 %v3282_v30  ;;  %2616 = vmatpush.msrb.mxu1 %v3294_v10  ;;  %v3305_v30 = vld [vmem:[%s5890_s7 + $0x290] sm:$0xff] }
 0x523   : > { %2652 = vmatpush.msrb.mxu2 %v3314_v29  ;;  %2697 = vmatpush.msra.mxu3 %v3325_v43  ;;  %v3359_v29 = vld [vmem:[%s5890_s7 + $0x430] sm:$0xff] }
 0x524   : > { %2573 = vmatpush.msra.mxu0 %v3281_v38  ;;  %2617 = vmatpush.msrb.mxu1 %v3293_v57  ;;  %v3321_v38 = vld [vmem:[%s5890_s7 + $0x308] sm:$0xff] }
 0x525   : > { %2653 = vmatpush.msrb.mxu2 %v3313_v25  ;;  %2698 = vmatpush.msra.mxu3 %v3324_v8  ;;  %v3356_v25 = vld [vmem:[%s5890_s7 + $0x418] sm:$0xff] }
 0x526   : > { %2574 = vmatpush.msra.mxu0 %v3280_v55  ;;  %2618 = vmatpush.msrb.mxu1 %v3292_v37  ;;  %v3303_v55 = vld [vmem:[%s5890_s7 + $0x280] sm:$0xff] }
 0x527   : > { %2654 = vmatpush.msrb.mxu2 %v3312_v41  ;;  %2699 = vmatpush.msra.mxu3 %v3323_v62  ;;  %v3353_v41 = vld [vmem:[%s5890_s7 + $0x400] sm:$0xff] }
 0x528   : > { %2575 = vmatpush.msra.mxu0 %v3279_v44  ;;  %2619 = vmatpush.msrb.mxu1 %v3291_v24  ;;  %v3337_v44 = vld [vmem:[%s5890_s7 + $0x380] sm:$0xff]  ;;  %v2803_v24 = vld [vmem:[%s5892_s9 + $0x50] sm:$0xff] }
 0x529   : > { %2655 = vmatpush.msrb.mxu2 %v3311_v40  ;;  %2700 = vmatpush.msra.mxu3 %v3322_v23  ;;  %v2800_v40 = vld [vmem:[%s5892_s9 + $0x38] sm:$0xff] }
 0x52a   : > { %2576 = vmatpush.msra.mxu0 %v3278_v54  ;;  %2620 = vmatpush.msrb.mxu1 %v3290_v22  ;;  %v2421_v54 = vand.u32 1, %v4070_v48  ;;  %v3367_v48 = vld [vmem:[%s5890_s7 + $0x470] sm:$0xff]  ;;  %v2802_v22 = vld [vmem:[%s5892_s9 + $0x48] sm:$0xff] }
 0x52b   : > { %2656 = vmatpush.msrb.mxu2 %v3310_v26  ;;  %2701 = vmatpush.msra.mxu3 %v3321_v38  ;;  %v2799_v26 = vld [vmem:[%s5892_s9 + $0x30] sm:$0xff] }
 0x52c   : > { %2577 = vmatpush.msra.mxu0 %v3277_v50  ;;  %2621 = vmatpush.msrb.mxu1 %v3289_v19  ;;  %vm5729_vm6 = vcmp.ge.s32.totalorder %v2421_v54, 1  ;;  %v3368_v50 = vld [vmem:[%s5890_s7 + $0x478] sm:$0xff]  ;;  %vm5736_vm7 = vcmp.le.s32.totalorder %v2421_v54, 0  ;;  %v2801_v19 = vld [vmem:[%s5892_s9 + $0x40] sm:$0xff] }
 0x52d   : > { %2657 = vmatpush.msrb.mxu2 %v3309_v60  ;;  %2702 = vmatpush.msra.mxu3 %v3320_v31  ;;  %v2793_v60 = vld [vmem:[%s5892_s9] sm:$0xff] }
 0x52e   : > { %2578 = vmatpush.msra.mxu0 %v3276_v39  ;;  %2622 = vmatpush.msrb.mxu1 %v3288_v18  ;;  %v2794_v18 = vld [vmem:[%s5892_s9 + $0x8] sm:$0xff] }
 0x52f   : > { %2658 = vmatpush.msrb.mxu2 %v3308_v27 }
 0x530   : > { %2579 = vmatpush.msra.mxu0 %v3275_v1  ;;  %2623 = vmatpush.msrb.mxu1 %v3287_v35 }
 0x531   : > { %2659 = vmatpush.msrb.mxu2 %v3307_v58 }
 0x532   : > { %2580 = vmatpush.msra.mxu0 %v3274_v34  ;;  %v2808_v34 = vld [vmem:[%s5892_s9 + $0x78] sm:$0xff] }
 0x533   : > { %2660 = vmatpush.msrb.mxu2 %v3306_v12 }
 0x534   : > { %2581 = vmatpush.msra.mxu0 %v3273_v5  ;;  %v2807_v5 = vld [vmem:[%s5892_s9 + $0x70] sm:$0xff] }
 0x535   : > { %2661 = vmatpush.msrb.mxu2 %v3305_v30 }
 0x536   : > { %2582 = vmatpush.msra.mxu0 %v3272_v32  ;;  %v3366_v32 = vld [vmem:[%s5890_s7 + $0x468] sm:$0xff] }
 0x537   : > { %2662 = vmatpush.msrb.mxu2 %v3304_v33  ;;  %v3418_v33 = vld [vmem:[%s5891_s8] ss:$0 sm:$0xff] }
 0x538   : > { %2583 = vmatpush.msra.mxu0 %v3271_v49  ;;  %v2806_v49 = vld [vmem:[%s5892_s9 + $0x68] sm:$0xff] }
 0x539   : > { %2663 = vmatpush.msrb.mxu2 %v3303_v55 }
 0x53a   : > { %2584 = vmatpush.msra.mxu0 %v3270_v3  ;;  %v3365_v3 = vld [vmem:[%s5890_s7 + $0x460] sm:$0xff] }
 0x53c   : > { %2726 = vmatpush.msrb.mxu0 %v3352_v17  ;;  %v3364_v17 = vld [vmem:[%s5890_s7 + $0x458] sm:$0xff] }
 0x53e   : > { %2727 = vmatpush.msrb.mxu0 %v3351_v15 }
 0x540   : > { %2728 = vmatpush.msrb.mxu0 %v3350_v14 }
 0x542   : > { %2729 = vmatpush.msrb.mxu0 %v3349_v36  ;;  %v3360_v36 = vld [vmem:[%s5890_s7 + $0x438] sm:$0xff] }
 0x544   : > { %2730 = vmatpush.msrb.mxu0 %v3348_v20  ;;  %v3357_v20 = vld [vmem:[%s5890_s7 + $0x420] sm:$0xff] }
 0x546   : > { %2731 = vmatpush.msrb.mxu0 %v3347_v6  ;;  %v3354_v6 = vld [vmem:[%s5890_s7 + $0x408] sm:$0xff] }
 0x548   : > { %2732 = vmatpush.msrb.mxu0 %v3346_v42  ;;  %v2804_v42 = vld [vmem:[%s5892_s9 + $0x58] sm:$0xff] }
 0x54a   : > { %2733 = vmatpush.msrb.mxu0 %v3345_v11  ;;  %v2796_v11 = vld [vmem:[%s5892_s9 + $0x18] sm:$0xff] }
 0x54c   : > { %2734 = vmatpush.msrb.mxu0 %v3344_v0  ;;  %v2795_v0 = vld [vmem:[%s5892_s9 + $0x10] sm:$0xff] }
 0x54e   : > { %2735 = vmatpush.msrb.mxu0 %v3343_v45 }
 0x550   : > { %2736 = vmatpush.msrb.mxu0 %v3342_v46 }
 0x552   : > { %2737 = vmatpush.msrb.mxu0 %v3341_v9 }
 0x554   : > { %2738 = vmatpush.msrb.mxu0 %v3340_v13 }
 0x556   : > { %2739 = vmatpush.msrb.mxu0 %v3339_v16 }
 0x558   : > { %2740 = vmatpush.msrb.mxu0 %v3338_v2 }
 0x55a   : > { %2741 = vmatpush.msrb.mxu0 %v3337_v44  ;;  %v3419_v44 = vld [vmem:[%s5893_s10] ss:$0 sm:$0xff] }
 0x598   : > { %v2411_v52 = vpop.f32.mrf.mxu0 }
 0x599   : > { %2416 = vst [vmem:[#allocation2 + $0x3] sm:$0xf] %v2411_v52 }
 0x5a0   : > { %v2451_v39 = vld [vmem:[#allocation2 + $0x1] sm:$0xf]  ;;  %v2708_v14 = vld [vmem:[#allocation2 + $0x5] sm:$0xf] }
 0x5a1   : > { %v2431_v37 = vld [vmem:[#allocation2] sm:$0xf]  ;;  %2485 = vmatmul.f32.vlgmr.msra.gmra.mxu1 %v2451_v39  ;;  %v2629_v28 = vld [vmem:[#allocation2 + $0x4] sm:$0xf] }
 0x5a2   : > { %v2509_v1 = vld [vmem:[#allocation2 + $0x2] sm:$0xf]  ;;  %3252 = vmatmul.msk.f32.vlgmr.msra.gmra.mxu2 %vm5729_vm6, %v2431_v37  ;;  %2766 = vmatpush.msra.mxu1 %v3368_v50  ;;  %v2747_v61 = vld [vmem:[#allocation2 + $0x6] sm:$0xf] }
 0x5a3   : > { %3269 = vmatmul.msk.f32.vlgmr.msrb.gmra.mxu3 %vm5736_vm7, %v2509_v1  ;;  %3286 = vmatmul.msk.f32.vlgmr.msra.gmra.mxu0 %vm5729_vm6, %v2509_v1  ;;  %v2590_v15 = vld [vmem:[#allocation2 + $0x3] sm:$0xf] }
 0x5a4   : > { %2813 = vmatpush.msra.mxu2 %v2808_v34  ;;  %2767 = vmatpush.msra.mxu1 %v3367_v48 }
 0x5a6   : > { %2814 = vmatpush.msra.mxu2 %v2807_v5  ;;  %2768 = vmatpush.msra.mxu1 %v3366_v32 }
 0x5a8   : > { %2815 = vmatpush.msra.mxu2 %v2806_v49  ;;  %2769 = vmatpush.msra.mxu1 %v3365_v3 }
 0x5a9   : > { %2624 = vmatmul.f32.vlgmr.msrb.gmra.mxu1 %v2590_v15 }
 0x5aa   : > { %3319 = vmatmul.msk.f32.vlgmr.msrb.gmra.mxu2 %vm5736_vm7, %v2629_v28  ;;  %2770 = vmatpush.msra.mxu1 %v3364_v17 }
 0x5ab   : > { %3336 = vmatmul.msk.f32.vlgmr.msra.gmra.mxu3 %vm5729_vm6, %v2629_v28  ;;  %2742 = vmatmul.f32.vlgmr.msrb.gmra.mxu0 %v2708_v14 }
 0x5ac   : > { %2816 = vmatpush.msra.mxu2 %v2805_v21  ;;  %2771 = vmatpush.msra.mxu1 %v3363_v47 }
 0x5ae   : > { %2772 = vmatpush.msra.mxu1 %v3362_v63  ;;  %2817 = vmatpush.msra.mxu2 %v2804_v42 }
 0x5b0   : > { %2773 = vmatpush.msra.mxu1 %v3361_v59  ;;  %2818 = vmatpush.msra.mxu2 %v2803_v24 }
 0x5b2   : > { %2774 = vmatpush.msra.mxu1 %v3360_v36  ;;  %2819 = vmatpush.msra.mxu2 %v2802_v22 }
 0x5b4   : > { %2775 = vmatpush.msra.mxu1 %v3359_v29  ;;  %2820 = vmatpush.msra.mxu2 %v2801_v19 }
 0x5b6   : > { %2776 = vmatpush.msra.mxu1 %v3358_v51  ;;  %2821 = vmatpush.msra.mxu2 %v2800_v40 }
 0x5b8   : > { %2777 = vmatpush.msra.mxu1 %v3357_v20  ;;  %2822 = vmatpush.msra.mxu2 %v2799_v26 }
 0x5ba   : > { %2778 = vmatpush.msra.mxu1 %v3356_v25  ;;  %2823 = vmatpush.msra.mxu2 %v2798_v53 }
 0x5bc   : > { %2779 = vmatpush.msra.mxu1 %v3355_v4  ;;  %2824 = vmatpush.msra.mxu2 %v2797_v7 }
 0x5be   : > { %2780 = vmatpush.msra.mxu1 %v3354_v6  ;;  %2825 = vmatpush.msra.mxu2 %v2796_v11 }
 0x5c0   : > { %2781 = vmatpush.msra.mxu1 %v3353_v41  ;;  %2826 = vmatpush.msra.mxu2 %v2795_v0 }
 0x5c1   : > { %3369 = vmatmul.msk.f32.vlgmr.msra.gmra.mxu1 %vm5736_vm7, %v2747_v61 }
 0x5c2   : > { %2827 = vmatpush.msra.mxu2 %v2794_v18 }
 0x5c4   : > { %2828 = vmatpush.msra.mxu2 %v2793_v60 }
 0x61e   : > { %v2486_v56 = vpop.f32.mrf.mxu1 }
 0x620   : > { %v2586_v46 = vpop.f32.mrf.mxu0 }
 0x625   : > { %v2506_v45 = vpop.f32.mrf.mxu2 }
 0x626   : > { %v2507_v35 = vadd.f32 %v2506_v45, %v2486_v56  ;;  %v2547_v27 = vpop.f32.mrf.mxu3  ;;  %v2625_v8 = vpop.f32.mrf.mxu1 }
 0x628   : > { %v2550_v43 = vadd.f32 %v2547_v27, %v2507_v35  ;;  %v2743_v23 = vpop.f32.mrf.mxu0 }
 0x62a   : > { %v2589_v58 = vadd.f32 %v2586_v46, %v2550_v43 }
 0x62c   : > { %v2628_v9 = vadd.f32 %v2625_v8, %v2589_v58 }
 0x62d   : > { %v2665_v12 = vpop.f32.mrf.mxu2 }
 0x62e   : > { %v2668_v62 = vadd.f32 %v2665_v12, %v2628_v9  ;;  %v2704_v13 = vpop.f32.mrf.mxu3 }
 0x630   : > { %v2707_v30 = vadd.f32 %v2704_v13, %v2668_v62 }
 0x632   : > { %v2746_v16 = vadd.f32 %v2743_v23, %v2707_v30 }
 0x63e   : > { %v2783_v38 = vpop.f32.mrf.mxu1 }
 0x63f   : > { %v2786_v2 = vadd.f32 %v2783_v38, %v2746_v16 }
 0x641   : > { %v2791_v55 = vadd.f32 %v3418_v33, %v2786_v2 }
 0x643   : > { %v2792_v31 = vmax.f32 %v2791_v55, 0.0 }
 0x645   : > { %2829 = vmatmul.f32.vlgmr.msra.gmra.mxu2 %v2792_v31 }
 0x6c8   : > { %v2830_v52 = vpop.f32.mrf.mxu2 }
 0x6c9   : > { %v2831_v54 = vadd.f32 %v3419_v44, %v2830_v52 }
 0x6cb   : > { %2834 = vst.msk [vmem:[%s460_s22] sm:$0xf] %vm2833_vm8, %v2831_v54 }
 0x6cc   : > { %3449 = shalt.err (!%p3446_p3)
}
 0x6cd   : > { %3375 = dma.vmem_to_hbm [thread:$0]  (%p3600_p5), %s2849_s20, 64, %s2851_s15, %s2836_s19  }
 0x6ce PF: > { %s5956_s21 = sld [smem:[#allocation6_spill]]  ;;  %p3381_p4 = scmp.ge.s32.totalorder %s3484_s16, 2 }
 0x6d0   : > { %p3378_p7 = pnand %p3381_p4, %p3604_p6 }
 0x6d2   : > { %p3379_p8 = pneg %p3378_p7 }
 0x6d4   : > { %s2862_s24 = sand.u32 1, %s5956_s21  }
 0x6d5   : > { %s2863_s22 = scalar_lea.sflag [#allocation4], %s2862_s24 }
 0x6d6   : > { %3467 = dma.done.wait (%p3379_p8), %s2863_s22, 64  }
 0x6d7   : > { %3469 = vsyncadd (%p3379_p8), %s2863_s22, 4294967232  ;;  %s5958_s16 = sld [smem:[#allocation8_spill]]  ;;  %s5961_s29 = smov %s3476_s30 }
 0x6d8   : > { %s5959_s0 = sld [smem:[#allocation7_spill]] }
 0x6d9   : > { %s5960_s15 = sld [smem:[#allocation9_spill]] }
 0x6dd   : > { %p24_p9 = scmp.ge.s32.totalorder %s5958_s16, 4  }
 0x6de   : > { %s5962_s30 = smov %s5959_s0 }
 0x6df   :  { %26 = sbr.rel (!%p24_p9) target bundleno = 5 (0x5), region = 135 }
 0x6e4   :  { %2869 = vsyncpa [#allocation4], 1 }
 0x6e5   :  { %2871 = vsyncpa [#allocation4 + $0x1], 1 }

</bundles_post_ra>
